<compile_context>
chip_gen: v5e
topology: v5e:2x2
jax: 0.10.0
libtpu: 0.0.40
codegen_flags: <defaults>
</compile_context>

<pallas_src>
import math
import functools

import jax
import jax.numpy as jnp
from jax import lax
from jax.experimental import pallas as pl
from jax.experimental.pallas import tpu as pltpu


def _round_up(x, m):
    return (x + m - 1) // m * m


# ----------------------------------------------------------------------------
# Fused Pallas kernel: act fake-quant + single-contraction conv + bias.
#   x_ref    : (Hp, Wp, C)       zero-padded NHWC activation (one image), f32
#   w_ref    : (KH*KW*C, O_pad)  pre-clamped weights, contraction-major (kh,kw,c), bf16
#   scale_ref, zp_ref : (1,1,C)  per-input-channel activation quant params, f32
#   isc_ref  : (1, Wp, C)        1/scale with the column-padding validity folded in, f32
#   bias_ref : (1, O_pad)        f32
#   o_ref    : (toh*OW, O_pad)   output rows of this block, f32
# ----------------------------------------------------------------------------
def _fused_qconv_kernel(x_ref, w_ref, scale_ref, zp_ref, isc_ref, bias_ref, o_ref,
                        *, a_bit, KH, KW, toh, OW, sh, sw, ph, H):
    j = pl.program_id(1)
    blk_rows = toh * sh
    row0 = pl.multiple_of(j * blk_rows, blk_rows)   # first padded input row of this block
    TH = (KH - 1) + toh * sh                        # padded input rows needed by the block

    # ---- per-channel asymmetric activation fake-quant (once per block) ----
    x = x_ref[pl.ds(row0, TH), :, :]                # (TH, Wp, C) f32
    half = 2.0 ** (a_bit - 1)
    q = jnp.round(scale_ref[...] * x - zp_ref[...])
    q = jnp.clip(q, -half, half - 1.0)              # == 0.5*(|-q-n| - |q-(n-1)| - 1)
    # isc_ref already contains inv_scale * column-validity, so padded columns land at 0
    # (PyTorch quantizes BEFORE zero-padding; quant(0) != 0 in general).
    xq = (q + zp_ref[...]) * isc_ref[...]           # (TH, Wp, C)

    # Zero the top/bottom padding rows: a (TH,1,1)-sized iota/compare + one broadcast mul
    # (the per-step (TH,Wp)-sized mask of v1 is gone).
    ridx = row0 + lax.broadcasted_iota(jnp.int32, (TH, 1, 1), 0)
    rvalid = ((ridx >= ph) & (ridx < ph + H)).astype(xq.dtype)
    xq = xq * rvalid
    # TODO(synk): for C < 128 the quant math above runs on C of the 128 lanes; a Wp*C
    # lane-dense layout would fix that but needs a lane-splitting relayout before the tap
    # extraction below, which is not worth it while the kernel is MXU-bound.

    # ---- build the (R, KH*KW*C) patch matrix once, then ONE MXU contraction ----
    taps = []
    for kh in range(KH):
        if sh == 1:
            rows = xq[kh:kh + toh]                                     # (toh, Wp, C)
        else:
            # strided row-tap selection (rows kh + sh*t) via a leading-dim reshape; exact.
            rows = xq[kh:kh + toh * sh].reshape(toh, sh, *xq.shape[1:])[:, 0]
        for kw in range(KW):
            if sw == 1:
                taps.append(rows[:, kw:kw + OW, :])                    # (toh, OW, C)
            else:
                t = rows[:, kw:kw + OW * sw, :]
                taps.append(t.reshape(toh, OW, sw, t.shape[-1])[:, :, 0, :])
    patch = jnp.concatenate(taps, axis=-1)                             # (toh, OW, KH*KW*C)
    R = toh * OW
    patch = patch.reshape(R, patch.shape[-1]).astype(jnp.bfloat16)

    acc = jnp.dot(patch, w_ref[...], preferred_element_type=jnp.float32)   # (R, O_pad)
    o_ref[...] = (acc + bias_ref[...]).astype(o_ref.dtype)


def _pick_row_block(OH, OW, O_pad, acc_budget_bytes=512 * 1024):
    """Largest row-block toh (divisor of OH) whose f32 accumulator R*O_pad*4 fits the
    VMEM budget, with R = toh*OW a multiple of 8 (lowering rule / store occupancy)."""
    max_rows = max(acc_budget_bytes // (O_pad * 4), 8)
    divs = [t for t in range(1, OH + 1) if OH % t == 0]
    ok = [t for t in divs if t * OW <= max_rows and (t * OW) % 8 == 0]
    if ok:
        return max(ok)
    ok8 = [t for t in divs if (t * OW) % 8 == 0]
    if ok8:
        return min(ok8)          # smallest legal block if even that exceeds the budget
    return OH                    # R == OH*OW equals the full output dim (always legal)


# ----------------------------------------------------------------------------
# Forward wrapper
# ----------------------------------------------------------------------------
def qconv2d_forward(x, weight, bias, wmin, wmax, alpha_activ, groups_range,
                    a_bit=8, stride=(1, 1), padding=(1, 1)):
    # x: (N, C, H, W)   weight: (O, C, KH, KW)   (groups == 1, dilation == 1)
    # TODO(synk): groups > 1, dilation and the stateful calibration path (_calibrate /
    # GroupWise_Quantizaion / lp_loss search / index_seq bookkeeping) are training-time
    # state and are not implemented here.
    N, C, H, W = x.shape
    O, _, KH, KW = weight.shape
    sh, sw = stride
    ph, pw = padding

    # activation range = softmax(alpha_activ[0], dim=0)-weighted mixture of group ranges
    mix = jax.nn.softmax(alpha_activ[0].astype(jnp.float32), axis=0)       # (G, C)
    act_min = jnp.sum(groups_range[0, :, 0:1] * mix, axis=0)               # (C,)
    act_max = jnp.sum(groups_range[0, :, 1:2] * mix, axis=0)               # (C,)
    n_levels = 2.0 ** a_bit - 1.0
    scale = n_levels / jnp.maximum(act_max - act_min, 1e-8)
    zp = jnp.round(scale * act_min) + 2.0 ** (a_bit - 1)
    inv_scale = 1.0 / scale

    # Padded NHWC activation (layout only; the fake-quant itself runs inside the kernel).
    # stride>1 needs sh-1 / sw-1 extra (masked) pad rows/cols for the in-kernel strided
    # tap selection.
    # TODO(synk): keep activations NHWC across adjacent layers to drop this transpose.
    eh, ew = (sh - 1 if sh > 1 else 0), (sw - 1 if sw > 1 else 0)
    x_nhwc = jnp.transpose(x, (0, 2, 3, 1)).astype(jnp.float32)
    xp = jnp.pad(x_nhwc, ((0, 0), (ph, ph + eh), (pw, pw + ew), (0, 0)))
    Hp, Wp = H + 2 * ph + eh, W + 2 * pw + ew
    OH = (H + 2 * ph - KH) // sh + 1
    OW = (W + 2 * pw - KW) // sw + 1

    # Pre-clamped weights folded to a single (KH*KW*C, O_pad) contraction operand
    # (ordering (kh, kw, c) matches the kernel's tap concatenation), bf16 MXU feed.
    # O_pad: 128 for small O; multiples of 256 once O > 128 (v6e/v7x MXU width; a 128
    # multiple is equally fine on v5e).
    O_pad = 128 if O <= 128 else _round_up(O, 256)
    K = KH * KW * C
    wq = jnp.clip(weight, wmin[:, None, None, None], wmax[:, None, None, None])
    wq = jnp.transpose(wq, (2, 3, 1, 0)).reshape(K, O)
    wq = jnp.pad(wq, ((0, 0), (0, O_pad - O))).astype(jnp.bfloat16)
    bias_p = jnp.pad(bias.astype(jnp.float32), (0, O_pad - O)).reshape(1, O_pad)

    # Column-padding validity folded into inv_scale (free inside the kernel).
    col_valid = ((jnp.arange(Wp) >= pw) & (jnp.arange(Wp) < pw + W)).astype(jnp.float32)
    isc = (col_valid[:, None] * inv_scale[None, :]).reshape(1, Wp, C)

    toh = _pick_row_block(OH, OW, O_pad)
    J = OH // toh
    R = toh * OW
    TH = (KH - 1) + toh * sh

    # Explicit VMEM budget (double-buffered image + outputs, single-buffered constants,
    # in-kernel patch/accumulator temporaries) with headroom; capped at v7x's 64 MiB.
    # TODO(synk): for large feature maps switch the image BlockSpec to a halo row-block
    # (or a manual double-buffered DMA) instead of keeping the whole padded image resident.
    footprint = (Hp * Wp * C * 4 * 2              # image (changes with n -> double-buffered)
                 + K * O_pad * 2                  # weights (single-buffered)
                 + (2 * C + Wp * C + O_pad) * 4   # quant params + bias
                 + R * O_pad * 4 * 2              # output block (double-buffered)
                 + TH * Wp * C * 4 * 3            # quantized-block temporaries
                 + R * K * 6 + R * O_pad * 4)     # patch (f32 + bf16) + accumulator
    vmem_bytes = int(min(max(1.5 * footprint + (4 << 20), 32 << 20), 64 << 20))

    kernel = functools.partial(_fused_qconv_kernel, a_bit=a_bit, KH=KH, KW=KW,
                               toh=toh, OW=OW, sh=sh, sw=sw, ph=ph, H=H)

    def _const_spec(shape, index_map):
        # Grid-constant operands: single-buffer when the API supports it (saves VMEM,
        # their index_map never changes so prefetch depth buys nothing).
        if hasattr(pl, "Buffered"):
            try:
                return pl.BlockSpec(shape, index_map, pipeline_mode=pl.Buffered(1))
            except (TypeError, ValueError):
                pass
        return pl.BlockSpec(shape, index_map)

    out = pl.pallas_call(
        kernel,
        out_shape=jax.ShapeDtypeStruct((N, OH * OW, O_pad), jnp.float32),
        grid_spec=pltpu.PrefetchScalarGridSpec(
            num_scalar_prefetch=0,
            grid=(N, J),
            in_specs=[
                pl.BlockSpec((None, Hp, Wp, C), lambda n, j: (n, 0, 0, 0)),
                _const_spec((K, O_pad), lambda n, j: (0, 0)),
                _const_spec((1, 1, C), lambda n, j: (0, 0, 0)),
                _const_spec((1, 1, C), lambda n, j: (0, 0, 0)),
                _const_spec((1, Wp, C), lambda n, j: (0, 0, 0)),
                _const_spec((1, O_pad), lambda n, j: (0, 0)),
            ],
            out_specs=pl.BlockSpec((None, R, O_pad), lambda n, j: (n, j, 0)),
        ),
        compiler_params=pltpu.CompilerParams(
            dimension_semantics=("parallel", "parallel"),
            vmem_limit_bytes=vmem_bytes),
    )(xp,
      wq,
      scale.reshape(1, 1, C).astype(jnp.float32),
      zp.reshape(1, 1, C).astype(jnp.float32),
      isc.astype(jnp.float32),
      bias_p)

    out = out.reshape(N, OH, OW, O_pad)[..., :O]
    # TODO(synk): return NHWC directly when the consumer accepts it; this transpose is
    # pure layout glue to match the PyTorch NCHW contract.
    return jnp.transpose(out, (0, 3, 1, 2))


# ----------------------------------------------------------------------------
# Pure-JAX reference (mirrors the PyTorch math) for verification
# ----------------------------------------------------------------------------
def reference(x, weight, bias, wmin, wmax, alpha_activ, groups_range,
              a_bit=8, stride=(1, 1), padding=(1, 1)):
    mix = jax.nn.softmax(alpha_activ[0], axis=0)
    act_min = jnp.sum(groups_range[0, :, 0:1] * mix, axis=0)
    act_max = jnp.sum(groups_range[0, :, 1:2] * mix, axis=0)
    n_levels = 2.0 ** a_bit - 1.0
    scale = n_levels / jnp.maximum(act_max - act_min, 1e-8)
    zp = jnp.round(scale * act_min) + 2.0 ** (a_bit - 1)

    xt = jnp.swapaxes(x, 1, -1)                                        # (N, W, H, C)
    q = jnp.round(scale * xt - zp)
    n = 2.0 ** (a_bit - 1)
    q = 0.5 * (jnp.abs(-q - n) - jnp.abs(q - (n - 1.0)) - 1.0)
    xq = jnp.swapaxes((q + zp) / scale, 1, -1)

    wt = jnp.swapaxes(weight, 0, -1)                                   # (KW, C, KH, O)
    wq = 0.5 * (jnp.abs(-wt + wmin) - jnp.abs(wt - wmax) + wmin + wmax)
    wq = jnp.swapaxes(wq, 0, -1)

    out = lax.conv_general_dilated(
        xq, wq, window_strides=stride,
        padding=[(padding[0], padding[0]), (padding[1], padding[1])],
        dimension_numbers=("NCHW", "OIHW", "NCHW"),
        precision=lax.Precision.HIGHEST)
    return out + bias[None, :, None, None]


if __name__ == "__main__":
    # Small, QConv2d-consistent shapes
    N, C_in, H, W = 2, 8, 16, 16
    C_out, KH, KW = 16, 3, 3
    stride, padding = (1, 1), (1, 1)
    a_bit = 8
    len_seq, group_num = 4, 8       # sequence of 4 timesteps, 8 range groups

    key = jax.random.PRNGKey(0)
    kw_key, kb_key, kx_key = jax.random.split(key, 3)

    # Conv parameters (kaiming_uniform_(a=sqrt(5)) -> U(-1/sqrt(fan_in), 1/sqrt(fan_in)))
    fan_in = C_in * KH * KW
    bound = 1.0 / math.sqrt(fan_in)
    weight = jax.random.uniform(kw_key, (C_out, C_in, KH, KW),
                                minval=-bound, maxval=bound, dtype=jnp.float32)
    bias = jax.random.uniform(kb_key, (C_out,), minval=-bound, maxval=bound,
                              dtype=jnp.float32)
    x = jax.random.normal(kx_key, (N, C_in, H, W), dtype=jnp.float32)

    # QModule buffers (deterministic synthetic calibration values; the module's
    # zero-initialized ranges would collapse the quantizer).
    alpha_activ = jnp.full((len_seq, group_num, C_in), 0.01, dtype=jnp.float32)
    g = jnp.arange(group_num, dtype=jnp.float32)
    groups_range = jnp.broadcast_to(
        jnp.stack([-4.0 + 0.25 * g, 2.0 + 0.5 * g], axis=1)[None],
        (len_seq, group_num, 2)).astype(jnp.float32)
    oc = jnp.arange(C_out, dtype=jnp.float32)
    weight_range_min = -(0.06 + 0.004 * oc)
    weight_range_max = (0.06 + 0.004 * oc)

    out = qconv2d_forward(x, weight, bias, weight_range_min, weight_range_max,
                          alpha_activ, groups_range, a_bit, stride, padding)
    out = jax.block_until_ready(out)

    ref = reference(x, weight, bias, weight_range_min, weight_range_max,
                    alpha_activ, groups_range, a_bit, stride, padding)
    ref = jax.block_until_ready(ref)

    assert out.shape == (N, C_out, H, W), out.shape
    assert jnp.allclose(out, ref, rtol=2e-2, atol=2e-2), \
        float(jnp.max(jnp.abs(out - ref)))
    print("KERNEL_OK")
</pallas_src>

<mosaic_0001>
module attributes {stable_mosaic.version = 11 : i64} {
  func.func @_fused_qconv_kernel(%arg0: i32, %arg1: i32, %arg2: memref<1x18x18x8xf32, #tpu.memory_space<vmem>>, %arg3: memref<72x128xbf16, #tpu.memory_space<vmem>>, %arg4: memref<1x1x8xf32, #tpu.memory_space<vmem>>, %arg5: memref<1x1x8xf32, #tpu.memory_space<vmem>>, %arg6: memref<1x18x8xf32, #tpu.memory_space<vmem>>, %arg7: memref<1x128xf32, #tpu.memory_space<vmem>>, %arg8: memref<1x256x128xf32, #tpu.memory_space<vmem>>) attributes {dimension_semantics = [#tpu.dimension_semantics<parallel>, #tpu.dimension_semantics<parallel>], iteration_bounds = array<i64: 2, 1>, scalar_prefetch = 0 : i64, scratch_operands = 0 : i64, tpu.core_type = #tpu.core_type<tc>, window_params = [{transform_indices = @transform_0, window_bounds = array<i64: 1, 18, 18, 8>}, {pipeline_mode = #tpu.pipeline_mode<synchronous>, transform_indices = @transform_1, window_bounds = array<i64: 72, 128>}, {pipeline_mode = #tpu.pipeline_mode<synchronous>, transform_indices = @transform_2, window_bounds = array<i64: 1, 1, 8>}, {pipeline_mode = #tpu.pipeline_mode<synchronous>, transform_indices = @transform_3, window_bounds = array<i64: 1, 1, 8>}, {pipeline_mode = #tpu.pipeline_mode<synchronous>, transform_indices = @transform_4, window_bounds = array<i64: 1, 18, 8>}, {pipeline_mode = #tpu.pipeline_mode<synchronous>, transform_indices = @transform_5, window_bounds = array<i64: 1, 128>}, {transform_indices = @transform_6, window_bounds = array<i64: 1, 256, 128>}]} {
    %c16_i32 = arith.constant 16 : i32
    %0 = arith.muli %arg1, %c16_i32 : i32
    %1 = tpu.assume_multiple %0, 16 : i32
    %c0 = arith.constant 0 : index
    %2 = arith.index_cast %1 : i32 to index
    %c0_0 = arith.constant 0 : index
    %c0_1 = arith.constant 0 : index
    %3 = vector.load %arg2[%c0, %2, %c0_0, %c0_1] : memref<1x18x18x8xf32, #tpu.memory_space<vmem>>, vector<1x18x18x8xf32>
    %4 = vector.shape_cast %3 : vector<1x18x18x8xf32> to vector<18x18x8xf32>
    %c0_2 = arith.constant 0 : index
    %c0_3 = arith.constant 0 : index
    %c0_4 = arith.constant 0 : index
    %5 = vector.load %arg4[%c0_2, %c0_3, %c0_4] : memref<1x1x8xf32, #tpu.memory_space<vmem>>, vector<1x1x8xf32>
    %6 = vector.broadcast %5 : vector<1x1x8xf32> to vector<18x18x8xf32>
    %7 = arith.mulf %6, %4 : vector<18x18x8xf32>
    %c0_5 = arith.constant 0 : index
    %c0_6 = arith.constant 0 : index
    %c0_7 = arith.constant 0 : index
    %8 = vector.load %arg5[%c0_5, %c0_6, %c0_7] : memref<1x1x8xf32, #tpu.memory_space<vmem>>, vector<1x1x8xf32>
    %9 = vector.broadcast %8 : vector<1x1x8xf32> to vector<18x18x8xf32>
    %10 = arith.subf %7, %9 : vector<18x18x8xf32>
    %11 = math.roundeven %10 : vector<18x18x8xf32>
    %cst = arith.constant -1.280000e+02 : f32
    %cst_8 = arith.constant 1.270000e+02 : f32
    %12 = vector.broadcast %cst : f32 to vector<18x18x8xf32>
    %13 = arith.maximumf %12, %11 : vector<18x18x8xf32>
    %14 = vector.broadcast %cst_8 : f32 to vector<18x18x8xf32>
    %15 = arith.minimumf %14, %13 : vector<18x18x8xf32>
    %c0_9 = arith.constant 0 : index
    %c0_10 = arith.constant 0 : index
    %c0_11 = arith.constant 0 : index
    %16 = vector.load %arg5[%c0_9, %c0_10, %c0_11] : memref<1x1x8xf32, #tpu.memory_space<vmem>>, vector<1x1x8xf32>
    %17 = vector.broadcast %16 : vector<1x1x8xf32> to vector<18x18x8xf32>
    %18 = arith.addf %15, %17 : vector<18x18x8xf32>
    %c0_12 = arith.constant 0 : index
    %c0_13 = arith.constant 0 : index
    %c0_14 = arith.constant 0 : index
    %19 = vector.load %arg6[%c0_12, %c0_13, %c0_14] : memref<1x18x8xf32, #tpu.memory_space<vmem>>, vector<1x18x8xf32>
    %20 = vector.broadcast %19 : vector<1x18x8xf32> to vector<18x18x8xf32>
    %21 = arith.mulf %18, %20 : vector<18x18x8xf32>
    %22 = tpu.iota {dimensions = array<i32: 0>} : vector<18x1x1xi32>
    %23 = vector.broadcast %1 : i32 to vector<18x1x1xi32>
    %24 = arith.addi %23, %22 : vector<18x1x1xi32>
    %c1_i32 = arith.constant 1 : i32
    %25 = vector.broadcast %c1_i32 : i32 to vector<18x1x1xi32>
    %26 = arith.cmpi sge, %24, %25 : vector<18x1x1xi32>
    %c17_i32 = arith.constant 17 : i32
    %27 = vector.broadcast %c17_i32 : i32 to vector<18x1x1xi32>
    %28 = arith.cmpi slt, %24, %27 : vector<18x1x1xi32>
    %29 = arith.andi %26, %28 : vector<18x1x1xi1>
    %30 = arith.extui %29 : vector<18x1x1xi1> to vector<18x1x1xi32>
    %31 = arith.sitofp %30 : vector<18x1x1xi32> to vector<18x1x1xf32>
    %32 = vector.broadcast %31 : vector<18x1x1xf32> to vector<18x18x8xf32>
    %33 = arith.mulf %21, %32 : vector<18x18x8xf32>
    %34 = vector.extract_strided_slice %33 {offsets = [0, 0, 0], sizes = [16, 18, 8], strides = [1, 1, 1]} : vector<18x18x8xf32> to vector<16x18x8xf32>
    %35 = vector.extract_strided_slice %34 {offsets = [0, 0, 0], sizes = [16, 16, 8], strides = [1, 1, 1]} : vector<16x18x8xf32> to vector<16x16x8xf32>
    %36 = vector.extract_strided_slice %34 {offsets = [0, 1, 0], sizes = [16, 16, 8], strides = [1, 1, 1]} : vector<16x18x8xf32> to vector<16x16x8xf32>
    %37 = vector.extract_strided_slice %34 {offsets = [0, 2, 0], sizes = [16, 16, 8], strides = [1, 1, 1]} : vector<16x18x8xf32> to vector<16x16x8xf32>
    %38 = vector.extract_strided_slice %33 {offsets = [1, 0, 0], sizes = [16, 18, 8], strides = [1, 1, 1]} : vector<18x18x8xf32> to vector<16x18x8xf32>
    %39 = vector.extract_strided_slice %38 {offsets = [0, 0, 0], sizes = [16, 16, 8], strides = [1, 1, 1]} : vector<16x18x8xf32> to vector<16x16x8xf32>
    %40 = vector.extract_strided_slice %38 {offsets = [0, 1, 0], sizes = [16, 16, 8], strides = [1, 1, 1]} : vector<16x18x8xf32> to vector<16x16x8xf32>
    %41 = vector.extract_strided_slice %38 {offsets = [0, 2, 0], sizes = [16, 16, 8], strides = [1, 1, 1]} : vector<16x18x8xf32> to vector<16x16x8xf32>
    %42 = vector.extract_strided_slice %33 {offsets = [2, 0, 0], sizes = [16, 18, 8], strides = [1, 1, 1]} : vector<18x18x8xf32> to vector<16x18x8xf32>
    %43 = vector.extract_strided_slice %42 {offsets = [0, 0, 0], sizes = [16, 16, 8], strides = [1, 1, 1]} : vector<16x18x8xf32> to vector<16x16x8xf32>
    %44 = vector.extract_strided_slice %42 {offsets = [0, 1, 0], sizes = [16, 16, 8], strides = [1, 1, 1]} : vector<16x18x8xf32> to vector<16x16x8xf32>
    %45 = vector.extract_strided_slice %42 {offsets = [0, 2, 0], sizes = [16, 16, 8], strides = [1, 1, 1]} : vector<16x18x8xf32> to vector<16x16x8xf32>
    %46 = tpu.concatenate %35, %36, %37, %39, %40, %41, %43, %44, %45 in 2 : vector<16x16x8xf32>, vector<16x16x8xf32>, vector<16x16x8xf32>, vector<16x16x8xf32>, vector<16x16x8xf32>, vector<16x16x8xf32>, vector<16x16x8xf32>, vector<16x16x8xf32>, vector<16x16x8xf32> -> vector<16x16x72xf32>
    %47 = vector.shape_cast %46 : vector<16x16x72xf32> to vector<256x72xf32>
    %48 = arith.truncf %47 : vector<256x72xf32> to vector<256x72xbf16>
    %c0_15 = arith.constant 0 : index
    %c0_16 = arith.constant 0 : index
    %49 = vector.load %arg3[%c0_15, %c0_16] : memref<72x128xbf16, #tpu.memory_space<vmem>>, vector<72x128xbf16>
    %cst_17 = arith.constant dense<0.000000e+00> : vector<256x128xf32>
    %50 = tpu.matmul %48, %49, %cst_17 {dimension_numbers = #tpu.dot_dimension_numbers<[1], [0], [0], [1], [0, 0, 1, 1], [], []>} : vector<256x72xbf16>, vector<72x128xbf16>, vector<256x128xf32> -> vector<256x128xf32>
    %c0_18 = arith.constant 0 : index
    %c0_19 = arith.constant 0 : index
    %51 = vector.load %arg7[%c0_18, %c0_19] : memref<1x128xf32, #tpu.memory_space<vmem>>, vector<1x128xf32>
    %52 = vector.broadcast %51 : vector<1x128xf32> to vector<256x128xf32>
    %53 = arith.addf %50, %52 : vector<256x128xf32>
    %c0_20 = arith.constant 0 : index
    %c0_21 = arith.constant 0 : index
    %c0_22 = arith.constant 0 : index
    %54 = vector.load %arg8[%c0_20, %c0_21, %c0_22] : memref<1x256x128xf32, #tpu.memory_space<vmem>>, vector<1x256x128xf32>
    %55 = vector.shape_cast %54 : vector<1x256x128xf32> to vector<256x128xf32>
    %56 = vector.shape_cast %53 : vector<256x128xf32> to vector<1x256x128xf32>
    tpu.vector_store %arg8[%c0_20, %c0_21, %c0_22], %56 {strides = array<i32>} : memref<1x256x128xf32, #tpu.memory_space<vmem>>, vector<1x256x128xf32>,
    return
  }
  func.func @transform_0(%arg0: i32, %arg1: i32) -> (i32, i32, i32, i32) {
    %c0_i32 = arith.constant 0 : i32
    %c0_i32_0 = arith.constant 0 : i32
    %c0_i32_1 = arith.constant 0 : i32
    %c0_i32_2 = arith.constant 0 : i32
    return %arg0, %c0_i32, %c0_i32_0, %c0_i32_1 : i32, i32, i32, i32
  }
  func.func @transform_1(%arg0: i32, %arg1: i32) -> (i32, i32) {
    %c0_i32 = arith.constant 0 : i32
    %c0_i32_0 = arith.constant 0 : i32
    %c0_i32_1 = arith.constant 0 : i32
    return %c0_i32, %c0_i32_0 : i32, i32
  }
  func.func @transform_2(%arg0: i32, %arg1: i32) -> (i32, i32, i32) {
    %c0_i32 = arith.constant 0 : i32
    %c0_i32_0 = arith.constant 0 : i32
    %c0_i32_1 = arith.constant 0 : i32
    %c0_i32_2 = arith.constant 0 : i32
    return %c0_i32, %c0_i32_0, %c0_i32_1 : i32, i32, i32
  }
  func.func @transform_3(%arg0: i32, %arg1: i32) -> (i32, i32, i32) {
    %c0_i32 = arith.constant 0 : i32
    %c0_i32_0 = arith.constant 0 : i32
    %c0_i32_1 = arith.constant 0 : i32
    %c0_i32_2 = arith.constant 0 : i32
    return %c0_i32, %c0_i32_0, %c0_i32_1 : i32, i32, i32
  }
  func.func @transform_4(%arg0: i32, %arg1: i32) -> (i32, i32, i32) {
    %c0_i32 = arith.constant 0 : i32
    %c0_i32_0 = arith.constant 0 : i32
    %c0_i32_1 = arith.constant 0 : i32
    %c0_i32_2 = arith.constant 0 : i32
    return %c0_i32, %c0_i32_0, %c0_i32_1 : i32, i32, i32
  }
  func.func @transform_5(%arg0: i32, %arg1: i32) -> (i32, i32) {
    %c0_i32 = arith.constant 0 : i32
    %c0_i32_0 = arith.constant 0 : i32
    %c0_i32_1 = arith.constant 0 : i32
    return %c0_i32, %c0_i32_0 : i32, i32
  }
  func.func @transform_6(%arg0: i32, %arg1: i32) -> (i32, i32, i32) {
    %c0_i32 = arith.constant 0 : i32
    %c0_i32_0 = arith.constant 0 : i32
    return %arg0, %arg1, %c0_i32 : i32, i32, i32
  }
}

</mosaic_0001>

<bundles_post_ra>
// kernel: tpu_custom_call.1
= control target key start
LH: loop header
LB: loop body
LE: loop exit
PB: predicated region body
PF: predicated region fallthrough
CT: control target
= control target key end

     0   :  { %11 = vsyncpa [#allocation3], 0  ;;  %s6104_s0 = inlined_call_operand.vmem [shape: f32[2,18,18,8], index: 0, kind: input, shape index: {}]   ;;  %s6105_s1 = inlined_call_operand.vmem [shape: bf16[72,128], index: 1, kind: input, shape index: {}]   ;;  %s6106_s2 = inlined_call_operand.vmem [shape: f32[1,1,8], index: 2, kind: input, shape index: {}]   ;;  %s6107_s3 = inlined_call_operand.vmem [shape: f32[1,1,8], index: 3, kind: input, shape index: {}]   ;;  %s6108_s4 = inlined_call_operand.vmem [shape: f32[1,18,8], index: 4, kind: input, shape index: {}]   ;;  %s6109_s5 = inlined_call_operand.vmem [shape: f32[1,128], index: 5, kind: input, shape index: {}]   ;;  %s6110_s6 = inlined_call_operand.hbm [shape: f32[2,256,128], index: 6, kind: output, shape index: {}]  }
   0x1   :  { %13 = vsyncpa [#allocation3 + $0x1], 0  ;;  %s3804_s21 = smov 0   ;;  %s3806_s22 = smov 0  }
   0x2   :  { %s3808_s23 = smov 0   ;;  %s3810_s24 = smov 0  }
   0x3   :  { %s3812_s25 = smov 0   ;;  %s3814_s26 = smov 0  }
   0x4 LB: > { %s2465_s27 = sadd.s32 4294967295, %s3758_s26   ;;  %s2466_s28 = sadd.s32 4294967294, %s3758_s26   ;;  %s3758_s26 = sphi %s3814_s26, %s19_s26   ;;  %s3754_s25 = sphi %s3812_s25, %s6444_s25   ;;  %s3750_s24 = sphi %s3810_s24, %s6443_s24   ;;  %s3746_s23 = sphi %s3808_s23, %s6442_s23   ;;  %s3742_s22 = sphi %s3806_s22, %s6441_s22   ;;  %s3738_s21 = sphi %s3804_s21, %s6440_s21  }
   0x5   : > { %s31_s29 = sadd.s32 1, %s3754_s25  ;;  %s171_s30 = sadd.s32 1, %s3746_s23 }
   0x6   : > { %p33_p0 = scmp.ge.s32.totalorder %s31_s29, 2  ;;  %p181_p1 = scmp.ne.s32.totalorder %s3746_s23, %s3742_s22 }
   0x7   : > { %p182_p2 = scmp.eq.s32.totalorder %s2465_s27, 1  ;;  %p187_p3 = scmp.ne.s32.totalorder %s3742_s22, %s3738_s21 }
   0x8   : > { %s6446_s29 = smov (%p33_p0, %s31_s29), 0  ;;  %p188_p5 = scmp.eq.s32.totalorder %s2466_s28, 1 }
   0x9   : > { %p3844_p4 = por %p182_p2, %p181_p1  ;;  %s166_s8 = ssub.s32 %s3754_s25, %s6446_s29 }
   0xa   : > { %p2469_p6 = scmp.ge.s32.totalorder %s3758_s26, 1  ;;  %p169_p7 = scmp.eq.s32.totalorder %s166_s8, 0 }
   0xb   : > { %p3851_p8 = por %p188_p5, %p187_p3  ;;  %p229_p9 = scmp.lt.s32.totalorder %s3758_s26, 3 }
   0xc   : > { %s3857_s10 = scalar_select %p169_p7, %s3746_s23, %s171_s30  }
   0xd   : > { %p230_p10 = pnand %p2469_p6, %p229_p9 }
   0xf   : > { %233 = sbr.rel (%p230_p10) target bundleno = 792 (0x318), region = 44 }
  0x14   : > { %p259_p11 = scmp.lt.s32.totalorder %s3750_s24, 1  ;;  %v3864_v0 = vld [vmem:[%s6106_s2] ss:$0 sm:$0xff]  ;;  %vm922_vm5 = vcmask 1046528   ;;  %s3761_s8 = smov 16  }
  0x15   : > { %v3874_v1 = vld [vmem:[%s6107_s3] ss:$0 sm:$0xff]  ;;  %s3763_s13 = smov 32   ;;  %s3764_s16 = smov 40  }
  0x16   : > { %s260_s11 = scalar_select %p259_p11, %s3750_s24, 1 }
  0x17   : > { %s3765_s20 = smov 48   ;;  %s3766_s27 = smov 64  }
  0x18   : > { %s2529_s12 = smul.u32 432, %s260_s11  ;;  %s3762_s11 = smov 24  }
  0x19   : > { %s3767_s28 = smov 56   ;;  %s3700_s18 = scalar_lea.hbm %s6110_s6, 512 }
  0x1a   : > { %s3869_s17 = scalar_lea.vmem %s6104_s0, %s2529_s12  ;;  %s3760_s12 = smov 8  }
  0x1b   : > { %v281_v2 = vld [vmem:[%s3869_s17 + $0x60] sm:$0xff]  ;;  %v282_v3 = vld [vmem:[%s3869_s17 + $0x68] sm:$0xff]  ;;  %v283_v4 = vld [vmem:[%s3869_s17 + $0x70] sm:$0x3] }
  0x1c   : > { %v339_v5 = vmul.f32 %v3864_v0, %v281_v2  ;;  %v340_v6 = vmul.f32 %v3864_v0, %v282_v3  ;;  %v341_v7 = vmul.f32 %v3864_v0, %v283_v4  ;;  %v275_v8 = vld [vmem:[%s3869_s17 + $0x30] sm:$0xff]  ;;  %v276_v9 = vld [vmem:[%s3869_s17 + $0x38] sm:$0xff]  ;;  %v277_v10 = vld [vmem:[%s3869_s17 + $0x40] sm:$0x3] }
  0x1d   : > { %v333_v11 = vmul.f32 %v3864_v0, %v275_v8  ;;  %v334_v12 = vmul.f32 %v3864_v0, %v276_v9  ;;  %v335_v13 = vmul.f32 %v3864_v0, %v277_v10  ;;  %v272_v14 = vld [vmem:[%s3869_s17 + $0x18] sm:$0xff]  ;;  %v273_v15 = vld [vmem:[%s3869_s17 + $0x20] sm:$0xff]  ;;  %v274_v60 = vld [vmem:[%s3869_s17 + $0x28] sm:$0x3] }
  0x1e   : > { %v397_v16 = vsub.f32 %v339_v5, %v3874_v1  ;;  %v398_v17 = vsub.f32 %v340_v6, %v3874_v1  ;;  %v399_v18 = vsub.f32 %v341_v7, %v3874_v1  ;;  %v330_v19 = vmul.f32 %v3864_v0, %v272_v14  ;;  %v286_v6 = vld [vmem:[%s3869_s17 + $0x88] sm:$0x3] }
  0x1f   : > { %v3895_v20 = vsub.f32 %v333_v11, %v3874_v1  ;;  %v3898_v21 = vsub.f32 %v334_v12, %v3874_v1  ;;  %v3901_v22 = vsub.f32 %v335_v13, %v3874_v1  ;;  %v3904_v23 = vmul.f32 %v3864_v0, %v273_v15  ;;  %v3950_v13 = vld [vmem:[%s6108_s4] sm:$0xff] }
  0x20   : > { %v2626_v24 = vand.u32 2147483647, %v397_v16  ;;  %v2628_v25 = vcvt.f32.s32 %v397_v16  ;;  %v2631_v26 = vand.u32 2147483648, %v397_v16  ;;  %v2634_v27 = vand.u32 2147483647, %v398_v17 }
  0x21   : > { %v2636_v28 = vcvt.f32.s32 %v398_v17  ;;  %v2639_v29 = vand.u32 2147483648, %v398_v17  ;;  %v2642_v30 = vand.u32 2147483647, %v399_v18  ;;  %v2644_v31 = vcvt.f32.s32 %v399_v18 }
  0x22   : > { %vm3906_vm0 = vcmp.lt.f32.partialorder %v2626_v24, 8388608.0  ;;  %v2629_v33 = vcvt.s32.f32 %v2628_v25  ;;  %vm3910_vm1 = vcmp.lt.f32.partialorder %v2634_v27, 8388608.0  ;;  %v2647_v35 = vand.u32 2147483648, %v399_v18 }
  0x23   : > { %v2637_v36 = vcvt.s32.f32 %v2636_v28  ;;  %vm3914_vm2 = vcmp.lt.f32.partialorder %v2642_v30, 8388608.0  ;;  %v2645_v38 = vcvt.s32.f32 %v2644_v31  ;;  %v2578_v39 = vand.u32 2147483647, %v3895_v20 }
  0x24   : > { %v2630_v40 = vand.u32 2147483647, %v2629_v33  ;;  %v2580_v41 = vcvt.f32.s32 %v3895_v20  ;;  %v2583_v42 = vand.u32 2147483648, %v3895_v20  ;;  %v2586_v43 = vand.u32 2147483647, %v3898_v21 }
  0x25   : > { %v2638_v44 = vand.u32 2147483647, %v2637_v36  ;;  %v2646_v45 = vand.u32 2147483647, %v2645_v38  ;;  %vm3922_vm3 = vcmp.lt.f32.partialorder %v2578_v39, 8388608.0  ;;  %v2588_v47 = vcvt.f32.s32 %v3898_v21 }
  0x26   : > { %v2632_v48 = vor.u32 %v2631_v26, %v2630_v40  ;;  %v2581_v49 = vcvt.s32.f32 %v2580_v41  ;;  %vm3927_vm4 = vcmp.lt.f32.partialorder %v2586_v43, 8388608.0  ;;  %v2591_v51 = vand.u32 2147483648, %v3898_v21 }
  0x27   : > { %v2640_v52 = vor.u32 %v2639_v29, %v2638_v44  ;;  %v2648_v53 = vor.u32 %v2647_v35, %v2646_v45  ;;  %v2589_v54 = vcvt.s32.f32 %v2588_v47  ;;  %v2594_v55 = vand.u32 2147483647, %v3901_v22 }
  0x28   : > { %v2633_v56 = vsel %vm3906_vm0, %v2632_v48, %v397_v16  ;;  %v2582_v57 = vand.u32 2147483647, %v2581_v49  ;;  %v2596_v58 = vcvt.f32.s32 %v3901_v22  ;;  %v2599_v59 = vand.u32 2147483648, %v3901_v22 }
  0x29   : > { %v2641_v61 = vsel %vm3910_vm1, %v2640_v52, %v398_v17  ;;  %v2649_v62 = vsel %vm3914_vm2, %v2648_v53, %v399_v18  ;;  %v505_v63 = vmax.f32 %v2633_v56, -128.0  ;;  %v2590_v2 = vand.u32 2147483647, %v2589_v54  ;;  %v3962_v17 = vld [vmem:[%s6108_s4 + $0x8] sm:$0xff]  ;;  %v3967_v18 = vld [vmem:[%s6108_s4 + $0x10] sm:$0x3] }
  0x2a   : > { %v506_v3 = vmax.f32 %v2641_v61, -128.0  ;;  %v507_v4 = vmax.f32 %v2649_v62, -128.0  ;;  %v2584_v5 = vor.u32 %v2583_v42, %v2582_v57  ;;  %vm3942_vm6 = vcmp.lt.f32.partialorder %v2594_v55, 8388608.0 }
  0x2b   : > { %v559_v7 = vmin.f32 %v505_v63, 127.0  ;;  %v2592_v8 = vor.u32 %v2591_v51, %v2590_v2  ;;  %v2597_v9 = vcvt.s32.f32 %v2596_v58  ;;  %v332_v10 = vmul.f32 %v3864_v0, %v274_v60  ;;  %v284_v58 = vld [vmem:[%s3869_s17 + $0x78] sm:$0xff]  ;;  %v285_v63 = vld [vmem:[%s3869_s17 + $0x80] sm:$0xff]  ;;  %v287_v60 = vld [vmem:[%s3869_s17 + $0x90] sm:$0xff] }
  0x2c   : > { %v560_v11 = vmin.f32 %v506_v3, 127.0  ;;  %v561_v12 = vmin.f32 %v507_v4, 127.0  ;;  %v2585_v14 = vsel %vm3922_vm3, %v2584_v5, %v3895_v20  ;;  %v3956_v15 = vsub.f32 %v330_v19, %v3874_v1 }
  0x2d   : > { %v613_v16 = vadd.f32 %v3874_v1, %v559_v7  ;;  %v2593_v24 = vsel %vm3927_vm4, %v2592_v8, %v3898_v21  ;;  %v2598_v20 = vand.u32 2147483647, %v2597_v9  ;;  %v499_v25 = vmax.f32 %v2585_v14, -128.0  ;;  %v278_v7 = vld [vmem:[%s3869_s17 + $0x48] sm:$0xff] }
  0x2e   : > { %v614_v19 = vadd.f32 %v3874_v1, %v560_v11  ;;  %v615_v26 = vadd.f32 %v3874_v1, %v561_v12  ;;  %v500_v27 = vmax.f32 %v2593_v24, -128.0  ;;  %v3976_v28 = vsub.f32 %v3904_v23, %v3874_v1 }
  0x2f   : > { %v3979_v29 = vmul.f32 %v3950_v13, %v613_v16  ;;  %v2600_v30 = vor.u32 %v2599_v59, %v2598_v20  ;;  %v553_v31 = vmin.f32 %v499_v25, 127.0  ;;  %v3982_v32 = vsub.f32 %v332_v10, %v3874_v1 }
  0x30   : > { %v3985_v21 = vmul.f32 %v3962_v17, %v614_v19  ;;  %v3988_v33 = vmul.f32 %v3967_v18, %v615_v26  ;;  %v554_v34 = vmin.f32 %v500_v27, 127.0  ;;  %v2554_v35 = vand.u32 2147483647, %v3956_v15 }
  0x31   : > { %6214 = vst [vmem:[#allocation5_spill] sm:$0xff] %v3979_v29  ;;  %v943_v23 = vrot.slane %v3979_v29, 1  ;;  %v2601_v36 = vsel %vm3942_vm6, %v2600_v30, %v3901_v22  ;;  %v607_v37 = vadd.f32 %v3874_v1, %v553_v31  ;;  %v2556_v38 = vcvt.f32.s32 %v3956_v15 }
  0x32   : > { %6215 = vst [vmem:[#allocation6_spill] sm:$0xff] %v3985_v21  ;;  %v944_v39 = vrot.slane %v3985_v21, 1  ;;  %v946_v40 = vrot.slane %v3988_v33, 1  ;;  %v501_v41 = vmax.f32 %v2601_v36, -128.0  ;;  %v608_v42 = vadd.f32 %v3874_v1, %v554_v34 }
  0x33   : > { %v4001_v43 = vmul.f32 %v3950_v13, %v607_v37  ;;  %vm4003_vm7 = vcmp.lt.f32.partialorder %v2554_v35, 8388608.0  ;;  %v2557_v22 = vcvt.s32.f32 %v2556_v38  ;;  %v2559_v45 = vand.u32 2147483648, %v3956_v15 }
  0x34   : > { %v945_v46 = vsel %vm922_vm5, %v943_v23, %v944_v39  ;;  %v947_v47 = vsel %vm922_vm5, %v944_v39, %v946_v40  ;;  %v555_v48 = vmin.f32 %v501_v41, 127.0  ;;  %v4011_v49 = vmul.f32 %v3962_v17, %v608_v42 }
  0x35   : > { %v4013_v50 = vpack.i.bf16 %v947_v47, %v945_v46  ;;  %v933_v51 = vrot.slane %v4001_v43, 1  ;;  %v2558_v52 = vand.u32 2147483647, %v2557_v22  ;;  %v2562_v53 = vand.u32 2147483647, %v3976_v28 }
  0x36   : > { %v609_v54 = vadd.f32 %v3874_v1, %v555_v48  ;;  %v934_v55 = vrot.slane %v4011_v49, 1  ;;  %v2564_v56 = vcvt.f32.s32 %v3976_v28  ;;  %v2567_v57 = vand.u32 2147483648, %v3976_v28 }
  0x37   : > { %6218 = vst [vmem:[#allocation7_spill] sm:$0xff] %v4013_v50  ;;  %3042 = vrot.lane.b32.xlu2 %v4013_v50, %s3760_s12  ;;  %v2560_v59 = vor.u32 %v2559_v45, %v2558_v52  ;;  %vm4024_vm8 = vcmp.lt.f32.partialorder %v2562_v53, 8388608.0  ;;  %v2570_v61 = vand.u32 2147483647, %v3982_v32  ;;  %v2572_v62 = vcvt.f32.s32 %v3982_v32  ;;  %v279_v53 = vld [vmem:[%s3869_s17 + $0x50] sm:$0xff] }
  0x38   : > { %v4032_v2 = vmul.f32 %v3967_v18, %v609_v54  ;;  %v935_v3 = vsel %vm922_vm5, %v933_v51, %v934_v55  ;;  %v2565_v4 = vcvt.s32.f32 %v2564_v56  ;;  %v2575_v5 = vand.u32 2147483648, %v3982_v32 }
  0x39   : > { %v2561_v8 = vsel %vm4003_vm7, %v2560_v59, %v3956_v15  ;;  %vm4041_vm9 = vcmp.lt.f32.partialorder %v2570_v61, 8388608.0  ;;  %v2573_v10 = vcvt.s32.f32 %v2572_v62  ;;  %v342_v11 = vmul.f32 %v3864_v0, %v284_v58  ;;  %v280_v58 = vld [vmem:[%s3869_s17 + $0x58] sm:$0x3] }
  0x3a   : > { %v936_v12 = vrot.slane %v4032_v2, 1  ;;  %v2566_v14 = vand.u32 2147483647, %v2565_v4  ;;  %v496_v16 = vmax.f32 %v2561_v8, -128.0  ;;  %v343_v24 = vmul.f32 %v3864_v0, %v285_v63 }
  0x3b   : > { %v2574_v20 = vand.u32 2147483647, %v2573_v10  ;;  %v344_v25 = vmul.f32 %v3864_v0, %v286_v6  ;;  %v400_v19 = vsub.f32 %v342_v11, %v3874_v1  ;;  %v336_v15 = vmul.f32 %v3864_v0, %v278_v7 }
  0x3c   : > { %v937_v26 = vsel %vm922_vm5, %v934_v55, %v936_v12  ;;  %v2568_v27 = vor.u32 %v2567_v57, %v2566_v14  ;;  %v550_v30 = vmin.f32 %v496_v16, 127.0  ;;  %v401_v31 = vsub.f32 %v343_v24, %v3874_v1 }
  0x3d   : > { %v4053_v34 = vpack.i.bf16 %v937_v26, %v935_v3  ;;  %v2576_v35 = vor.u32 %v2575_v5, %v2574_v20  ;;  %v402_v23 = vsub.f32 %v344_v25, %v3874_v1  ;;  %v2650_v36 = vand.u32 2147483647, %v400_v19 }
  0x3e   : > { %v2569_v37 = vsel %vm4024_vm8, %v2568_v27, %v3976_v28  ;;  %v604_v38 = vadd.f32 %v3874_v1, %v550_v30  ;;  %v2652_v39 = vcvt.f32.s32 %v400_v19  ;;  %v2655_v40 = vand.u32 2147483648, %v400_v19 }
  0x3f   : > { %6223 = vst [vmem:[#allocation8_spill] sm:$0xff] %v4053_v34  ;;  %3032 = vrot.lane.b32.xlu1 %v4053_v34, %s3760_s12  ;;  %v2577_v41 = vsel %vm4041_vm9, %v2576_v35, %v3982_v32  ;;  %v497_v42 = vmax.f32 %v2569_v37, -128.0  ;;  %vm4065_vm10 = vcmp.lt.f32.partialorder %v2650_v36, 8388608.0  ;;  %v2658_v22 = vand.u32 2147483647, %v401_v31 }
  0x40   : > { %v498_v28 = vmax.f32 %v2577_v41, -128.0  ;;  %v4070_v45 = vmul.f32 %v3950_v13, %v604_v38  ;;  %v2653_v46 = vcvt.s32.f32 %v2652_v39  ;;  %v2660_v47 = vcvt.f32.s32 %v401_v31 }
  0x41   : > { %v551_v48 = vmin.f32 %v497_v42, 127.0  ;;  %vm4072_vm11 = vcmp.lt.f32.partialorder %v2658_v22, 8388608.0  ;;  %v2663_v52 = vand.u32 2147483648, %v401_v31  ;;  %v2666_v32 = vand.u32 2147483647, %v402_v23 }
  0x42   : > { %6226 = vst [vmem:[#allocation9_spill] sm:$0xff] %v4070_v45  ;;  %v552_v54 = vmin.f32 %v498_v28, 127.0  ;;  %v928_v55 = vrot.slane %v4070_v45, 1  ;;  %v2654_v56 = vand.u32 2147483647, %v2653_v46  ;;  %v2661_v57 = vcvt.s32.f32 %v2660_v47 }
  0x43   : > { %v605_v59 = vadd.f32 %v3874_v1, %v551_v48  ;;  %vm4080_vm12 = vcmp.lt.f32.partialorder %v2666_v32, 8388608.0  ;;  %v2668_v61 = vcvt.f32.s32 %v402_v23  ;;  %v2671_v62 = vand.u32 2147483648, %v402_v23 }
  0x44   : > { %v606_v63 = vadd.f32 %v3874_v1, %v552_v54  ;;  %v2656_v3 = vor.u32 %v2655_v40, %v2654_v56  ;;  %v2662_v4 = vand.u32 2147483647, %v2661_v57  ;;  %v337_v5 = vmul.f32 %v3864_v0, %v279_v53 }
  0x45   : > { %v4087_v6 = vmul.f32 %v3962_v17, %v605_v59  ;;  %v2669_v7 = vcvt.s32.f32 %v2668_v61  ;;  %v338_v8 = vmul.f32 %v3864_v0, %v280_v58  ;;  %v394_v9 = vsub.f32 %v336_v15, %v3874_v1  ;;  %v288_v61 = vld [vmem:[%s3869_s17 + $0x98] sm:$0xff] }
  0x46   : > { %v4092_v10 = vmul.f32 %v3967_v18, %v606_v63  ;;  %v2657_v11 = vsel %vm4065_vm10, %v2656_v3, %v400_v19  ;;  %v2664_v12 = vor.u32 %v2663_v52, %v2662_v4  ;;  %v4097_v14 = vsub.f32 %v337_v5, %v3874_v1 }
  0x47   : > { %6231 = vst [vmem:[#allocation10_spill] sm:$0xff] %v4087_v6  ;;  %v929_v16 = vrot.slane %v4087_v6, 1  ;;  %v2670_v24 = vand.u32 2147483647, %v2669_v7  ;;  %v508_v20 = vmax.f32 %v2657_v11, -128.0  ;;  %v4101_v25 = vsub.f32 %v338_v8, %v3874_v1 }
  0x48   : > { %v931_v26 = vrot.slane %v4092_v10, 1  ;;  %v2665_v15 = vsel %vm4072_vm11, %v2664_v12, %v401_v31  ;;  %v2602_v27 = vand.u32 2147483647, %v394_v9  ;;  %v2604_v30 = vcvt.f32.s32 %v394_v9 }
  0x49   : > { %v930_v19 = vsel %vm922_vm5, %v928_v55, %v929_v16  ;;  %v2672_v35 = vor.u32 %v2671_v62, %v2670_v24  ;;  %v509_v36 = vmax.f32 %v2665_v15, -128.0  ;;  %v562_v37 = vmin.f32 %v508_v20, 127.0  ;;  %v289_v62 = vld [vmem:[%s3869_s17 + $0xa0] sm:$0x3] }
  0x4a   : > { %v932_v38 = vsel %vm922_vm5, %v929_v16, %v931_v26  ;;  %vm4108_vm13 = vcmp.lt.f32.partialorder %v2602_v27, 8388608.0  ;;  %v2605_v40 = vcvt.s32.f32 %v2604_v30  ;;  %v2607_v41 = vand.u32 2147483648, %v394_v9  ;;  %v293_v15 = vld [vmem:[%s3869_s17 + $0xc0] sm:$0xff] }
  0x4b   : > { %v4112_v42 = vpack.i.bf16 %v932_v38, %v930_v19  ;;  %v2673_v31 = vsel %vm4080_vm12, %v2672_v35, %v402_v23  ;;  %v563_v44 = vmin.f32 %v509_v36, 127.0  ;;  %v616_v28 = vadd.f32 %v3874_v1, %v562_v37 }
  0x4c   : > { %v510_v22 = vmax.f32 %v2673_v31, -128.0  ;;  %v2606_v46 = vand.u32 2147483647, %v2605_v40  ;;  %v2610_v47 = vand.u32 2147483647, %v4097_v14  ;;  %v2612_v51 = vcvt.f32.s32 %v4097_v14 }
  0x4d   : > { %6234 = vst [vmem:[#allocation11_spill] sm:$0xff] %v4112_v42  ;;  %3027 = vrot.lane.b32.xlu0 %v4112_v42, %s3760_s12  ;;  %v617_v48 = vadd.f32 %v3874_v1, %v563_v44  ;;  %v2615_v52 = vand.u32 2147483648, %v4097_v14  ;;  %v2618_v23 = vand.u32 2147483647, %v4101_v25  ;;  %v4125_v53 = vmul.f32 %v3950_v13, %v616_v28 }
  0x4e   : > { %v564_v32 = vmin.f32 %v510_v22, 127.0  ;;  %v2608_v54 = vor.u32 %v2607_v41, %v2606_v46  ;;  %vm4127_vm14 = vcmp.lt.f32.partialorder %v2610_v47, 8388608.0  ;;  %v2613_v57 = vcvt.s32.f32 %v2612_v51 }
  0x4f   : > { %v4132_v56 = vmul.f32 %v3962_v17, %v617_v48  ;;  %vm4134_vm15 = vcmp.lt.f32.partialorder %v2618_v23, 8388608.0  ;;  %v2620_v59 = vcvt.f32.s32 %v4101_v25  ;;  %v948_v3 = vrot.slane %v4125_v53, 1 }
  0x50   : > { %v618_v63 = vadd.f32 %v3874_v1, %v564_v32  ;;  %v2609_v4 = vsel %vm4108_vm13, %v2608_v54, %v394_v9  ;;  %v2623_v5 = vand.u32 2147483648, %v4101_v25  ;;  %v2614_v8 = vand.u32 2147483647, %v2613_v57 }
  0x51   : > { %v949_v7 = vrot.slane %v4132_v56, 1  ;;  %v2621_v11 = vcvt.s32.f32 %v2620_v59  ;;  %v502_v12 = vmax.f32 %v2609_v4, -128.0  ;;  %v345_v24 = vmul.f32 %v3864_v0, %v287_v60  ;;  %v295_v59 = vld [vmem:[%s3869_s17 + $0xd0] sm:$0x3] }
  0x52   : > { %v4149_v16 = vmul.f32 %v3967_v18, %v618_v63  ;;  %v346_v20 = vmul.f32 %v3864_v0, %v288_v61  ;;  %v347_v26 = vmul.f32 %v3864_v0, %v289_v62  ;;  %v2616_v9 = vor.u32 %v2615_v52, %v2614_v8 }
  0x53   : > { %v950_v27 = vsel %vm922_vm5, %v948_v3, %v949_v7  ;;  %v2622_v30 = vand.u32 2147483647, %v2621_v11  ;;  %v556_v19 = vmin.f32 %v502_v12, 127.0  ;;  %v403_v36 = vsub.f32 %v345_v24, %v3874_v1  ;;  %v294_v3 = vld [vmem:[%s3869_s17 + $0xc8] sm:$0xff] }
  0x54   : > { %v951_v35 = vrot.slane %v4149_v16, 1  ;;  %v404_v37 = vsub.f32 %v346_v20, %v3874_v1  ;;  %v4160_v38 = vsub.f32 %v347_v26, %v3874_v1  ;;  %v2617_v39 = vsel %vm4127_vm14, %v2616_v9, %v4097_v14  ;;  %v290_v20 = vld [vmem:[%s3869_s17 + $0xa8] sm:$0xff] }
  0x55   : > { %v2624_v40 = vor.u32 %v2623_v5, %v2622_v30  ;;  %v610_v41 = vadd.f32 %v3874_v1, %v556_v19  ;;  %v351_v31 = vmul.f32 %v3864_v0, %v293_v15  ;;  %v503_v22 = vmax.f32 %v2617_v39, -128.0 }
  0x56   : > { %v952_v44 = vsel %vm922_vm5, %v949_v7, %v951_v35  ;;  %v2674_v28 = vand.u32 2147483647, %v403_v36  ;;  %v2676_v46 = vcvt.f32.s32 %v403_v36  ;;  %v2679_v14 = vand.u32 2147483648, %v403_v36 }
  0x57   : > { %v4168_v47 = vpack.i.bf16 %v952_v44, %v950_v27  ;;  %v2625_v48 = vsel %vm4134_vm15, %v2624_v40, %v4101_v25  ;;  %v4174_v51 = vmul.f32 %v3950_v13, %v610_v41  ;;  %v557_v23 = vmin.f32 %v503_v22, 127.0 }
  0x58   : > { %v504_v52 = vmax.f32 %v2625_v48, -128.0  ;;  %vm4176_vm0 = vcmp.lt.f32.partialorder %v2674_v28, 8388608.0  ;;  %v2677_v54 = vcvt.s32.f32 %v2676_v46  ;;  %v2682_v57 = vand.u32 2147483647, %v404_v37 }
  0x59   : > { %6239 = vst [vmem:[#allocation12_spill] sm:$0xff] %v4168_v47  ;;  %3047 = vrot.lane.b32.xlu2 %v4168_v47, %s3760_s12  ;;  %v938_v55 = vrot.slane %v4174_v51, 1  ;;  %v2684_v58 = vcvt.f32.s32 %v404_v37  ;;  %v2687_v25 = vand.u32 2147483648, %v404_v37  ;;  %v611_v61 = vadd.f32 %v3874_v1, %v557_v23 }
  0x5a   : > { %v558_v60 = vmin.f32 %v504_v52, 127.0  ;;  %v2678_v62 = vand.u32 2147483647, %v2677_v54  ;;  %v2690_v63 = vand.u32 2147483647, %v4160_v38  ;;  %vm4187_vm1 = vcmp.lt.f32.partialorder %v2682_v57, 8388608.0 }
  0x5b   : > { %v2685_v5 = vcvt.s32.f32 %v2684_v58  ;;  %v2692_v7 = vcvt.f32.s32 %v4160_v38  ;;  %v2695_v8 = vand.u32 2147483648, %v4160_v38  ;;  %v4195_v12 = vmul.f32 %v3962_v17, %v611_v61 }
  0x5c   : > { %v612_v11 = vadd.f32 %v3874_v1, %v558_v60  ;;  %v2680_v24 = vor.u32 %v2679_v14, %v2678_v62  ;;  %vm4197_vm2 = vcmp.lt.f32.partialorder %v2690_v63, 8388608.0  ;;  %v352_v27 = vmul.f32 %v3864_v0, %v294_v3 }
  0x5d   : > { %v2686_v26 = vand.u32 2147483647, %v2685_v5  ;;  %v2693_v15 = vcvt.s32.f32 %v2692_v7  ;;  %v353_v9 = vmul.f32 %v3864_v0, %v295_v59  ;;  %v939_v19 = vrot.slane %v4195_v12, 1 }
  0x5e   : > { %v4204_v30 = vmul.f32 %v3967_v18, %v612_v11  ;;  %v2681_v35 = vsel %vm4176_vm0, %v2680_v24, %v403_v36  ;;  %v409_v39 = vsub.f32 %v351_v31, %v3874_v1  ;;  %v410_v22 = vsub.f32 %v352_v27, %v3874_v1 }
  0x5f   : > { %v2688_v40 = vor.u32 %v2687_v25, %v2686_v26  ;;  %v2694_v41 = vand.u32 2147483647, %v2693_v15  ;;  %v511_v44 = vmax.f32 %v2681_v35, -128.0  ;;  %v940_v28 = vsel %vm922_vm5, %v938_v55, %v939_v19  ;;  %v291_v26 = vld [vmem:[%s3869_s17 + $0xb0] sm:$0xff] }
  0x60   : > { %v941_v46 = vrot.slane %v4204_v30, 1  ;;  %v4214_v48 = vsub.f32 %v353_v9, %v3874_v1  ;;  %v2722_v14 = vand.u32 2147483647, %v409_v39  ;;  %v2724_v32 = vcvt.f32.s32 %v409_v39 }
  0x61   : > { %v2689_v52 = vsel %vm4187_vm1, %v2688_v40, %v404_v37  ;;  %v2696_v23 = vor.u32 %v2695_v8, %v2694_v41  ;;  %v565_v36 = vmin.f32 %v511_v44, 127.0  ;;  %v2727_v55 = vand.u32 2147483648, %v409_v39 }
  0x62   : > { %v942_v31 = vsel %vm922_vm5, %v939_v19, %v941_v46  ;;  %v512_v54 = vmax.f32 %v2689_v52, -128.0  ;;  %vm4219_vm3 = vcmp.lt.f32.partialorder %v2722_v14, 8388608.0  ;;  %v2725_v59 = vcvt.s32.f32 %v2724_v32 }
  0x63   : > { %v4223_v58 = vpack.i.bf16 %v942_v31, %v940_v28  ;;  %v2697_v25 = vsel %vm4197_vm2, %v2696_v23, %v4160_v38  ;;  %v619_v37 = vadd.f32 %v3874_v1, %v565_v36  ;;  %v2730_v62 = vand.u32 2147483647, %v410_v22  ;;  %v292_v28 = vld [vmem:[%s3869_s17 + $0xb8] sm:$0x3] }
  0x64   : > { %v513_v60 = vmax.f32 %v2697_v25, -128.0  ;;  %v566_v61 = vmin.f32 %v512_v54, 127.0  ;;  %v2732_v63 = vcvt.f32.s32 %v410_v22  ;;  %v2726_v4 = vand.u32 2147483647, %v2725_v59 }
  0x65   : > { %6248 = vst [vmem:[#allocation13_spill] sm:$0xff] %v4223_v58  ;;  %3037 = vrot.lane.b32.xlu1 %v4223_v58, %s3760_s12  ;;  %v4232_v3 = vmul.f32 %v3950_v13, %v619_v37  ;;  %v2735_v5 = vand.u32 2147483648, %v410_v22  ;;  %v2738_v38 = vand.u32 2147483647, %v4214_v48  ;;  %vm4236_vm4 = vcmp.lt.f32.partialorder %v2730_v62, 8388608.0 }
  0x66   : > { %v567_v7 = vmin.f32 %v513_v60, 127.0  ;;  %v620_v8 = vadd.f32 %v3874_v1, %v566_v61  ;;  %v2733_v24 = vcvt.s32.f32 %v2732_v63  ;;  %v2728_v27 = vor.u32 %v2727_v55, %v2726_v4 }
  0x67   : > { %v953_v15 = vrot.slane %v4232_v3, 1  ;;  %vm4243_vm6 = vcmp.lt.f32.partialorder %v2738_v38, 8388608.0  ;;  %v2740_v19 = vcvt.f32.s32 %v4214_v48  ;;  %v2743_v44 = vand.u32 2147483648, %v4214_v48 }
  0x68   : > { %v621_v35 = vadd.f32 %v3874_v1, %v567_v7  ;;  %v4250_v40 = vmul.f32 %v3962_v17, %v620_v8  ;;  %v2734_v41 = vand.u32 2147483647, %v2733_v24  ;;  %v2729_v46 = vsel %vm4219_vm3, %v2728_v27, %v409_v39 }
  0x69   : > { %v2741_v14 = vcvt.s32.f32 %v2740_v19  ;;  %v348_v52 = vmul.f32 %v3864_v0, %v290_v20  ;;  %v349_v23 = vmul.f32 %v3864_v0, %v291_v26  ;;  %v517_v54 = vmax.f32 %v2729_v46, -128.0 }
  0x6a   : > { %v4259_v36 = vmul.f32 %v3967_v18, %v621_v35  ;;  %v954_v32 = vrot.slane %v4250_v40, 1  ;;  %v2736_v31 = vor.u32 %v2735_v5, %v2734_v41  ;;  %v350_v25 = vmul.f32 %v3864_v0, %v292_v28  ;;  %v296_v28 = vld [vmem:[%s3869_s17 + $0xd8] sm:$0xff] }
  0x6b   : > { %v2742_v55 = vand.u32 2147483647, %v2741_v14  ;;  %v406_v37 = vsub.f32 %v348_v52, %v3874_v1  ;;  %v4265_v57 = vsub.f32 %v349_v23, %v3874_v1  ;;  %v571_v61 = vmin.f32 %v517_v54, 127.0 }
  0x6c   : > { %v955_v39 = vsel %vm922_vm5, %v953_v15, %v954_v32  ;;  %v956_v59 = vrot.slane %v4259_v36, 1  ;;  %v2737_v60 = vsel %vm4236_vm4, %v2736_v31, %v410_v22  ;;  %v408_v4 = vsub.f32 %v350_v25, %v3874_v1 }
  0x6d   : > { %v2744_v62 = vor.u32 %v2743_v44, %v2742_v55  ;;  %v518_v63 = vmax.f32 %v2737_v60, -128.0  ;;  %v2698_v5 = vand.u32 2147483647, %v406_v37  ;;  %v625_v7 = vadd.f32 %v3874_v1, %v571_v61 }
  0x6e   : > { %v957_v38 = vsel %vm922_vm5, %v954_v32, %v956_v59  ;;  %v2700_v8 = vcvt.f32.s32 %v406_v37  ;;  %v2703_v24 = vand.u32 2147483648, %v406_v37  ;;  %v2706_v35 = vand.u32 2147483647, %v4265_v57  ;;  %v297_v32 = vld [vmem:[%s3869_s17 + $0xe0] sm:$0xff] }
  0x6f   : > { %v4274_v20 = vpack.i.bf16 %v957_v38, %v955_v39  ;;  %v2745_v11 = vsel %vm4243_vm6, %v2744_v62, %v4214_v48  ;;  %v572_v22 = vmin.f32 %v518_v63, 127.0  ;;  %vm4279_vm7 = vcmp.lt.f32.partialorder %v2698_v5, 8388608.0  ;;  %v298_v39 = vld [vmem:[%s3869_s17 + $0xe8] sm:$0x3] }
  0x70   : > { %v519_v15 = vmax.f32 %v2745_v11, -128.0  ;;  %v4284_v27 = vmul.f32 %v3950_v13, %v625_v7  ;;  %v2701_v19 = vcvt.s32.f32 %v2700_v8  ;;  %v2708_v48 = vcvt.f32.s32 %v4265_v57 }
  0x71   : > { %6253 = vst [vmem:[#allocation14_spill] sm:$0xff] %v4274_v20  ;;  %3052 = vrot.lane.b32.xlu0 %v4274_v20, %s3760_s12  ;;  %v626_v9 = vadd.f32 %v3874_v1, %v572_v22  ;;  %v2711_v41 = vand.u32 2147483648, %v4265_v57  ;;  %v2714_v44 = vand.u32 2147483647, %v408_v4  ;;  %vm4294_vm8 = vcmp.lt.f32.partialorder %v2706_v35, 8388608.0 }
  0x72   : > { %6256 = vst [vmem:[#allocation15_spill] sm:$0xff] %v4284_v27  ;;  %v573_v46 = vmin.f32 %v519_v15, 127.0  ;;  %v963_v14 = vrot.slane %v4284_v27, 1  ;;  %v2702_v52 = vand.u32 2147483647, %v2701_v19  ;;  %v2709_v54 = vcvt.s32.f32 %v2708_v48 }
  0x73   : > { %v4300_v31 = vmul.f32 %v3962_v17, %v626_v9  ;;  %vm4302_vm9 = vcmp.lt.f32.partialorder %v2714_v44, 8388608.0  ;;  %v2716_v25 = vcvt.f32.s32 %v408_v4  ;;  %v2719_v61 = vand.u32 2147483648, %v408_v4 }
  0x74   : > { %v627_v59 = vadd.f32 %v3874_v1, %v573_v46  ;;  %v2704_v60 = vor.u32 %v2703_v24, %v2702_v52  ;;  %v354_v62 = vmul.f32 %v3864_v0, %v296_v28  ;;  %v2710_v5 = vand.u32 2147483647, %v2709_v54 }
  0x75   : > { %6259 = vst [vmem:[#allocation16_spill] sm:$0xff] %v4300_v31  ;;  %v964_v63 = vrot.slane %v4300_v31, 1  ;;  %v2717_v38 = vcvt.s32.f32 %v2716_v25  ;;  %v355_v7 = vmul.f32 %v3864_v0, %v297_v32  ;;  %v356_v22 = vmul.f32 %v3864_v0, %v298_v39 }
  0x76   : > { %v4312_v8 = vmul.f32 %v3967_v18, %v627_v59  ;;  %v2705_v11 = vsel %vm4279_vm7, %v2704_v60, %v406_v37  ;;  %v412_v15 = vsub.f32 %v354_v62, %v3874_v1  ;;  %v2712_v19 = vor.u32 %v2711_v41, %v2710_v5 }
  0x77   : > { %v965_v24 = vsel %vm922_vm5, %v963_v14, %v964_v63  ;;  %v2718_v35 = vand.u32 2147483647, %v2717_v38  ;;  %v514_v9 = vmax.f32 %v2705_v11, -128.0  ;;  %v413_v44 = vsub.f32 %v355_v7, %v3874_v1 }
  0x78   : > { %6262 = vst [vmem:[#allocation17_spill] sm:$0xff] %v4312_v8  ;;  %v966_v48 = vrot.slane %v4312_v8, 1  ;;  %v4322_v28 = vsub.f32 %v356_v22, %v3874_v1  ;;  %v2746_v46 = vand.u32 2147483647, %v412_v15  ;;  %v2713_v37 = vsel %vm4294_vm8, %v2712_v19, %v4265_v57  ;;  %v302_v19 = vld [vmem:[%s3869_s17 + $0x108] sm:$0xff] }
  0x79   : > { %v2720_v26 = vor.u32 %v2719_v61, %v2718_v35  ;;  %v568_v52 = vmin.f32 %v514_v9, 127.0  ;;  %v2748_v32 = vcvt.f32.s32 %v412_v15  ;;  %v515_v41 = vmax.f32 %v2713_v37, -128.0  ;;  %v303_v35 = vld [vmem:[%s3869_s17 + $0x110] sm:$0xff] }
  0x7a   : > { %v967_v14 = vsel %vm922_vm5, %v964_v63, %v966_v48  ;;  %vm4328_vm10 = vcmp.lt.f32.partialorder %v2746_v46, 8388608.0  ;;  %v2751_v25 = vand.u32 2147483648, %v412_v15  ;;  %v2754_v62 = vand.u32 2147483647, %v413_v44 }
  0x7b   : > { %v4332_v39 = vpack.i.bf16 %v967_v14, %v965_v24  ;;  %v2721_v59 = vsel %vm4302_vm9, %v2720_v26, %v408_v4  ;;  %v622_v23 = vadd.f32 %v3874_v1, %v568_v52  ;;  %v2749_v57 = vcvt.s32.f32 %v2748_v32 }
  0x7c   : > { %v516_v60 = vmax.f32 %v2721_v59, -128.0  ;;  %v569_v61 = vmin.f32 %v515_v41, 127.0  ;;  %v2756_v63 = vcvt.f32.s32 %v413_v44  ;;  %v2759_v7 = vand.u32 2147483648, %v413_v44  ;;  %v304_v41 = vld [vmem:[%s3869_s17 + $0x118] sm:$0x3] }
  0x7d   : > { %6265 = vst [vmem:[#allocation18_spill] sm:$0xff] %v4332_v39  ;;  %3062 = vrot.lane.b32.xlu2 %v4332_v39, %s3760_s12  ;;  %v4340_v5 = vmul.f32 %v3950_v13, %v622_v23  ;;  %v2750_v38 = vand.u32 2147483647, %v2749_v57  ;;  %v2762_v4 = vand.u32 2147483647, %v4322_v28  ;;  %vm4344_vm11 = vcmp.lt.f32.partialorder %v2754_v62, 8388608.0 }
  0x7e   : > { %v570_v55 = vmin.f32 %v516_v60, 127.0  ;;  %v623_v11 = vadd.f32 %v3874_v1, %v569_v61  ;;  %v2757_v24 = vcvt.s32.f32 %v2756_v63  ;;  %v2764_v37 = vcvt.f32.s32 %v4322_v28 }
  0x7f   : > { %v958_v9 = vrot.slane %v4340_v5, 1  ;;  %v2752_v48 = vor.u32 %v2751_v25, %v2750_v38  ;;  %vm4351_vm12 = vcmp.lt.f32.partialorder %v2762_v4, 8388608.0  ;;  %v2767_v14 = vand.u32 2147483648, %v4322_v28 }
  0x80   : > { %v624_v26 = vadd.f32 %v3874_v1, %v570_v55  ;;  %v4358_v52 = vmul.f32 %v3962_v17, %v623_v11  ;;  %v2758_v32 = vand.u32 2147483647, %v2757_v24  ;;  %v2765_v23 = vcvt.s32.f32 %v2764_v37 }
  0x81   : > { %v2753_v59 = vsel %vm4328_vm10, %v2752_v48, %v412_v15  ;;  %v360_v25 = vmul.f32 %v3864_v0, %v302_v19  ;;  %v361_v57 = vmul.f32 %v3864_v0, %v303_v35  ;;  %v362_v4 = vmul.f32 %v3864_v0, %v304_v41 }
  0x82   : > { %v4367_v60 = vmul.f32 %v3967_v18, %v624_v26  ;;  %v959_v61 = vrot.slane %v4358_v52, 1  ;;  %v2760_v62 = vor.u32 %v2759_v7, %v2758_v32  ;;  %v520_v63 = vmax.f32 %v2753_v59, -128.0 }
  0x83   : > { %v2766_v38 = vand.u32 2147483647, %v2765_v23  ;;  %v418_v55 = vsub.f32 %v360_v25, %v3874_v1  ;;  %v4373_v54 = vsub.f32 %v361_v57, %v3874_v1  ;;  %v4380_v7 = vsub.f32 %v362_v4, %v3874_v1 }
  0x84   : > { %v960_v15 = vsel %vm922_vm5, %v958_v9, %v959_v61  ;;  %v961_v11 = vrot.slane %v4367_v60, 1  ;;  %v2761_v24 = vsel %vm4344_vm11, %v2760_v62, %v413_v44  ;;  %v574_v19 = vmin.f32 %v520_v63, 127.0 }
  0x85   : > { %v2768_v35 = vor.u32 %v2767_v14, %v2766_v38  ;;  %v521_v48 = vmax.f32 %v2761_v24, -128.0  ;;  %v2794_v37 = vand.u32 2147483647, %v418_v55  ;;  %v2796_v41 = vcvt.f32.s32 %v418_v55  ;;  %v299_v38 = vld [vmem:[%s3869_s17 + $0xf0] sm:$0xff] }
  0x86   : > { %v962_v26 = vsel %vm922_vm5, %v959_v61, %v961_v11  ;;  %v628_v32 = vadd.f32 %v3874_v1, %v574_v19  ;;  %v2799_v59 = vand.u32 2147483648, %v418_v55  ;;  %v2802_v61 = vand.u32 2147483647, %v4373_v54  ;;  %v300_v19 = vld [vmem:[%s3869_s17 + $0xf8] sm:$0xff] }
  0x87   : > { %v4384_v9 = vpack.i.bf16 %v962_v26, %v960_v15  ;;  %v2769_v44 = vsel %vm4351_vm12, %v2768_v35, %v4322_v28  ;;  %v575_v22 = vmin.f32 %v521_v48, 127.0  ;;  %vm4389_vm13 = vcmp.lt.f32.partialorder %v2794_v37, 8388608.0 }
  0x88   : > { %v522_v23 = vmax.f32 %v2769_v44, -128.0  ;;  %v4394_v25 = vmul.f32 %v3950_v13, %v628_v32  ;;  %v2797_v57 = vcvt.s32.f32 %v2796_v41  ;;  %v2804_v28 = vcvt.f32.s32 %v4373_v54  ;;  %v301_v32 = vld [vmem:[%s3869_s17 + $0x100] sm:$0x3] }
  0x89   : > { %6270 = vst [vmem:[#allocation19_spill] sm:$0xff] %v4384_v9  ;;  %3057 = vrot.lane.b32.xlu1 %v4384_v9, %s3760_s12  ;;  %v629_v46 = vadd.f32 %v3874_v1, %v575_v22  ;;  %v2807_v62 = vand.u32 2147483648, %v4373_v54  ;;  %v2810_v63 = vand.u32 2147483647, %v4380_v7  ;;  %vm4405_vm14 = vcmp.lt.f32.partialorder %v2802_v61, 8388608.0 }
  0x8a   : > { %v576_v4 = vmin.f32 %v522_v23, 127.0  ;;  %v968_v15 = vrot.slane %v4394_v25, 1  ;;  %v2798_v11 = vand.u32 2147483647, %v2797_v57  ;;  %v2805_v48 = vcvt.s32.f32 %v2804_v28 }
  0x8b   : > { %v4411_v35 = vmul.f32 %v3962_v17, %v629_v46  ;;  %vm4413_vm15 = vcmp.lt.f32.partialorder %v2810_v63, 8388608.0  ;;  %v2812_v26 = vcvt.f32.s32 %v4380_v7  ;;  %v2815_v22 = vand.u32 2147483648, %v4380_v7 }
  0x8c   : > { %v630_v41 = vadd.f32 %v3874_v1, %v576_v4  ;;  %v2800_v44 = vor.u32 %v2799_v59, %v2798_v11  ;;  %v357_v23 = vmul.f32 %v3864_v0, %v299_v38  ;;  %v2806_v61 = vand.u32 2147483647, %v2805_v48 }
  0x8d   : > { %v969_v57 = vrot.slane %v4411_v35, 1  ;;  %v2813_v46 = vcvt.s32.f32 %v2812_v26  ;;  %v358_v28 = vmul.f32 %v3864_v0, %v300_v19  ;;  %v359_v50 = vmul.f32 %v3864_v0, %v301_v32 }
  0x8e   : > { %v4425_v63 = vmul.f32 %v3967_v18, %v630_v41  ;;  %v2801_v9 = vsel %vm4389_vm13, %v2800_v44, %v418_v55  ;;  %v415_v59 = vsub.f32 %v357_v23, %v3874_v1  ;;  %v2808_v11 = vor.u32 %v2807_v62, %v2806_v61 }
  0x8f   : > { %v970_v4 = vsel %vm922_vm5, %v968_v15, %v969_v57  ;;  %v2814_v38 = vand.u32 2147483647, %v2813_v46  ;;  %v526_v39 = vmax.f32 %v2801_v9, -128.0  ;;  %v416_v26 = vsub.f32 %v358_v28, %v3874_v1 }
  0x90   : > { %v971_v48 = vrot.slane %v4425_v63, 1  ;;  %v4435_v19 = vsub.f32 %v359_v50, %v3874_v1  ;;  %v2770_v41 = vand.u32 2147483647, %v415_v59  ;;  %v2809_v55 = vsel %vm4405_vm14, %v2808_v11, %v4373_v54  ;;  %v4453_v50 = vld [vmem:[%s6107_s3] ss:$0 sm:$0xff] }
  0x91   : > { %v2816_v0 = vor.u32 %v2815_v22, %v2814_v38  ;;  %v580_v14 = vmin.f32 %v526_v39, 127.0  ;;  %v2772_v32 = vcvt.f32.s32 %v415_v59  ;;  %v527_v62 = vmax.f32 %v2809_v55, -128.0  ;;  %v306_v55 = vld [vmem:[%s3869_s17 + $0x128] sm:$0xff] }
  0x92   : > { %v972_v15 = vsel %vm922_vm5, %v969_v57, %v971_v48  ;;  %vm4441_vm0 = vcmp.lt.f32.partialorder %v2770_v41, 8388608.0  ;;  %v2775_v44 = vand.u32 2147483648, %v415_v59  ;;  %v2778_v57 = vand.u32 2147483647, %v416_v26  ;;  %v305_v41 = vld [vmem:[%s3869_s17 + $0x120] sm:$0xff] }
  0x93   : > { %v4445_v23 = vpack.i.bf16 %v972_v15, %v970_v4  ;;  %v2817_v1 = vsel %vm4413_vm15, %v2816_v0, %v4380_v7  ;;  %v634_v39 = vadd.f32 %v4453_v50, %v580_v14  ;;  %v2773_v54 = vcvt.s32.f32 %v2772_v32 }
  0x94   : > { %v528_v24 = vmax.f32 %v2817_v1, -128.0  ;;  %v581_v22 = vmin.f32 %v527_v62, 127.0  ;;  %v2780_v61 = vcvt.f32.s32 %v416_v26  ;;  %v2783_v46 = vand.u32 2147483648, %v416_v26 }
  0x95   : > { %6279 = vst [vmem:[#allocation20_spill] sm:$0xff] %v4445_v23  ;;  %3067 = vrot.lane.b32.xlu0 %v4445_v23, %s3760_s12  ;;  %v4459_v37 = vmul.f32 %v3950_v13, %v634_v39  ;;  %v2774_v7 = vand.u32 2147483647, %v2773_v54  ;;  %v2786_v28 = vand.u32 2147483647, %v4435_v19  ;;  %vm4463_vm1 = vcmp.lt.f32.partialorder %v2778_v57, 8388608.0 }
  0x96   : > { %v582_v4 = vmin.f32 %v528_v24, 127.0  ;;  %v635_v11 = vadd.f32 %v4453_v50, %v581_v22  ;;  %v2781_v48 = vcvt.s32.f32 %v2780_v61  ;;  %v2788_v15 = vcvt.f32.s32 %v4435_v19  ;;  %v307_v24 = vld [vmem:[%s3869_s17 + $0x130] sm:$0x3] }
  0x97   : > { %6280 = vst [vmem:[#allocation21_spill] sm:$0xff] %v4459_v37  ;;  %v978_v0 = vrot.slane %v4459_v37, 1  ;;  %v2776_v14 = vor.u32 %v2775_v44, %v2774_v7  ;;  %vm4470_vm2 = vcmp.lt.f32.partialorder %v2786_v28, 8388608.0  ;;  %v2791_v54 = vand.u32 2147483648, %v4435_v19  ;;  %v4486_v44 = vld [vmem:[%s6106_s2] ss:$0 sm:$0xff] }
  0x98   : > { %v636_v62 = vadd.f32 %v4453_v50, %v582_v4  ;;  %v4477_v1 = vmul.f32 %v3962_v17, %v635_v11  ;;  %v2782_v39 = vand.u32 2147483647, %v2781_v48  ;;  %v2789_v57 = vcvt.s32.f32 %v2788_v15  ;;  %6286 = vst [vmem:[#allocation23_spill] sm:$0xff] %v4486_v44 }
  0x99   : > { %v2777_v22 = vsel %vm4441_vm0, %v2776_v14, %v415_v59  ;;  %v363_v61 = vmul.f32 %v4486_v44, %v305_v41  ;;  %v364_v7 = vmul.f32 %v4486_v44, %v306_v55  ;;  %v365_v59 = vmul.f32 %v4486_v44, %v307_v24 }
  0x9a   : > { %6285 = vst [vmem:[#allocation22_spill] sm:$0xff] %v4477_v1  ;;  %v4491_v17 = vmul.f32 %v3967_v18, %v636_v62  ;;  %v979_v28 = vrot.slane %v4477_v1, 1  ;;  %v2784_v4 = vor.u32 %v2783_v46, %v2782_v39  ;;  %v523_v11 = vmax.f32 %v2777_v22, -128.0 }
  0x9b   : > { %v2790_v48 = vand.u32 2147483647, %v2789_v57  ;;  %v421_v9 = vsub.f32 %v363_v61, %v4453_v50  ;;  %v4497_v14 = vsub.f32 %v364_v7, %v4453_v50  ;;  %v4504_v46 = vsub.f32 %v365_v59, %v4453_v50  ;;  %v311_v59 = vld [vmem:[%s3869_s17 + $0x150] sm:$0xff] }
  0x9c   : > { %6287 = vst [vmem:[#allocation24_spill] sm:$0xff] %v4491_v17  ;;  %v980_v15 = vsel %vm922_vm5, %v978_v0, %v979_v28  ;;  %v981_v41 = vrot.slane %v4491_v17, 1  ;;  %v2785_v18 = vsel %vm4463_vm1, %v2784_v4, %v416_v26  ;;  %v577_v55 = vmin.f32 %v523_v11, 127.0 }
  0x9d   : > { %v2792_v62 = vor.u32 %v2791_v54, %v2790_v48  ;;  %v524_v42 = vmax.f32 %v2785_v18, -128.0  ;;  %v2818_v39 = vand.u32 2147483647, %v421_v9  ;;  %v2820_v57 = vcvt.f32.s32 %v421_v9 }
  0x9e   : > { %v982_v24 = vsel %vm922_vm5, %v979_v28, %v981_v41  ;;  %v631_v22 = vadd.f32 %v4453_v50, %v577_v55  ;;  %v2823_v61 = vand.u32 2147483648, %v421_v9  ;;  %v2826_v11 = vand.u32 2147483647, %v4497_v14  ;;  %v312_v55 = vld [vmem:[%s3869_s17 + $0x158] sm:$0xff] }
  0x9f   : > { %v4508_v0 = vpack.i.bf16 %v982_v24, %v980_v15  ;;  %v2793_v26 = vsel %vm4470_vm2, %v2792_v62, %v4435_v19  ;;  %v578_v38 = vmin.f32 %v524_v42, 127.0  ;;  %vm4513_vm3 = vcmp.lt.f32.partialorder %v2818_v39, 8388608.0  ;;  %v4537_v62 = vld [vmem:[%s6108_s4 + $0x8] sm:$0xff] }
  0xa0   : > { %v525_v7 = vmax.f32 %v2793_v26, -128.0  ;;  %v4518_v28 = vmul.f32 %v3950_v13, %v631_v22  ;;  %v2821_v4 = vcvt.s32.f32 %v2820_v57  ;;  %v2828_v42 = vcvt.f32.s32 %v4497_v14  ;;  %v313_v26 = vld [vmem:[%s3869_s17 + $0x160] sm:$0x3] }
  0xa1   : > { %6288 = vst [vmem:[#allocation25_spill] sm:$0xff] %v4508_v0  ;;  %3077 = vrot.lane.b32.xlu2 %v4508_v0, %s3760_s12  ;;  %v632_v32 = vadd.f32 %v4453_v50, %v578_v38  ;;  %v2831_v19 = vand.u32 2147483648, %v4497_v14  ;;  %v2834_v48 = vand.u32 2147483647, %v4504_v46  ;;  %vm4529_vm4 = vcmp.lt.f32.partialorder %v2826_v11, 8388608.0 }
  0xa2   : > { %v579_v15 = vmin.f32 %v525_v7, 127.0  ;;  %v973_v13 = vrot.slane %v4518_v28, 1  ;;  %v2822_v41 = vand.u32 2147483647, %v2821_v4  ;;  %v2829_v24 = vcvt.s32.f32 %v2828_v42 }
  0xa3   : > { %v4540_v39 = vmul.f32 %v4537_v62, %v632_v32  ;;  %vm4542_vm6 = vcmp.lt.f32.partialorder %v2834_v48, 8388608.0  ;;  %v2836_v57 = vcvt.f32.s32 %v4504_v46  ;;  %v2839_v4 = vand.u32 2147483648, %v4504_v46  ;;  %v4556_v48 = vld [vmem:[%s6108_s4 + $0x10] sm:$0x3] }
  0xa4   : > { %v633_v38 = vadd.f32 %v4453_v50, %v579_v15  ;;  %v2824_v7 = vor.u32 %v2823_v61, %v2822_v41  ;;  %v369_v11 = vmul.f32 %v4486_v44, %v311_v59  ;;  %v2830_v23 = vand.u32 2147483647, %v2829_v24 }
  0xa5   : > { %v974_v0 = vrot.slane %v4540_v39, 1  ;;  %v2837_v32 = vcvt.s32.f32 %v2836_v57  ;;  %v370_v42 = vmul.f32 %v4486_v44, %v312_v55  ;;  %v371_v15 = vmul.f32 %v4486_v44, %v313_v26 }
  0xa6   : > { %v4559_v47 = vmul.f32 %v4556_v48, %v633_v38  ;;  %v2825_v61 = vsel %vm4513_vm3, %v2824_v7, %v421_v9  ;;  %v427_v59 = vsub.f32 %v369_v11, %v4453_v50  ;;  %v2832_v24 = vor.u32 %v2831_v19, %v2830_v23 }
  0xa7   : > { %v975_v41 = vsel %vm922_vm5, %v973_v13, %v974_v0  ;;  %v2838_v57 = vand.u32 2147483647, %v2837_v32  ;;  %v529_v55 = vmax.f32 %v2825_v61, -128.0  ;;  %v428_v34 = vsub.f32 %v370_v42, %v4453_v50 }
  0xa8   : > { %v976_v20 = vrot.slane %v4559_v47, 1  ;;  %v4569_v58 = vsub.f32 %v371_v15, %v4453_v50  ;;  %v2866_v38 = vand.u32 2147483647, %v427_v59  ;;  %v2833_v9 = vsel %vm4529_vm4, %v2832_v24, %v4497_v14  ;;  %v4590_v15 = vld [vmem:[%s6108_s4] sm:$0xff] }
  0xa9   : > { %v2840_v54 = vor.u32 %v2839_v4, %v2838_v57  ;;  %v583_v26 = vmin.f32 %v529_v55, 127.0  ;;  %v2868_v7 = vcvt.f32.s32 %v427_v59  ;;  %v530_v23 = vmax.f32 %v2833_v9, -128.0 }
  0xaa   : > { %v977_v13 = vsel %vm922_vm5, %v974_v0, %v976_v20  ;;  %vm4575_vm7 = vcmp.lt.f32.partialorder %v2866_v38, 8388608.0  ;;  %v2871_v11 = vand.u32 2147483648, %v427_v59  ;;  %v2874_v20 = vand.u32 2147483647, %v428_v34 }
  0xab   : > { %v4579_v32 = vpack.i.bf16 %v977_v13, %v975_v41  ;;  %v2841_v42 = vsel %vm4542_vm6, %v2840_v54, %v4504_v46  ;;  %v637_v18 = vadd.f32 %v4453_v50, %v583_v26  ;;  %v2869_v14 = vcvt.s32.f32 %v2868_v7  ;;  %v308_v54 = vld [vmem:[%s3869_s17 + $0x138] sm:$0xff]  ;;  %v309_v26 = vld [vmem:[%s3869_s17 + $0x140] sm:$0xff] }
  0xac   : > { %v531_v4 = vmax.f32 %v2841_v42, -128.0  ;;  %v584_v61 = vmin.f32 %v530_v23, 127.0  ;;  %v2876_v0 = vcvt.f32.s32 %v428_v34  ;;  %v2879_v41 = vand.u32 2147483648, %v428_v34 }
  0xad   : > { %6297 = vst [vmem:[#allocation26_spill] sm:$0xff] %v4579_v32  ;;  %3072 = vrot.lane.b32.xlu1 %v4579_v32, %s3760_s12  ;;  %v4593_v22 = vmul.f32 %v4590_v15, %v637_v18  ;;  %v2870_v46 = vand.u32 2147483647, %v2869_v14  ;;  %v2882_v24 = vand.u32 2147483647, %v4569_v58  ;;  %vm4597_vm8 = vcmp.lt.f32.partialorder %v2874_v20, 8388608.0 }
  0xae   : > { %v585_v57 = vmin.f32 %v531_v4, 127.0  ;;  %v638_v55 = vadd.f32 %v4453_v50, %v584_v61  ;;  %v2877_v9 = vcvt.s32.f32 %v2876_v0  ;;  %v2884_v42 = vcvt.f32.s32 %v4569_v58  ;;  %v310_v20 = vld [vmem:[%s3869_s17 + $0x148] sm:$0x3] }
  0xaf   : > { %v983_v7 = vrot.slane %v4593_v22, 1  ;;  %v2872_v13 = vor.u32 %v2871_v11, %v2870_v46  ;;  %vm4604_vm9 = vcmp.lt.f32.partialorder %v2882_v24, 8388608.0  ;;  %v2887_v61 = vand.u32 2147483648, %v4569_v58 }
  0xb0   : > { %v639_v18 = vadd.f32 %v4453_v50, %v585_v57  ;;  %v4611_v14 = vmul.f32 %v4537_v62, %v638_v55  ;;  %v2878_v4 = vand.u32 2147483647, %v2877_v9  ;;  %v2885_v32 = vcvt.s32.f32 %v2884_v42 }
  0xb1   : > { %v2873_v0 = vsel %vm4575_vm7, %v2872_v13, %v427_v59  ;;  %v366_v11 = vmul.f32 %v4486_v44, %v308_v54  ;;  %v367_v46 = vmul.f32 %v4486_v44, %v309_v26  ;;  %v368_v9 = vmul.f32 %v4486_v44, %v310_v20 }
  0xb2   : > { %v4620_v24 = vmul.f32 %v4556_v48, %v639_v18  ;;  %v984_v57 = vrot.slane %v4611_v14, 1  ;;  %v2880_v17 = vor.u32 %v2879_v41, %v2878_v4  ;;  %v535_v55 = vmax.f32 %v2873_v0, -128.0 }
  0xb3   : > { %v2886_v1 = vand.u32 2147483647, %v2885_v32  ;;  %v424_v37 = vsub.f32 %v366_v11, %v4453_v50  ;;  %v4626_v19 = vsub.f32 %v367_v46, %v4453_v50  ;;  %v426_v41 = vsub.f32 %v368_v9, %v4453_v50 }
  0xb4   : > { %v985_v59 = vsel %vm922_vm5, %v983_v7, %v984_v57  ;;  %v986_v54 = vrot.slane %v4620_v24, 1  ;;  %v2881_v26 = vsel %vm4597_vm8, %v2880_v17, %v428_v34  ;;  %v589_v13 = vmin.f32 %v535_v55, 127.0 }
  0xb5   : > { %v2888_v42 = vor.u32 %v2887_v61, %v2886_v1  ;;  %v536_v18 = vmax.f32 %v2881_v26, -128.0  ;;  %v2842_v32 = vand.u32 2147483647, %v424_v37  ;;  %v2844_v0 = vcvt.f32.s32 %v424_v37 }
  0xb6   : > { %v987_v4 = vsel %vm922_vm5, %v984_v57, %v986_v54  ;;  %v643_v20 = vadd.f32 %v4453_v50, %v589_v13  ;;  %v2847_v11 = vand.u32 2147483648, %v424_v37  ;;  %v2850_v57 = vand.u32 2147483647, %v4626_v19 }
  0xb7   : > { %v4635_v46 = vpack.i.bf16 %v987_v4, %v985_v59  ;;  %v2889_v38 = vsel %vm4604_vm9, %v2888_v42, %v4569_v58  ;;  %v590_v34 = vmin.f32 %v536_v18, 127.0  ;;  %vm4640_vm10 = vcmp.lt.f32.partialorder %v2842_v32, 8388608.0  ;;  %v269_v59 = vld [vmem:[%s3869_s17] sm:$0xff]  ;;  %v270_v18 = vld [vmem:[%s3869_s17 + $0x8] sm:$0xff] }
  0xb8   : > { %v537_v17 = vmax.f32 %v2889_v38, -128.0  ;;  %v4645_v7 = vmul.f32 %v4590_v15, %v643_v20  ;;  %v2845_v61 = vcvt.s32.f32 %v2844_v0  ;;  %v2852_v58 = vcvt.f32.s32 %v4626_v19  ;;  %v271_v38 = vld [vmem:[%s3869_s17 + $0x10] sm:$0x3] }
  0xb9   : > { %6302 = vst [vmem:[#allocation27_spill] sm:$0xff] %v4635_v46  ;;  %3082 = vrot.lane.b32.xlu0 %v4635_v46, %s3760_s12  ;;  %v644_v23 = vadd.f32 %v4453_v50, %v590_v34  ;;  %v2855_v55 = vand.u32 2147483648, %v4626_v19  ;;  %v2858_v9 = vand.u32 2147483647, %v426_v41  ;;  %vm4655_vm11 = vcmp.lt.f32.partialorder %v2850_v57, 8388608.0 }
  0xba   : > { %6305 = vst [vmem:[#allocation28_spill] sm:$0xff] %v4645_v7  ;;  %v591_v54 = vmin.f32 %v537_v17, 127.0  ;;  %v993_v26 = vrot.slane %v4645_v7, 1  ;;  %v2846_v13 = vand.u32 2147483647, %v2845_v61  ;;  %v2853_v4 = vcvt.s32.f32 %v2852_v58 }
  0xbb   : > { %v4661_v32 = vmul.f32 %v4537_v62, %v644_v23  ;;  %vm4663_vm12 = vcmp.lt.f32.partialorder %v2858_v9, 8388608.0  ;;  %v2860_v0 = vcvt.f32.s32 %v426_v41  ;;  %v2863_v46 = vand.u32 2147483648, %v426_v41 }
  0xbc   : > { %v645_v34 = vadd.f32 %v4453_v50, %v591_v54  ;;  %v2848_v17 = vor.u32 %v2847_v11, %v2846_v13  ;;  %v327_v61 = vmul.f32 %v4486_v44, %v269_v59  ;;  %v2854_v7 = vand.u32 2147483647, %v2853_v4 }
  0xbd   : > { %6308 = vst [vmem:[#allocation29_spill] sm:$0xff] %v4661_v32  ;;  %v994_v57 = vrot.slane %v4661_v32, 1  ;;  %v2861_v8 = vcvt.s32.f32 %v2860_v0  ;;  %v328_v23 = vmul.f32 %v4486_v44, %v270_v18  ;;  %v329_v31 = vmul.f32 %v4486_v44, %v271_v38 }
  0xbe   : > { %v4673_v58 = vmul.f32 %v4556_v48, %v645_v34  ;;  %v2849_v9 = vsel %vm4640_vm10, %v2848_v17, %v424_v37  ;;  %v385_v54 = vsub.f32 %v327_v61, %v4453_v50  ;;  %v2856_v13 = vor.u32 %v2855_v55, %v2854_v7 }
  0xbf   : > { %v995_v11 = vsel %vm922_vm5, %v993_v26, %v994_v57  ;;  %v2862_v59 = vand.u32 2147483647, %v2861_v8  ;;  %v532_v27 = vmax.f32 %v2849_v9, -128.0  ;;  %v386_v0 = vsub.f32 %v328_v23, %v4453_v50 }
  0xc0   : > { %6311 = vst [vmem:[#allocation30_spill] sm:$0xff] %v4673_v58  ;;  %v996_v4 = vrot.slane %v4673_v58, 1  ;;  %v4683_v18 = vsub.f32 %v329_v31, %v4453_v50  ;;  %v2530_v34 = vand.u32 2147483647, %v385_v54  ;;  %v2857_v37 = vsel %vm4655_vm11, %v2856_v13, %v4626_v19  ;;  %v316_v58 = vld [vmem:[%s3869_s17 + $0x178] sm:$0x3] }
  0xc1   : > { %v2864_v1 = vor.u32 %v2863_v46, %v2862_v59  ;;  %v586_v38 = vmin.f32 %v532_v27, 127.0  ;;  %v2532_v17 = vcvt.f32.s32 %v385_v54  ;;  %v533_v7 = vmax.f32 %v2857_v37, -128.0 }
  0xc2   : > { %v997_v26 = vsel %vm922_vm5, %v994_v57, %v996_v4  ;;  %vm4689_vm13 = vcmp.lt.f32.partialorder %v2530_v34, 8388608.0  ;;  %v2535_v55 = vand.u32 2147483648, %v385_v54  ;;  %v2538_v27 = vand.u32 2147483647, %v386_v0 }
  0xc3   : > { %v4693_v61 = vpack.i.bf16 %v997_v26, %v995_v11  ;;  %v2865_v31 = vsel %vm4663_vm12, %v2864_v1, %v426_v41  ;;  %v640_v23 = vadd.f32 %v4453_v50, %v586_v38  ;;  %v2533_v42 = vcvt.s32.f32 %v2532_v17 }
  0xc4   : > { %v534_v19 = vmax.f32 %v2865_v31, -128.0  ;;  %v587_v46 = vmin.f32 %v533_v7, 127.0  ;;  %v2540_v9 = vcvt.f32.s32 %v386_v0  ;;  %v2543_v11 = vand.u32 2147483648, %v386_v0 }
  0xc5   : > { %6314 = vst [vmem:[#allocation31_spill] sm:$0xff] %v4693_v61  ;;  %3092 = vrot.lane.b32.xlu2 %v4693_v61, %s3760_s12  ;;  %v4701_v57 = vmul.f32 %v4590_v15, %v640_v23  ;;  %v2534_v13 = vand.u32 2147483647, %v2533_v42  ;;  %v2546_v59 = vand.u32 2147483647, %v4683_v18  ;;  %vm4705_vm14 = vcmp.lt.f32.partialorder %v2538_v27, 8388608.0 }
  0xc6   : > { %v588_v20 = vmin.f32 %v534_v19, 127.0  ;;  %v641_v41 = vadd.f32 %v4453_v50, %v587_v46  ;;  %v2541_v34 = vcvt.s32.f32 %v2540_v9  ;;  %v2548_v17 = vcvt.f32.s32 %v4683_v18  ;;  %v314_v42 = vld [vmem:[%s3869_s17 + $0x168] sm:$0xff]  ;;  %v315_v61 = vld [vmem:[%s3869_s17 + $0x170] sm:$0xff] }
  0xc7   : > { %v988_v37 = vrot.slane %v4701_v57, 1  ;;  %v2536_v1 = vor.u32 %v2535_v55, %v2534_v13  ;;  %vm4710_vm15 = vcmp.lt.f32.partialorder %v2546_v59, 8388608.0  ;;  %v2551_v23 = vand.u32 2147483648, %v4683_v18 }
  0xc8   : > { %v642_v26 = vadd.f32 %v4453_v50, %v588_v20  ;;  %v4717_v7 = vmul.f32 %v4537_v62, %v641_v41  ;;  %v2542_v31 = vand.u32 2147483647, %v2541_v34  ;;  %v2549_v55 = vcvt.s32.f32 %v2548_v17 }
  0xc9   : > { %v2537_v19 = vsel %vm4689_vm13, %v2536_v1, %v385_v54  ;;  %vm1099_vm0 = vcmask 1045504   ;;  %v1105_v46 = vrot.slane %v4070_v45, 2  ;;  %v1106_v41 = vrot.slane %v4087_v6, 2 }
  0xca   : > { %v4725_v27 = vmul.f32 %v4556_v48, %v642_v26  ;;  %v989_v9 = vrot.slane %v4717_v7, 1  ;;  %v2544_v13 = vor.u32 %v2543_v11, %v2542_v31  ;;  %v493_v59 = vmax.f32 %v2537_v19, -128.0 }
  0xcb   : > { %v2550_v20 = vand.u32 2147483647, %v2549_v55  ;;  %v1108_v34 = vrot.slane %v4092_v10, 2  ;;  %v372_v54 = vmul.f32 %v4486_v44, %v314_v42  ;;  %v1107_v31 = vsel %vm1099_vm0, %v1105_v46, %v1106_v41 }
  0xcc   : > { %v990_v8 = vsel %vm922_vm5, %v988_v37, %v989_v9  ;;  %v991_v1 = vrot.slane %v4725_v27, 1  ;;  %v2545_v17 = vsel %vm4705_vm14, %v2544_v13, %v386_v0  ;;  %v547_v26 = vmin.f32 %v493_v59, 127.0 }
  0xcd   : > { %v2552_v32 = vor.u32 %v2551_v23, %v2550_v20  ;;  %v494_v11 = vmax.f32 %v2545_v17, -128.0  ;;  %v1109_v19 = vsel %vm1099_vm0, %v1106_v41, %v1108_v34  ;;  %v373_v37 = vmul.f32 %v4486_v44, %v315_v61 }
  0xce   : > { %v992_v10 = vsel %vm922_vm5, %v989_v9, %v991_v1  ;;  %v601_v55 = vadd.f32 %v4453_v50, %v547_v26  ;;  %v4741_v42 = vpack.i.bf16 %v1109_v19, %v1107_v31  ;;  %v374_v23 = vmul.f32 %v4486_v44, %v316_v58 }
  0xcf   : > { %v4744_v6 = vpack.i.bf16 %v992_v10, %v990_v8  ;;  %v2553_v0 = vsel %vm4710_vm15, %v2552_v32, %v4683_v18  ;;  %v548_v4 = vmin.f32 %v494_v11, 127.0  ;;  %v430_v9 = vsub.f32 %v372_v54, %v4453_v50 }
  0xd0   : > { %6319 = vst [vmem:[#allocation32_spill] sm:$0xff] %v4741_v42  ;;  %v495_v46 = vmax.f32 %v2553_v0, -128.0  ;;  %v658_v13 = vmul.f32 %v4590_v15, %v601_v55  ;;  %3112 = vrot.lane.b32.xlu2 %v4741_v42, %s3761_s8  ;;  %v431_v61 = vsub.f32 %v373_v37, %v4453_v50  ;;  %v432_v32 = vsub.f32 %v374_v23, %v4453_v50 }
  0xd1   : > { %6320 = vst [vmem:[#allocation33_spill] sm:$0xff] %v4744_v6  ;;  %3087 = vrot.lane.b32.xlu1 %v4744_v6, %s3760_s12  ;;  %v602_v38 = vadd.f32 %v4453_v50, %v548_v4  ;;  %v1120_v58 = vrot.slane %v3979_v29, 2  ;;  %v1121_v18 = vrot.slane %v3985_v21, 2  ;;  %v2890_v41 = vand.u32 2147483647, %v430_v9 }
  0xd2   : > { %v549_v59 = vmin.f32 %v495_v46, 127.0  ;;  %v4761_v20 = vmul.f32 0.0, %v658_v13  ;;  %v2892_v34 = vcvt.f32.s32 %v430_v9  ;;  %v2895_v8 = vand.u32 2147483648, %v430_v9 }
  0xd3   : > { %v659_v54 = vmul.f32 %v4537_v62, %v602_v38  ;;  %v2898_v1 = vand.u32 2147483647, %v431_v61  ;;  %v2900_v17 = vcvt.f32.s32 %v431_v61  ;;  %vm4767_vm1 = vcmp.lt.f32.partialorder %v2890_v41, 8388608.0 }
  0xd4   : > { %6321 = vst [vmem:[#allocation34_spill] sm:$0xff] %v4761_v20  ;;  %v603_v26 = vadd.f32 %v4453_v50, %v549_v59  ;;  %v923_v11 = vrot.slane %v4761_v20, 1  ;;  %v1100_v31 = vrot.slane %v4761_v20, 2  ;;  %v2893_v55 = vcvt.s32.f32 %v2892_v34 }
  0xd5   : > { %v4771_v10 = vmul.f32 0.0, %v659_v54  ;;  %vm4773_vm2 = vcmp.lt.f32.partialorder %v2898_v1, 8388608.0  ;;  %v2901_v0 = vcvt.s32.f32 %v2900_v17  ;;  %v2903_v23 = vand.u32 2147483648, %v431_v61 }
  0xd6   : > { %v660_v4 = vmul.f32 %v4556_v48, %v603_v26  ;;  %v2906_v46 = vand.u32 2147483647, %v432_v32  ;;  %v2908_v13 = vcvt.f32.s32 %v432_v32  ;;  %v2894_v41 = vand.u32 2147483647, %v2893_v55 }
  0xd7   : > { %6324 = vst [vmem:[#allocation35_spill] sm:$0xff] %v4771_v10  ;;  %v924_v38 = vrot.slane %v4771_v10, 1  ;;  %v1101_v59 = vrot.slane %v4771_v10, 2  ;;  %v2902_v6 = vand.u32 2147483647, %v2901_v0  ;;  %v2911_v1 = vand.u32 2147483648, %v432_v32 }
  0xd8   : > { %v822_v42 = vmul.f32 0.0, %v660_v4  ;;  %vm4780_vm3 = vcmp.lt.f32.partialorder %v2906_v46, 8388608.0  ;;  %v2909_v34 = vcvt.s32.f32 %v2908_v13  ;;  %v2896_v20 = vor.u32 %v2895_v8, %v2894_v41 }
  0xd9   : > { %v925_v17 = vsel %vm922_vm5, %v923_v11, %v924_v38  ;;  %v1102_v26 = vsel %vm1099_vm0, %v1100_v31, %v1101_v59  ;;  %v2904_v44 = vor.u32 %v2903_v23, %v2902_v6  ;;  %v1122_v10 = vsel %vm1099_vm0, %v1120_v58, %v1121_v18 }
  0xda   : > { %v926_v21 = vrot.slane %v822_v42, 1  ;;  %v1103_v29 = vrot.slane %v822_v42, 2  ;;  %v2910_v45 = vand.u32 2147483647, %v2909_v34  ;;  %v2897_v55 = vsel %vm4767_vm1, %v2896_v20, %v430_v9 }
  0xdb   : > { %v2905_v0 = vsel %vm4773_vm2, %v2904_v44, %v431_v61  ;;  %v1123_v4 = vrot.slane %v3988_v33, 2  ;;  %v1115_v46 = vrot.slane %v4174_v51, 2  ;;  %v538_v31 = vmax.f32 %v2897_v55, -128.0 }
  0xdc   : > { %v927_v11 = vsel %vm922_vm5, %v924_v38, %v926_v21  ;;  %v1104_v8 = vsel %vm1099_vm0, %v1101_v59, %v1103_v29  ;;  %v2912_v6 = vor.u32 %v2911_v1, %v2910_v45  ;;  %v539_v13 = vmax.f32 %v2905_v0, -128.0 }
  0xdd   : > { %v3096_v42 = vpack.i.bf16 %v927_v11, %v925_v17  ;;  %v3106_v23 = vpack.i.bf16 %v1104_v8, %v1102_v26  ;;  %v1124_v58 = vsel %vm1099_vm0, %v1121_v18, %v1123_v4  ;;  %v592_v20 = vmin.f32 %v538_v31, 127.0 }
  0xde   : > { %v2913_v9 = vsel %vm4780_vm3, %v2912_v6, %v432_v32  ;;  %v4798_v44 = vpack.i.bf16 %v1124_v58, %v1122_v10  ;;  %v1116_v33 = vrot.slane %v4195_v12, 2  ;;  %v593_v21 = vmin.f32 %v539_v13, 127.0 }
  0xdf   : > { %3097 = vrot.lane.b32.xlu0 %v3096_v42, %s3760_s12  ;;  %3107 = vrot.lane.b32.xlu1 %v3106_v23, %s3761_s8  ;;  %v540_v29 = vmax.f32 %v2913_v9, -128.0  ;;  %v1118_v45 = vrot.slane %v4204_v30, 2  ;;  %v646_v61 = vadd.f32 %v4453_v50, %v592_v20  ;;  %v1135_v37 = vrot.slane %v4340_v5, 2 }
  0xe0   : > { %3127 = vrot.lane.b32.xlu2 %v4798_v44, %s3761_s8  ;;  %v1117_v32 = vsel %vm1099_vm0, %v1115_v46, %v1116_v33  ;;  %v647_v19 = vadd.f32 %v4453_v50, %v593_v21  ;;  %v1136_v54 = vrot.slane %v4358_v52, 2  ;;  %v1138_v1 = vrot.slane %v4367_v60, 2 }
  0xe1   : > { %v594_v18 = vmin.f32 %v540_v29, 127.0  ;;  %v1119_v10 = vsel %vm1099_vm0, %v1116_v33, %v1118_v45  ;;  %v4812_v38 = vmul.f32 %v4590_v15, %v646_v61  ;;  %v1130_v17 = vrot.slane %v4232_v3, 2 }
  0xe2   : > { %v4816_v30 = vmul.f32 %v4537_v62, %v647_v19  ;;  %v4818_v41 = vpack.i.bf16 %v1119_v10, %v1117_v32  ;;  %v1131_v26 = vrot.slane %v4250_v40, 2  ;;  %v1137_v4 = vsel %vm1099_vm0, %v1135_v37, %v1136_v54 }
  0xe3   : > { %v648_v59 = vadd.f32 %v4453_v50, %v594_v18  ;;  %v998_v34 = vrot.slane %v4812_v38, 1  ;;  %v1133_v46 = vrot.slane %v4259_v36, 2  ;;  %v1139_v11 = vsel %vm1099_vm0, %v1136_v54, %v1138_v1 }
  0xe4   : > { %v999_v0 = vrot.slane %v4816_v30, 1  ;;  %v1110_v60 = vrot.slane %v4001_v43, 2  ;;  %v4837_v31 = vpack.i.bf16 %v1139_v11, %v1137_v4  ;;  %v1132_v42 = vsel %vm1099_vm0, %v1130_v17, %v1131_v26 }
  0xe5   : > { %v4826_v55 = vmul.f32 %v4556_v48, %v648_v59  ;;  %v1111_v48 = vrot.slane %v4011_v49, 2  ;;  %v1134_v23 = vsel %vm1099_vm0, %v1131_v26, %v1133_v46  ;;  %v1150_v36 = vrot.slane %v4518_v28, 2 }
  0xe6   : > { %v1000_v8 = vsel %vm922_vm5, %v998_v34, %v999_v0  ;;  %v1113_v58 = vrot.slane %v4032_v2, 2  ;;  %v1151_v9 = vrot.slane %v4540_v39, 2  ;;  %v1153_v20 = vrot.slane %v4559_v47, 2 }
  0xe7   : > { %v1001_v6 = vrot.slane %v4826_v55, 1  ;;  %3122 = vrot.lane.b32.xlu1 %v4818_v41, %s3761_s8  ;;  %v4851_v29 = vpack.i.bf16 %v1134_v23, %v1132_v42  ;;  %v1145_v2 = vrot.slane %v4394_v25, 2  ;;  %v1146_v61 = vrot.slane %v4411_v35, 2 }
  0xe8   : > { %3142 = vrot.lane.b32.xlu2 %v4837_v31, %s3761_s8  ;;  %v1152_v21 = vsel %vm1099_vm0, %v1150_v36, %v1151_v9  ;;  %v1154_v45 = vsel %vm1099_vm0, %v1151_v9, %v1153_v20  ;;  %v1148_v32 = vrot.slane %v4425_v63, 2  ;;  %v1112_v18 = vsel %vm1099_vm0, %v1110_v60, %v1111_v48  ;;  %v6336_v36 = vld [vmem:[#allocation15_spill] sm:$0xff] }
  0xe9   : > { %v1002_v13 = vsel %vm922_vm5, %v999_v0, %v1001_v6  ;;  %6330 = vst [vmem:[#allocation37_spill] sm:$0xff] %v4851_v29  ;;  %v1114_v47 = vsel %vm1099_vm0, %v1111_v48, %v1113_v58  ;;  %v4862_v19 = vpack.i.bf16 %v1154_v45, %v1152_v21  ;;  %v1165_v10 = vrot.slane %v4701_v57, 2  ;;  %v6337_v58 = vld [vmem:[#allocation16_spill] sm:$0xff] }
  0xea   : > { %v4849_v33 = vpack.i.bf16 %v1002_v13, %v1000_v8  ;;  %v1166_v37 = vrot.slane %v4717_v7, 2  ;;  %v1168_v59 = vrot.slane %v4725_v27, 2  ;;  %v4869_v54 = vpack.i.bf16 %v1114_v47, %v1112_v18 }
  0xeb   : > { %6331 = vst [vmem:[#allocation38_spill] sm:$0xff] %v4862_v19  ;;  %v1147_v34 = vsel %vm1099_vm0, %v1145_v2, %v1146_v61  ;;  %v1149_v63 = vsel %vm1099_vm0, %v1146_v61, %v1148_v32  ;;  %v1125_v1 = vrot.slane %v4125_v53, 2  ;;  %v1126_v17 = vrot.slane %v4132_v56, 2  ;;  %v4909_v32 = vpop.permute.xlu2 %3042 }
  0xec   : > { %6329 = vst [vmem:[#allocation36_spill] sm:$0xff] %v4849_v33  ;;  %3102 = vrot.lane.b32.xlu0 %v4849_v33, %s3760_s12  ;;  %v1128_v26 = vrot.slane %v4149_v16, 2  ;;  %v1167_v27 = vsel %vm1099_vm0, %v1165_v10, %v1166_v37  ;;  %v1169_v0 = vsel %vm1099_vm0, %v1166_v37, %v1168_v59  ;;  %v4880_v4 = vpack.i.bf16 %v1149_v63, %v1147_v34  ;;  %v6340_v10 = vld [vmem:[#allocation9_spill] sm:$0xff]  ;;  %v6341_v37 = vld [vmem:[#allocation10_spill] sm:$0xff] }
  0xed   : > { %6332 = vst [vmem:[#allocation39_spill] sm:$0xff] %v4869_v54  ;;  %v1160_v46 = vrot.slane %v4593_v22, 2  ;;  %v1161_v11 = vrot.slane %v4611_v14, 2  ;;  %v1163_v8 = vrot.slane %v4620_v24, 2  ;;  %v1127_v16 = vsel %vm1099_vm0, %v1125_v1, %v1126_v17  ;;  %v6338_v24 = vld [vmem:[#allocation17_spill] sm:$0xff] }
  0xee   : > { %6333 = vst [vmem:[#allocation40_spill] sm:$0xff] %v4880_v4  ;;  %v1129_v6 = vsel %vm1099_vm0, %v1126_v17, %v1128_v26  ;;  %v4889_v60 = vpack.i.bf16 %v1169_v0, %v1167_v27  ;;  %v1140_v13 = vrot.slane %v6336_v36, 2  ;;  %v1141_v9 = vrot.slane %v6337_v58, 2  ;;  %v6342_v34 = vld [vmem:[#allocation21_spill] sm:$0xff]  ;;  %v6343_v17 = vld [vmem:[#allocation22_spill] sm:$0xff]  ;;  %v6344_v0 = vld [vmem:[#allocation24_spill] sm:$0xff] }
  0xef   : > { %3137 = vrot.lane.b32.xlu1 %v4851_v29, %s3761_s8  ;;  %v4893_v48 = vpack.i.bf16 %v1129_v6, %v1127_v16  ;;  %v1162_v42 = vsel %vm1099_vm0, %v1160_v46, %v1161_v11  ;;  %v1164_v23 = vsel %vm1099_vm0, %v1161_v11, %v1163_v8  ;;  %v1143_v20 = vrot.slane %v6338_v24, 2  ;;  %v317_v6 = vld [vmem:[%s3869_s17 + $0x180] sm:$0xff] }
  0xf0   : > { %3157 = vrot.lane.b32.xlu2 %v4862_v19, %s3761_s8  ;;  %6334 = vst [vmem:[#allocation41_spill] sm:$0xff] %v4889_v60  ;;  %v4902_v21 = vpack.i.bf16 %v1164_v23, %v1162_v42  ;;  %v1175_v45 = vrot.slane %v4812_v38, 2  ;;  %v1176_v2 = vrot.slane %v4816_v30, 2  ;;  %v1178_v61 = vrot.slane %v4826_v55, 2  ;;  %v318_v42 = vld [vmem:[%s3869_s17 + $0x188] sm:$0xff] }
  0xf1   : > { %6335 = vst [vmem:[#allocation42_spill] sm:$0xff] %v4893_v48  ;;  %v1142_v18 = vsel %vm1099_vm0, %v1140_v13, %v1141_v9  ;;  %v1144_v47 = vsel %vm1099_vm0, %v1141_v9, %v1143_v20  ;;  %v3186_v59 = vpack.i.bf16 %v6341_v37, %v6340_v10  ;;  %v1155_v63 = vrot.slane %v6342_v34, 2  ;;  %v6346_v13 = vld [vmem:[#allocation5_spill] sm:$0xff]  ;;  %v6347_v9 = vld [vmem:[#allocation6_spill] sm:$0xff]  ;;  %v6349_v20 = vld [vmem:[#allocation23_spill] sm:$0xff] }
  0xf2   : > { %6339 = vst [vmem:[#allocation15_spill] sm:$0xff] %v4902_v21  ;;  %v4918_v1 = vpack.i.bf16 %v1144_v47, %v1142_v18  ;;  %v1156_v55 = vrot.slane %v6343_v17, 2  ;;  %v1177_v26 = vsel %vm1099_vm0, %v1175_v45, %v1176_v2  ;;  %v1179_v27 = vsel %vm1099_vm0, %v1176_v2, %v1178_v61 }
  0xf3   : > { %v1158_v46 = vrot.slane %v6344_v0, 2  ;;  %v4925_v11 = vpack.i.bf16 %v1179_v27, %v1177_v26  ;;  %v4930_v16 = vpop.permute.xlu2 %3047  ;;  %v4937_v24 = vpack.i.bf16 %v6347_v9, %v6346_v13  ;;  %v375_v45 = vmul.f32 %v6349_v20, %v317_v6  ;;  %v6352_v27 = vld [vmem:[#allocation30_spill] sm:$0xff] }
  0xf4   : > { %3117 = vrot.lane.b32.xlu0 %v4869_v54, %s3761_s8  ;;  %v1157_v8 = vsel %vm1099_vm0, %v1155_v63, %v1156_v55  ;;  %v376_v2 = vmul.f32 %v6349_v20, %v318_v42  ;;  %v1173_v0 = vrot.slane %v6352_v27, 2  ;;  %v4954_v42 = vpack.i.bf16 %v4195_v12, %v4174_v51 }
  0xf5   : > { %6345 = vst [vmem:[#allocation16_spill] sm:$0xff] %v4925_v11  ;;  %v1159_v23 = vsel %vm1099_vm0, %v1156_v55, %v1158_v46  ;;  %v433_v61 = vsub.f32 %v375_v45, %v4453_v50  ;;  %v6351_v55 = vld [vmem:[#allocation29_spill] sm:$0xff]  ;;  %v4964_v27 = vpack.i.bf16 %v4358_v52, %v4340_v5  ;;  %vm1878_vm7 = vcmask 64512  }
  0xf6   : > { %6348 = vst [vmem:[#allocation17_spill] sm:$0xff] %v4937_v24  ;;  %v434_v18 = vsub.f32 %v376_v2, %v4453_v50  ;;  %v4945_v47 = vpack.i.bf16 %v1159_v23, %v1157_v8  ;;  %v1171_v26 = vrot.slane %v6351_v55, 2  ;;  %vm1911_vm8 = vcmask 130048  }
  0xf7   : > { %3152 = vrot.lane.b32.xlu1 %v4880_v4, %s3761_s8  ;;  %v2916_v46 = vcvt.f32.s32 %v433_v61  ;;  %6353 = vst [vmem:[#allocation9_spill] sm:$0xff] %v4954_v42  ;;  %v2914_v4 = vand.u32 2147483647, %v433_v61  ;;  %vm1944_vm10 = vcmask 195584   ;;  %vm1977_vm11 = vcmask 261120  }
  0xf8   : > { %3172 = vrot.lane.b32.xlu2 %v4889_v60, %s3761_s8  ;;  %v2924_v6 = vcvt.f32.s32 %v434_v18  ;;  %v1174_v2 = vsel %vm1099_vm0, %v1171_v26, %v1173_v0  ;;  %6354 = vst [vmem:[#allocation10_spill] sm:$0xff] %v4964_v27  ;;  %v2922_v60 = vand.u32 2147483647, %v434_v18  ;;  %v4974_v0 = vpack.i.bf16 %v4250_v40, %v4232_v3 }
  0xf9   : > { %v2917_v45 = vcvt.s32.f32 %v2916_v46  ;;  %vm2915_vm4 = vcmp.lt.f32.partialorder %v2914_v4, 8388608.0  ;;  %vm2010_vm12 = vcmask 326656   ;;  %vm2043_vm1 = vcmask 392192  }
  0xfa   : > { %vm2923_vm6 = vcmp.lt.f32.partialorder %v2922_v60, 8388608.0  ;;  %6355 = vst [vmem:[#allocation21_spill] sm:$0xff] %v4974_v0  ;;  %vm2109_vm2 = vcmask 523264   ;;  %vm2198_vm3 = vcmask 588800  }
  0xfb   : > { %v4959_v23 = vpop.permute.xlu2 %3062 }
  0xfc   : > { %3132 = vrot.lane.b32.xlu0 %v4893_v48, %s3761_s8 }
  0xff   : > { %3167 = vrot.lane.b32.xlu1 %v4902_v21, %s3761_s8  ;;  %v2919_v21 = vand.u32 2147483648, %v433_v61 }
 0x100   : > { %3187 = vrot.lane.b32.xlu2 %v3186_v59, %s3762_s11  ;;  %v6350_v59 = vld [vmem:[#allocation28_spill] sm:$0xff] }
 0x101   : > { %v1170_v63 = vrot.slane %v6350_v59, 2 }
 0x103   : > { %v1172_v8 = vsel %vm1099_vm0, %v1170_v63, %v1171_v26  ;;  %v4982_v60 = vpop.permute.xlu2 %3077 }
 0x104   : > { %3147 = vrot.lane.b32.xlu0 %v4918_v1, %s3761_s8  ;;  %v4968_v19 = vpack.i.bf16 %v1174_v2, %v1172_v8  ;;  %v5000_v8 = vpack.i.bf16 %v4717_v7, %v4701_v57 }
 0x106   : > { %6358 = vst [vmem:[#allocation5_spill] sm:$0xff] %v5000_v8 }
 0x107   : > { %3182 = vrot.lane.b32.xlu1 %v4925_v11, %s3761_s8  ;;  %v2925_v11 = vcvt.s32.f32 %v2924_v6  ;;  %v2927_v6 = vand.u32 2147483648, %v434_v18 }
 0x108   : > { %3202 = vrot.lane.b32.xlu2 %v4937_v24, %s3762_s11  ;;  %v2918_v24 = vand.u32 2147483647, %v2917_v45 }
 0x109   : > { %v2926_v29 = vand.u32 2147483647, %v2925_v11 }
 0x10a   : > { %v2920_v46 = vor.u32 %v2919_v21, %v2918_v24  ;;  %v4980_v21 = vpack.i.bf16 %v4540_v39, %v4518_v28 }
 0x10b   : > { %v2928_v63 = vor.u32 %v2927_v6, %v2926_v29  ;;  %v4988_v29 = vpack.i.bf16 %v4011_v49, %v4001_v43  ;;  %v5006_v6 = vpop.permute.xlu1 %3032 }
 0x10c   : > { %3162 = vrot.lane.b32.xlu0 %v4945_v47, %s3761_s8  ;;  %v2921_v26 = vsel %vm2915_vm4, %v2920_v46, %v433_v61  ;;  %6356 = vst [vmem:[#allocation22_spill] sm:$0xff] %v4980_v21 }
 0x10d   : > { %v2929_v45 = vsel %vm2923_vm6, %v2928_v63, %v434_v18  ;;  %v541_v11 = vmax.f32 %v2921_v26, -128.0  ;;  %v4994_v18 = vpack.i.bf16 %v4411_v35, %v4394_v25  ;;  %v5010_v63 = vpack.i.bf16 %v4132_v56, %v4125_v53 }
 0x10e   : > { %v542_v4 = vmax.f32 %v2929_v45, -128.0 }
 0x10f   : > { %3197 = vrot.lane.b32.xlu1 %v4954_v42, %s3762_s11  ;;  %v595_v24 = vmin.f32 %v541_v11, 127.0  ;;  %6357 = vst [vmem:[#allocation24_spill] sm:$0xff] %v4994_v18  ;;  %v6367_v42 = vld [vmem:[#allocation13_spill] sm:$0xff] }
 0x110   : > { %3217 = vrot.lane.b32.xlu2 %v4964_v27, %s3762_s11  ;;  %v596_v61 = vmin.f32 %v542_v4, 127.0  ;;  %6359 = vst [vmem:[#allocation6_spill] sm:$0xff] %v5010_v63  ;;  %v3028_v4 = vpop.permute.xlu0 %3027 }
 0x111   : > { %v649_v2 = vadd.f32 %v4453_v50, %v595_v24 }
 0x112   : > { %v650_v46 = vadd.f32 %v4453_v50, %v596_v61  ;;  %v5024_v50 = vpack.i.bf16 %v4611_v14, %v4593_v22  ;;  %v3029_v61 = vunpack.i.l.bf16 %v3028_v4 }
 0x113   : > { %v5017_v45 = vmul.f32 %v4590_v15, %v649_v2  ;;  %v5036_v15 = vpack.i.bf16 %v6337_v58, %v6336_v36  ;;  %v5040_v2 = vpop.permute.xlu1 %3037 }
 0x114   : > { %3177 = vrot.lane.b32.xlu0 %v4968_v19, %s3761_s8  ;;  %v5020_v11 = vmul.f32 %v4537_v62, %v650_v46  ;;  %6360 = vst [vmem:[#allocation23_spill] sm:$0xff] %v5024_v50  ;;  %v3030_v62 = vunpack.i.h.bf16 %v3028_v4 }
 0x115   : > { %6362 = vst [vmem:[#allocation43_spill] sm:$0xff] %v5036_v15 }
 0x116   : > { %v5030_v24 = vpack.i.bf16 %v5020_v11, %v5017_v45  ;;  %v1882_v4 = vsel %vm1878_vm7, %v6341_v37, %v3030_v62  ;;  %v319_v37 = vld [vmem:[%s3869_s17 + $0x190] sm:$0x3] }
 0x117   : > { %3212 = vrot.lane.b32.xlu1 %v4974_v0, %s3762_s11 }
 0x118   : > { %3232 = vrot.lane.b32.xlu2 %v4980_v21, %s3762_s11  ;;  %6361 = vst [vmem:[#allocation30_spill] sm:$0xff] %v5030_v24  ;;  %v5067_v62 = vpop.permute.xlu0 %3052 }
 0x11c   : > { %3192 = vrot.lane.b32.xlu0 %v4988_v29, %s3762_s11 }
 0x11f   : > { %3227 = vrot.lane.b32.xlu1 %v4994_v18, %s3762_s11  ;;  %v5012_v26 = vpop.permute.xlu2 %3092 }
 0x120   : > { %3247 = vrot.lane.b32.xlu2 %v5000_v8, %s3762_s11  ;;  %v5044_v8 = vpack.i.bf16 %v4816_v30, %v4812_v38 }
 0x122   : > { %6363 = vst [vmem:[#allocation44_spill] sm:$0xff] %v5044_v8 }
 0x124   : > { %3207 = vrot.lane.b32.xlu0 %v5010_v63, %s3762_s11 }
 0x127   : > { %3242 = vrot.lane.b32.xlu1 %v5024_v50, %s3762_s11 }
 0x128   : > { %3262 = vrot.lane.b32.xlu2 %v5030_v24, %s3762_s11  ;;  %v1881_v24 = vsel %vm1878_vm7, %v6340_v10, %v3029_v61  ;;  %v3058_v10 = vpop.permute.xlu1 %3057  ;;  %v3044_v61 = vunpack.i.l.bf16 %v4909_v32 }
 0x129   : > { %v3059_v63 = vunpack.i.l.bf16 %v3058_v10 }
 0x12a   : > { %v3113_v46 = vpop.permute.xlu2 %3112  ;;  %v1887_v27 = vsel %vm1878_vm7, %v6346_v13, %v3044_v61  ;;  %v6375_v13 = vld [vmem:[#allocation20_spill] sm:$0xff] }
 0x12b   : > { %v3115_v50 = vunpack.i.h.bf16 %v3113_v46  ;;  %v3114_v18 = vunpack.i.l.bf16 %v3113_v46  ;;  %v5062_v46 = vpack.i.bf16 %v6343_v17, %v6342_v34 }
 0x12c   : > { %3222 = vrot.lane.b32.xlu0 %v5036_v15, %s3762_s11 }
 0x12d   : > { %v5053_v0 = vsel %vm1911_vm8, %v1881_v24, %v3114_v18  ;;  %v5056_v21 = vsel %vm1911_vm8, %v1882_v4, %v3115_v50  ;;  %6366 = vst [vmem:[#allocation47_spill] sm:$0xff] %v5062_v46  ;;  %v377_v18 = vmul.f32 %v6349_v20, %v319_v37  ;;  %v6368_v50 = vld [vmem:[#allocation8_spill] sm:$0xff]  ;;  %v3045_v24 = vunpack.i.h.bf16 %v4909_v32  ;;  %v6371_v20 = vld [vmem:[#allocation14_spill] sm:$0xff] }
 0x12e   : > { %6364 = vst [vmem:[#allocation45_spill] sm:$0xff] %v5053_v0  ;;  %v5078_v4 = vpack.i.bf16 %v6351_v55, %v6350_v59  ;;  %v5094_v0 = vpop.permute.xlu0 %3067 }
 0x12f   : > { %6365 = vst [vmem:[#allocation46_spill] sm:$0xff] %v5056_v21  ;;  %3257 = vrot.lane.b32.xlu1 %v5044_v8, %s3762_s11  ;;  %v5083_v8 = vld [vmem:[%s6107_s3] ss:$0 sm:$0xff]  ;;  %v1888_v32 = vsel %vm1878_vm7, %v6347_v9, %v3045_v24  ;;  %v3060_v24 = vunpack.i.h.bf16 %v3058_v10 }
 0x130   : > { %3277 = vrot.lane.b32.xlu2 %v6367_v42, %s3763_s13  ;;  %6369 = vst [vmem:[#allocation48_spill] sm:$0xff] %v5078_v4  ;;  %v435_v42 = vsub.f32 %v377_v18, %v5083_v8  ;;  %v3073_v21 = vpop.permute.xlu1 %3072 }
 0x131   : > { %6370 = vst [vmem:[#allocation49_spill] sm:$0xff] %v5083_v8 }
 0x132   : > { %v2932_v15 = vcvt.f32.s32 %v435_v42 }
 0x134   : > { %3237 = vrot.lane.b32.xlu0 %v5062_v46, %s3762_s11  ;;  %v2933_v9 = vcvt.s32.f32 %v2932_v15  ;;  %v2930_v15 = vand.u32 2147483647, %v435_v42 }
 0x136   : > { %vm2931_vm9 = vcmp.lt.f32.partialorder %v2930_v15, 8388608.0  ;;  %v6380_v15 = vld [vmem:[#allocation25_spill] sm:$0xff] }
 0x137   : > { %3272 = vrot.lane.b32.xlu1 %v6368_v50, %s3763_s13 }
 0x138   : > { %3292 = vrot.lane.b32.xlu2 %v6371_v20, %s3763_s13 }
 0x13a   : > { %v3128_v37 = vpop.permute.xlu2 %3127 }
 0x13b   : > { %v3130_v46 = vunpack.i.h.bf16 %v3128_v37  ;;  %v3129_v50 = vunpack.i.l.bf16 %v3128_v37  ;;  %v6374_v37 = vld [vmem:[#allocation12_spill] sm:$0xff] }
 0x13c   : > { %3252 = vrot.lane.b32.xlu0 %v5078_v4, %s3762_s11  ;;  %v6376_v4 = vld [vmem:[#allocation11_spill] sm:$0xff] }
 0x13d   : > { %v5097_v18 = vsel %vm1911_vm8, %v1888_v32, %v3130_v46  ;;  %v5100_v20 = vsel %vm1911_vm8, %v1887_v27, %v3129_v50  ;;  %v2934_v46 = vand.u32 2147483647, %v2933_v9  ;;  %v2935_v32 = vand.u32 2147483648, %v435_v42 }
 0x13e   : > { %6372 = vst [vmem:[#allocation50_spill] sm:$0xff] %v5097_v18  ;;  %v1894_v27 = vsel %vm1878_vm7, %v4358_v52, %v3060_v24  ;;  %v1893_v50 = vsel %vm1878_vm7, %v4340_v5, %v3059_v63  ;;  %v3074_v18 = vunpack.i.l.bf16 %v3073_v21  ;;  %v6378_v52 = vld [vmem:[#allocation27_spill] sm:$0xff] }
 0x13f   : > { %6373 = vst [vmem:[#allocation51_spill] sm:$0xff] %v5100_v20  ;;  %3287 = vrot.lane.b32.xlu1 %v6374_v37, %s3763_s13  ;;  %v3075_v20 = vunpack.i.h.bf16 %v3073_v21 }
 0x140   : > { %3307 = vrot.lane.b32.xlu2 %v6375_v13, %s3763_s13  ;;  %v5118_v13 = vpop.permute.xlu0 %3082 }
 0x142   : > { %v3143_v61 = vpop.permute.xlu2 %3142 }
 0x143   : > { %v3145_v59 = vunpack.i.h.bf16 %v3143_v61  ;;  %v3144_v55 = vunpack.i.l.bf16 %v3143_v61  ;;  %v3088_v9 = vpop.permute.xlu1 %3087  ;;  %v2936_v61 = vor.u32 %v2935_v32, %v2934_v46 }
 0x144   : > { %3267 = vrot.lane.b32.xlu0 %v6376_v4, %s3763_s13  ;;  %v6377_v4 = vld [vmem:[#allocation18_spill] sm:$0xff]  ;;  %v3090_v32 = vunpack.i.h.bf16 %v3088_v9 }
 0x145   : > { %v5113_v10 = vsel %vm1911_vm8, %v1894_v27, %v3145_v59  ;;  %v5116_v37 = vsel %vm1911_vm8, %v1893_v50, %v3144_v55  ;;  %v6379_v59 = vld [vmem:[#allocation7_spill] sm:$0xff]  ;;  %v2937_v24 = vsel %vm2931_vm9, %v2936_v61, %v435_v42  ;;  %v1900_v27 = vsel %vm1878_vm7, %v4540_v39, %v3075_v20 }
 0x146   : > { %v1899_v50 = vsel %vm1878_vm7, %v4518_v28, %v3074_v18  ;;  %v1906_v61 = vsel %vm1878_vm7, %v4717_v7, %v3090_v32 }
 0x147   : > { %3302 = vrot.lane.b32.xlu1 %v6377_v4, %s3763_s13  ;;  %v3089_v4 = vunpack.i.l.bf16 %v3088_v9 }
 0x148   : > { %3322 = vrot.lane.b32.xlu2 %v6378_v52, %s3763_s13 }
 0x14a   : > { %v3158_v5 = vpop.permute.xlu2 %3157 }
 0x14b   : > { %v3160_v63 = vunpack.i.h.bf16 %v3158_v5  ;;  %v3159_v55 = vunpack.i.l.bf16 %v3158_v5 }
 0x14c   : > { %3282 = vrot.lane.b32.xlu0 %v6379_v59, %s3763_s13  ;;  %v543_v59 = vmax.f32 %v2937_v24, -128.0  ;;  %v6383_v24 = vld [vmem:[#allocation34_spill] sm:$0xff] }
 0x14d   : > { %v5131_v46 = vsel %vm1911_vm8, %v1900_v27, %v3160_v63  ;;  %v5134_v21 = vsel %vm1911_vm8, %v1899_v50, %v3159_v55  ;;  %v6381_v27 = vld [vmem:[#allocation19_spill] sm:$0xff] }
 0x14e   : > { %v597_v55 = vmin.f32 %v543_v59, 127.0  ;;  %v6382_v50 = vld [vmem:[#allocation35_spill] sm:$0xff] }
 0x14f   : > { %3317 = vrot.lane.b32.xlu1 %v6380_v15, %s3763_s13 }
 0x150   : > { %3337 = vrot.lane.b32.xlu2 %v4849_v33, %s3763_s13 }
 0x151   : > { %v3098_v5 = vpop.permute.xlu0 %3097  ;;  %v3108_v42 = vpop.permute.xlu1 %3107 }
 0x152   : > { %v3100_v39 = vunpack.i.h.bf16 %v3098_v5  ;;  %v3099_v20 = vunpack.i.l.bf16 %v3098_v5  ;;  %v3110_v28 = vunpack.i.h.bf16 %v3108_v42  ;;  %v3109_v18 = vunpack.i.l.bf16 %v3108_v42  ;;  %v3173_v63 = vpop.permute.xlu2 %3172 }
 0x153   : > { %v3175_v15 = vunpack.i.h.bf16 %v3173_v63  ;;  %v3174_v33 = vunpack.i.l.bf16 %v3173_v63  ;;  %v1905_v5 = vsel %vm1878_vm7, %v4701_v57, %v3089_v4  ;;  %v651_v57 = vadd.f32 %v5083_v8, %v597_v55  ;;  %v5176_v55 = vld [vmem:[%s6108_s4 + $0x10] sm:$0x3] }
 0x154   : > { %3297 = vrot.lane.b32.xlu0 %v6381_v27, %s3763_s13  ;;  %v1880_v9 = vsel %vm1878_vm7, %v6382_v50, %v3100_v39  ;;  %v1879_v52 = vsel %vm1878_vm7, %v6383_v24, %v3099_v20  ;;  %v3040_v39 = vunpack.i.h.bf16 %v5040_v2  ;;  %v3039_v50 = vunpack.i.l.bf16 %v5040_v2  ;;  %v6384_v20 = vld [vmem:[#allocation31_spill] sm:$0xff]  ;;  %6386 = vst [vmem:[#allocation11_spill] sm:$0xff] %v5176_v55 }
 0x155   : > { %v1912_v42 = vsel %vm1911_vm8, %v1879_v52, %v3109_v18  ;;  %v1913_v7 = vsel %vm1911_vm8, %v1880_v9, %v3110_v28  ;;  %v5153_v59 = vsel %vm1911_vm8, %v1906_v61, %v3175_v15  ;;  %v5156_v32 = vsel %vm1911_vm8, %v1905_v5, %v3174_v33  ;;  %v6385_v28 = vld [vmem:[#allocation26_spill] sm:$0xff] }
 0x156   : > { %v1886_v33 = vsel %vm1878_vm7, %v4195_v12, %v3040_v39  ;;  %v1885_v15 = vsel %vm1878_vm7, %v4174_v51, %v3039_v50  ;;  %v5179_v12 = vmul.f32 %v5176_v55, %v651_v57  ;;  %v3055_v50 = vunpack.i.h.bf16 %v5067_v62  ;;  %v6389_v55 = vld [vmem:[#allocation33_spill] sm:$0xff] }
 0x157   : > { %3332 = vrot.lane.b32.xlu1 %v6384_v20, %s3763_s13  ;;  %v1376_v57 = vrot.slane %v5020_v11, 1 }
 0x158   : > { %3352 = vrot.lane.b32.xlu2 %v4869_v54, %s3764_s16 }
 0x159   : > { %v3123_v63 = vpop.permute.xlu1 %3122 }
 0x15a   : > { %v3125_v4 = vunpack.i.h.bf16 %v3123_v63  ;;  %v3124_v52 = vunpack.i.l.bf16 %v3123_v63  ;;  %v3188_v2 = vpop.permute.xlu2 %3187  ;;  %v3054_v63 = vunpack.i.l.bf16 %v5067_v62  ;;  %v1892_v62 = vsel %vm1878_vm7, %v4250_v40, %v3055_v50 }
 0x15b   : > { %v3190_v9 = vunpack.i.h.bf16 %v3188_v2  ;;  %v3189_v24 = vunpack.i.l.bf16 %v3188_v2  ;;  %v3070_v50 = vunpack.i.h.bf16 %v5094_v0 }
 0x15c   : > { %3312 = vrot.lane.b32.xlu0 %v6385_v28, %s3763_s13  ;;  %v1919_v18 = vsel %vm1911_vm8, %v1886_v33, %v3125_v4  ;;  %v1918_v61 = vsel %vm1911_vm8, %v1885_v15, %v3124_v52  ;;  %v6388_v4 = vld [vmem:[#allocation32_spill] sm:$0xff]  ;;  %v1375_v52 = vrot.slane %v5017_v45, 1  ;;  %v1378_v33 = vrot.slane %v5179_v12, 1 }
 0x15d   : > { %v5184_v5 = vsel %vm1944_vm10, %v1912_v42, %v3189_v24  ;;  %v5187_v39 = vsel %vm1944_vm10, %v1913_v7, %v3190_v9  ;;  %v3035_v42 = vunpack.i.h.bf16 %v5006_v6  ;;  %v3034_v9 = vunpack.i.l.bf16 %v5006_v6 }
 0x15e   : > { %v5181_v51 = vpop.permute.xlu0 %3102  ;;  %6387 = vst [vmem:[#allocation35_spill] sm:$0xff] %v5187_v39  ;;  %v1891_v24 = vsel %vm1878_vm7, %v4232_v3, %v3054_v63  ;;  %v1379_v6 = vsel %vm922_vm5, %v1376_v57, %v1378_v33  ;;  %v3069_v63 = vunpack.i.l.bf16 %v5094_v0 }
 0x15f   : > { %3347 = vrot.lane.b32.xlu1 %v6388_v4, %s3764_s16 }
 0x160   : > { %3367 = vrot.lane.b32.xlu2 %v4893_v48, %s3764_s16 }
 0x161   : > { %v3138_v15 = vpop.permute.xlu1 %3137 }
 0x162   : > { %v3140_v7 = vunpack.i.h.bf16 %v3138_v15  ;;  %v3139_v2 = vunpack.i.l.bf16 %v3138_v15  ;;  %v3203_v4 = vpop.permute.xlu2 %3202  ;;  %v1377_v15 = vsel %vm922_vm5, %v1375_v52, %v1376_v57  ;;  %v1884_v52 = vsel %vm1878_vm7, %v4011_v49, %v3035_v42 }
 0x163   : > { %v3205_v8 = vunpack.i.h.bf16 %v3203_v4  ;;  %v3204_v54 = vunpack.i.l.bf16 %v3203_v4  ;;  %v1883_v57 = vsel %vm1878_vm7, %v4001_v43, %v3034_v9  ;;  %v3049_v49 = vunpack.i.l.bf16 %v4930_v16 }
 0x164   : > { %3327 = vrot.lane.b32.xlu0 %v6389_v55, %s3763_s13  ;;  %v1925_v27 = vsel %vm1911_vm8, %v1892_v62, %v3140_v7  ;;  %v1924_v48 = vsel %vm1911_vm8, %v1891_v24, %v3139_v2  ;;  %v1898_v43 = vsel %vm1878_vm7, %v4411_v35, %v3070_v50  ;;  %v1897_v42 = vsel %vm1878_vm7, %v4394_v25, %v3069_v63 }
 0x165   : > { %v5211_v40 = vsel %vm1944_vm10, %v1918_v61, %v3204_v54  ;;  %v5214_v3 = vsel %vm1944_vm10, %v1919_v18, %v3205_v8  ;;  %v5224_v54 = vpack.i.bf16 %v1379_v6, %v1377_v15  ;;  %v3050_v61 = vunpack.i.h.bf16 %v4930_v16 }
 0x166   : > { %v3118_v39 = vpop.permute.xlu0 %3117  ;;  %v3085_v35 = vunpack.i.h.bf16 %v5118_v13  ;;  %v3084_v25 = vunpack.i.l.bf16 %v5118_v13  ;;  %v3065_v13 = vunpack.i.h.bf16 %v4959_v23 }
 0x167   : > { %v3120_v7 = vunpack.i.h.bf16 %v3118_v39  ;;  %v3119_v62 = vunpack.i.l.bf16 %v3118_v39  ;;  %3362 = vrot.lane.b32.xlu1 %v4798_v44, %s3764_s16 }
 0x168   : > { %3382 = vrot.lane.b32.xlu2 %v4918_v1, %s3764_s16 }
 0x169   : > { %v5227_v8 = vsel %vm1911_vm8, %v1884_v52, %v3120_v7  ;;  %v5230_v18 = vsel %vm1911_vm8, %v1883_v57, %v3119_v62  ;;  %v3153_v0 = vpop.permute.xlu1 %3152  ;;  %v1890_v62 = vsel %vm1878_vm7, %v4132_v56, %v3050_v61  ;;  %v1889_v52 = vsel %vm1878_vm7, %v4125_v53, %v3049_v49 }
 0x16a   : > { %v3155_v39 = vunpack.i.h.bf16 %v3153_v0  ;;  %v3154_v33 = vunpack.i.l.bf16 %v3153_v0  ;;  %v3218_v2 = vpop.permute.xlu2 %3217  ;;  %v1904_v56 = vsel %vm1878_vm7, %v4611_v14, %v3085_v35  ;;  %v1903_v53 = vsel %vm1878_vm7, %v4593_v22, %v3084_v25  ;;  %v6390_v25 = vld [vmem:[#allocation38_spill] sm:$0xff] }
 0x16b   : > { %v3220_v4 = vunpack.i.h.bf16 %v3218_v2  ;;  %v3219_v15 = vunpack.i.l.bf16 %v3218_v2 }
 0x16c   : > { %3342 = vrot.lane.b32.xlu0 %v5224_v54, %s3763_s13  ;;  %v1931_v9 = vsel %vm1911_vm8, %v1898_v43, %v3155_v39  ;;  %v1930_v24 = vsel %vm1911_vm8, %v1897_v42, %v3154_v33  ;;  %v3064_v33 = vunpack.i.l.bf16 %v4959_v23  ;;  %v3104_v23 = vunpack.i.l.bf16 %v5181_v51 }
 0x16d   : > { %v5245_v7 = vsel %vm1944_vm10, %v1924_v48, %v3219_v15  ;;  %v5248_v16 = vsel %vm1944_vm10, %v1925_v27, %v3220_v4  ;;  %v3105_v4 = vunpack.i.h.bf16 %v5181_v51  ;;  %v3080_v51 = vunpack.i.h.bf16 %v4982_v60 }
 0x16e   : > { %v3133_v6 = vpop.permute.xlu0 %3132 }
 0x16f   : > { %v3135_v50 = vunpack.i.h.bf16 %v3133_v6  ;;  %v3134_v63 = vunpack.i.l.bf16 %v3133_v6  ;;  %3377 = vrot.lane.b32.xlu1 %v4837_v31, %s3764_s16 }
 0x170   : > { %3397 = vrot.lane.b32.xlu2 %v4945_v47, %s3764_s16 }
 0x171   : > { %v5259_v48 = vsel %vm1911_vm8, %v1890_v62, %v3135_v50  ;;  %v5262_v27 = vsel %vm1911_vm8, %v1889_v52, %v3134_v63  ;;  %v3168_v57 = vpop.permute.xlu1 %3167  ;;  %v1896_v50 = vsel %vm1878_vm7, %v6337_v58, %v3065_v13  ;;  %v1895_v63 = vsel %vm1878_vm7, %v6336_v36, %v3064_v33 }
 0x172   : > { %v3170_v0 = vunpack.i.h.bf16 %v3168_v57  ;;  %v3169_v39 = vunpack.i.l.bf16 %v3168_v57  ;;  %v3233_v61 = vpop.permute.xlu2 %3232  ;;  %v3079_v62 = vunpack.i.l.bf16 %v4982_v60  ;;  %v1910_v58 = vsel %vm1878_vm7, %v4816_v30, %v3105_v4 }
 0x173   : > { %v3235_v42 = vunpack.i.h.bf16 %v3233_v61  ;;  %v3234_v2 = vunpack.i.l.bf16 %v3233_v61  ;;  %v1909_v36 = vsel %vm1878_vm7, %v4812_v38, %v3104_v23  ;;  %v1476_v60 = vrot.slane %v5017_v45, 2  ;;  %v6392_v23 = vld [vmem:[#allocation41_spill] sm:$0xff] }
 0x174   : > { %3357 = vrot.lane.b32.xlu0 %v4818_v41, %s3764_s16  ;;  %v1937_v49 = vsel %vm1911_vm8, %v1904_v56, %v3170_v0  ;;  %v1936_v43 = vsel %vm1911_vm8, %v1903_v53, %v3169_v39  ;;  %v1477_v39 = vrot.slane %v5020_v11, 2  ;;  %v1479_v33 = vrot.slane %v5179_v12, 2  ;;  %v6391_v56 = vld [vmem:[#allocation37_spill] sm:$0xff] }
 0x175   : > { %v5279_v14 = vsel %vm1944_vm10, %v1930_v24, %v3234_v2  ;;  %v5282_v22 = vsel %vm1944_vm10, %v1931_v9, %v3235_v42  ;;  %v1902_v45 = vsel %vm1878_vm7, %v6343_v17, %v3080_v51  ;;  %v3095_v51 = vunpack.i.h.bf16 %v5012_v26 }
 0x176   : > { %v3148_v15 = vpop.permute.xlu0 %3147 }
 0x177   : > { %v3150_v6 = vunpack.i.h.bf16 %v3148_v15  ;;  %v3149_v35 = vunpack.i.l.bf16 %v3148_v15  ;;  %3392 = vrot.lane.b32.xlu1 %v6390_v25, %s3764_s16  ;;  %v1901_v15 = vsel %vm1878_vm7, %v6342_v34, %v3079_v62  ;;  %v3094_v34 = vunpack.i.l.bf16 %v5012_v26 }
 0x178   : > { %3412 = vrot.lane.b32.xlu2 %v4968_v19, %s3764_s16 }
 0x179   : > { %v5293_v24 = vsel %vm1911_vm8, %v1896_v50, %v3150_v6  ;;  %v5296_v9 = vsel %vm1911_vm8, %v1895_v63, %v3149_v35  ;;  %v3183_v52 = vpop.permute.xlu1 %3182  ;;  %v1478_v6 = vsel %vm1099_vm0, %v1476_v60, %v1477_v39  ;;  %v1480_v35 = vsel %vm1099_vm0, %v1477_v39, %v1479_v33 }
 0x17a   : > { %v3185_v57 = vunpack.i.h.bf16 %v3183_v52  ;;  %v3184_v13 = vunpack.i.l.bf16 %v3183_v52  ;;  %v3248_v0 = vpop.permute.xlu2 %3247  ;;  %v5335_v62 = vpack.i.bf16 %v1480_v35, %v1478_v6  ;;  %v6397_v6 = vld [vmem:[#allocation15_spill] sm:$0xff] }
 0x17b   : > { %v3250_v30 = vunpack.i.h.bf16 %v3248_v0  ;;  %v3249_v42 = vunpack.i.l.bf16 %v3248_v0 }
 0x17c   : > { %3372 = vrot.lane.b32.xlu0 %v6391_v56, %s3764_s16  ;;  %v1942_v53 = vsel %vm1911_vm8, %v1909_v36, %v3184_v13  ;;  %v1943_v61 = vsel %vm1911_vm8, %v1910_v58, %v3185_v57  ;;  %v6393_v58 = vld [vmem:[#allocation40_spill] sm:$0xff] }
 0x17d   : > { %v5312_v38 = vsel %vm1944_vm10, %v1936_v43, %v3249_v42  ;;  %v5315_v4 = vsel %vm1944_vm10, %v1937_v49, %v3250_v30  ;;  %v6394_v30 = vld [vmem:[#allocation29_spill] sm:$0xff]  ;;  %v6395_v42 = vld [vmem:[#allocation28_spill] sm:$0xff] }
 0x17e   : > { %v3163_v2 = vpop.permute.xlu0 %3162 }
 0x17f   : > { %v3165_v11 = vunpack.i.h.bf16 %v3163_v2  ;;  %v3164_v12 = vunpack.i.l.bf16 %v3163_v2  ;;  %3407 = vrot.lane.b32.xlu1 %v6392_v23, %s3764_s16 }
 0x180   : > { %3427 = vrot.lane.b32.xlu2 %v4988_v29, %s3765_s20 }
 0x181   : > { %v5326_v43 = vsel %vm1911_vm8, %v1902_v45, %v3165_v11  ;;  %v5329_v49 = vsel %vm1911_vm8, %v1901_v15, %v3164_v12  ;;  %v3198_v50 = vpop.permute.xlu1 %3197 }
 0x182   : > { %v3200_v17 = vunpack.i.h.bf16 %v3198_v50  ;;  %v3199_v63 = vunpack.i.l.bf16 %v3198_v50  ;;  %v3263_v52 = vpop.permute.xlu2 %3262 }
 0x183   : > { %v3265_v13 = vunpack.i.h.bf16 %v3263_v52  ;;  %v3264_v29 = vunpack.i.l.bf16 %v3263_v52 }
 0x184   : > { %3387 = vrot.lane.b32.xlu0 %v6393_v58, %s3764_s16  ;;  %v1949_v36 = vsel %vm1944_vm10, %v5230_v18, %v3199_v63  ;;  %v1950_v57 = vsel %vm1944_vm10, %v5227_v8, %v3200_v17  ;;  %v1908_v18 = vsel %vm1878_vm7, %v6394_v30, %v3095_v51  ;;  %v1907_v8 = vsel %vm1878_vm7, %v6395_v42, %v3094_v34 }
 0x185   : > { %v5344_v60 = vsel %vm1944_vm10, %v1942_v53, %v3264_v29  ;;  %v5347_v26 = vsel %vm1944_vm10, %v1943_v61, %v3265_v13  ;;  %v6396_v61 = vld [vmem:[#allocation6_spill] sm:$0xff] }
 0x186   : > { %v3178_v0 = vpop.permute.xlu0 %3177 }
 0x187   : > { %v3180_v39 = vunpack.i.h.bf16 %v3178_v0  ;;  %v3179_v33 = vunpack.i.l.bf16 %v3178_v0  ;;  %3422 = vrot.lane.b32.xlu1 %v5335_v62, %s3764_s16  ;;  %v6398_v0 = vld [vmem:[#allocation17_spill] sm:$0xff] }
 0x188   : > { %3442 = vrot.lane.b32.xlu2 %v6396_v61, %s3765_s20 }
 0x189   : > { %v5356_v2 = vsel %vm1911_vm8, %v1908_v18, %v3180_v39  ;;  %v5359_v53 = vsel %vm1911_vm8, %v1907_v8, %v3179_v33  ;;  %v3213_v45 = vpop.permute.xlu1 %3212  ;;  %v6399_v39 = vld [vmem:[#allocation46_spill] sm:$0xff]  ;;  %v6400_v33 = vld [vmem:[#allocation45_spill] sm:$0xff]  ;;  %v6402_v8 = vld [vmem:[#allocation16_spill] sm:$0xff] }
 0x18a   : > { %v3215_v11 = vunpack.i.h.bf16 %v3213_v45  ;;  %v3214_v12 = vunpack.i.l.bf16 %v3213_v45  ;;  %v3278_v15 = vpop.permute.xlu2 %3277 }
 0x18b   : > { %v3280_v17 = vunpack.i.h.bf16 %v3278_v15  ;;  %v3279_v63 = vunpack.i.l.bf16 %v3278_v15 }
 0x18c   : > { %3402 = vrot.lane.b32.xlu0 %v6397_v6, %s3764_s16  ;;  %v1955_v35 = vsel %vm1944_vm10, %v5262_v27, %v3214_v12  ;;  %v1956_v50 = vsel %vm1944_vm10, %v5259_v48, %v3215_v11 }
 0x18d   : > { %v5370_v34 = vsel %vm1977_vm11, %v1949_v36, %v3279_v63  ;;  %v5373_v52 = vsel %vm1977_vm11, %v1950_v57, %v3280_v17  ;;  %v6401_v36 = vld [vmem:[#allocation43_spill] sm:$0xff] }
 0x18e   : > { %v3193_v51 = vpop.permute.xlu0 %3192 }
 0x18f   : > { %v3195_v13 = vunpack.i.h.bf16 %v3193_v51  ;;  %v3194_v29 = vunpack.i.l.bf16 %v3193_v51  ;;  %3437 = vrot.lane.b32.xlu1 %v6398_v0, %s3765_s20  ;;  %v6404_v0 = vld [vmem:[#allocation50_spill] sm:$0xff] }
 0x190   : > { %3457 = vrot.lane.b32.xlu2 %v6401_v36, %s3765_s20 }
 0x191   : > { %v5379_v27 = vsel %vm1944_vm10, %v6399_v39, %v3195_v13  ;;  %v5383_v48 = vsel %vm1944_vm10, %v6400_v33, %v3194_v29  ;;  %v3228_v30 = vpop.permute.xlu1 %3227  ;;  %v6403_v29 = vld [vmem:[#allocation10_spill] sm:$0xff]  ;;  %v6405_v39 = vld [vmem:[#allocation51_spill] sm:$0xff] }
 0x192   : > { %v3230_v18 = vunpack.i.h.bf16 %v3228_v30  ;;  %v3229_v57 = vunpack.i.l.bf16 %v3228_v30  ;;  %v3293_v42 = vpop.permute.xlu2 %3292 }
 0x193   : > { %v3295_v11 = vunpack.i.h.bf16 %v3293_v42  ;;  %v3294_v12 = vunpack.i.l.bf16 %v3293_v42 }
 0x194   : > { %3417 = vrot.lane.b32.xlu0 %v6402_v8, %s3764_s16  ;;  %v1961_v45 = vsel %vm1944_vm10, %v5296_v9, %v3229_v57  ;;  %v1962_v61 = vsel %vm1944_vm10, %v5293_v24, %v3230_v18  ;;  %v6407_v18 = vld [vmem:[#allocation9_spill] sm:$0xff] }
 0x195   : > { %v5394_v17 = vsel %vm1977_vm11, %v1955_v35, %v3294_v12  ;;  %v5397_v63 = vsel %vm1977_vm11, %v1956_v50, %v3295_v11  ;;  %v6406_v35 = vld [vmem:[#allocation48_spill] sm:$0xff] }
 0x196   : > { %v3208_v15 = vpop.permute.xlu0 %3207 }
 0x197   : > { %v3210_v51 = vunpack.i.h.bf16 %v3208_v15  ;;  %v3209_v13 = vunpack.i.l.bf16 %v3208_v15  ;;  %3452 = vrot.lane.b32.xlu1 %v6403_v29, %s3765_s20 }
 0x198   : > { %3472 = vrot.lane.b32.xlu2 %v6406_v35, %s3765_s20 }
 0x199   : > { %v5403_v9 = vsel %vm1944_vm10, %v6404_v0, %v3210_v51  ;;  %v5407_v24 = vsel %vm1944_vm10, %v6405_v39, %v3209_v13  ;;  %v3243_v33 = vpop.permute.xlu1 %3242  ;;  %v6408_v39 = vld [vmem:[#allocation22_spill] sm:$0xff] }
 0x19a   : > { %v3245_v30 = vunpack.i.h.bf16 %v3243_v33  ;;  %v3244_v50 = vunpack.i.l.bf16 %v3243_v33  ;;  %v3308_v36 = vpop.permute.xlu2 %3307 }
 0x19b   : > { %v3310_v11 = vunpack.i.h.bf16 %v3308_v36  ;;  %v3309_v12 = vunpack.i.l.bf16 %v3308_v36 }
 0x19c   : > { %3432 = vrot.lane.b32.xlu0 %v6407_v18, %s3765_s20  ;;  %v1967_v57 = vsel %vm1944_vm10, %v5329_v49, %v3244_v50  ;;  %v1968_v42 = vsel %vm1944_vm10, %v5326_v43, %v3245_v30  ;;  %v6409_v30 = vld [vmem:[#allocation21_spill] sm:$0xff] }
 0x19d   : > { %v5418_v51 = vsel %vm1977_vm11, %v1961_v45, %v3309_v12  ;;  %v5421_v13 = vsel %vm1977_vm11, %v1962_v61, %v3310_v11 }
 0x19e   : > { %v3223_v15 = vpop.permute.xlu0 %3222 }
 0x19f   : > { %v3225_v29 = vunpack.i.h.bf16 %v3223_v15  ;;  %v3224_v0 = vunpack.i.l.bf16 %v3223_v15  ;;  %3467 = vrot.lane.b32.xlu1 %v6408_v39, %s3765_s20 }
 0x1a0   : > { %3487 = vrot.lane.b32.xlu2 %v6390_v25, %s3766_s27 }
 0x1a1   : > { %v5427_v49 = vsel %vm1944_vm10, %v5113_v10, %v3225_v29  ;;  %v5431_v43 = vsel %vm1944_vm10, %v5116_v37, %v3224_v0  ;;  %v3258_v33 = vpop.permute.xlu1 %3257 }
 0x1a2   : > { %v3260_v45 = vunpack.i.h.bf16 %v3258_v33  ;;  %v3259_v61 = vunpack.i.l.bf16 %v3258_v33  ;;  %v3323_v35 = vpop.permute.xlu2 %3322  ;;  %v6411_v33 = vld [vmem:[#allocation24_spill] sm:$0xff] }
 0x1a3   : > { %v3325_v36 = vunpack.i.h.bf16 %v3323_v35  ;;  %v3324_v37 = vunpack.i.l.bf16 %v3323_v35 }
 0x1a4   : > { %3447 = vrot.lane.b32.xlu0 %v6409_v30, %s3765_s20  ;;  %v1973_v50 = vsel %vm1944_vm10, %v5359_v53, %v3259_v61  ;;  %v1974_v10 = vsel %vm1944_vm10, %v5356_v2, %v3260_v45 }
 0x1a5   : > { %v5442_v11 = vsel %vm1977_vm11, %v1967_v57, %v3324_v37  ;;  %v5445_v25 = vsel %vm1977_vm11, %v1968_v42, %v3325_v36  ;;  %v6410_v57 = vld [vmem:[#allocation14_spill] sm:$0xff] }
 0x1a6   : > { %v3238_v18 = vpop.permute.xlu0 %3237 }
 0x1a7   : > { %v3240_v12 = vunpack.i.h.bf16 %v3238_v18  ;;  %v3239_v15 = vunpack.i.l.bf16 %v3238_v18  ;;  %3482 = vrot.lane.b32.xlu1 %v6384_v20, %s3767_s28  ;;  %v6412_v18 = vld [vmem:[#allocation8_spill] sm:$0xff] }
 0x1a8   : > { %3502 = vrot.lane.b32.xlu2 %v6410_v57, %s3767_s28 }
 0x1a9   : > { %v5451_v53 = vsel %vm1944_vm10, %v5131_v46, %v3240_v12  ;;  %v5455_v2 = vsel %vm1944_vm10, %v5134_v21, %v3239_v15  ;;  %v3273_v29 = vpop.permute.xlu1 %3272 }
 0x1aa   : > { %v3275_v42 = vunpack.i.h.bf16 %v3273_v29  ;;  %v3274_v0 = vunpack.i.l.bf16 %v3273_v29  ;;  %v3338_v39 = vpop.permute.xlu2 %3337 }
 0x1ab   : > { %v3340_v45 = vunpack.i.h.bf16 %v3338_v39  ;;  %v3339_v61 = vunpack.i.l.bf16 %v3338_v39 }
 0x1ac   : > { %3462 = vrot.lane.b32.xlu0 %v6411_v33, %s3765_s20  ;;  %v1980_v20 = vsel %vm1977_vm11, %v5383_v48, %v3274_v0  ;;  %v1981_v46 = vsel %vm1977_vm11, %v5379_v27, %v3275_v42 }
 0x1ad   : > { %v5466_v35 = vsel %vm1977_vm11, %v1973_v50, %v3339_v61  ;;  %v5469_v30 = vsel %vm1977_vm11, %v1974_v10, %v3340_v45  ;;  %v6413_v50 = vld [vmem:[#allocation47_spill] sm:$0xff] }
 0x1ae   : > { %v3253_v21 = vpop.permute.xlu0 %3252 }
 0x1af   : > { %v3255_v36 = vunpack.i.h.bf16 %v3253_v21  ;;  %v3254_v37 = vunpack.i.l.bf16 %v3253_v21  ;;  %3497 = vrot.lane.b32.xlu1 %v6412_v18, %s3767_s28 }
 0x1b0   : > { %3517 = vrot.lane.b32.xlu2 %v6413_v50, %s3765_s20 }
 0x1b1   : > { %v5475_v48 = vsel %vm1944_vm10, %v5153_v59, %v3255_v36  ;;  %v5479_v27 = vsel %vm1944_vm10, %v5156_v32, %v3254_v37  ;;  %v3288_v12 = vpop.permute.xlu1 %3287 }
 0x1b2   : > { %v3290_v15 = vunpack.i.h.bf16 %v3288_v12  ;;  %v3289_v10 = vunpack.i.l.bf16 %v3288_v12  ;;  %v3353_v29 = vpop.permute.xlu2 %3352 }
 0x1b3   : > { %v3355_v42 = vunpack.i.h.bf16 %v3353_v29  ;;  %v3354_v32 = vunpack.i.l.bf16 %v3353_v29 }
 0x1b4   : > { %3477 = vrot.lane.b32.xlu0 %v6385_v28, %s3767_s28  ;;  %v1986_v57 = vsel %vm1977_vm11, %v5407_v24, %v3289_v10  ;;  %v1987_v59 = vsel %vm1977_vm11, %v5403_v9, %v3290_v15  ;;  %v6416_v24 = vld [vmem:[#allocation35_spill] sm:$0xff] }
 0x1b5   : > { %v5490_v39 = vsel %vm2010_vm12, %v1980_v20, %v3354_v32  ;;  %v5493_v33 = vsel %vm2010_vm12, %v1981_v46, %v3355_v42  ;;  %v6417_v20 = vld [vmem:[#allocation36_spill] sm:$0xff] }
 0x1b6   : > { %v3268_v0 = vpop.permute.xlu0 %3267  ;;  %6414 = vst [vmem:[#allocation34_spill] sm:$0xff] %v5490_v39 }
 0x1b7   : > { %6415 = vst [vmem:[#allocation31_spill] sm:$0xff] %v5493_v33  ;;  %v3270_v45 = vunpack.i.h.bf16 %v3268_v0  ;;  %v3269_v61 = vunpack.i.l.bf16 %v3268_v0  ;;  %3512 = vrot.lane.b32.xlu1 %v6391_v56, %s3766_s27 }
 0x1b8   : > { %3532 = vrot.lane.b32.xlu2 %v6417_v20, %s3767_s28 }
 0x1b9   : > { %v5499_v28 = vsel %vm1977_vm11, %v5184_v5, %v3269_v61  ;;  %v5503_v9 = vsel %vm1977_vm11, %v6416_v24, %v3270_v45  ;;  %v3303_v21 = vpop.permute.xlu1 %3302  ;;  %v320_v45 = vld [vmem:[%s3869_s17 + $0x198] sm:$0xff]  ;;  %v321_v61 = vld [vmem:[%s3869_s17 + $0x1a0] sm:$0xff] }
 0x1ba   : > { %v3305_v36 = vunpack.i.h.bf16 %v3303_v21  ;;  %v3304_v46 = vunpack.i.l.bf16 %v3303_v21  ;;  %v3368_v37 = vpop.permute.xlu2 %3367  ;;  %v3676_v21 = vld [vmem:[%s6106_s2] ss:$0 sm:$0xff] }
 0x1bb   : > { %v3370_v18 = vunpack.i.h.bf16 %v3368_v37  ;;  %v3369_v12 = vunpack.i.l.bf16 %v3368_v37  ;;  %v378_v20 = vmul.f32 %v3676_v21, %v320_v45 }
 0x1bc   : > { %3492 = vrot.lane.b32.xlu0 %v4968_v19, %s3766_s27  ;;  %v1992_v56 = vsel %vm1977_vm11, %v5431_v43, %v3304_v46  ;;  %v1993_v5 = vsel %vm1977_vm11, %v5427_v49, %v3305_v36  ;;  %v6418_v19 = vld [vmem:[#allocation25_spill] sm:$0xff]  ;;  %v6420_v36 = vld [vmem:[#allocation39_spill] sm:$0xff] }
 0x1bd   : > { %v5514_v15 = vsel %vm2010_vm12, %v1986_v57, %v3369_v12  ;;  %v5517_v10 = vsel %vm2010_vm12, %v1987_v59, %v3370_v18  ;;  %v6419_v57 = vld [vmem:[#allocation13_spill] sm:$0xff] }
 0x1be   : > { %v3283_v50 = vpop.permute.xlu0 %3282  ;;  %v6421_v12 = vld [vmem:[#allocation49_spill] sm:$0xff] }
 0x1bf   : > { %v3285_v29 = vunpack.i.h.bf16 %v3283_v50  ;;  %v3284_v42 = vunpack.i.l.bf16 %v3283_v50  ;;  %3527 = vrot.lane.b32.xlu1 %v6418_v19, %s3767_s28  ;;  %v436_v50 = vsub.f32 %v378_v20, %v6421_v12 }
 0x1c0   : > { %3547 = vrot.lane.b32.xlu2 %v6419_v57, %s3767_s28 }
 0x1c1   : > { %v5523_v43 = vsel %vm1977_vm11, %v5214_v3, %v3285_v29  ;;  %v5527_v49 = vsel %vm1977_vm11, %v5211_v40, %v3284_v42  ;;  %v3318_v32 = vpop.permute.xlu1 %3317  ;;  %v379_v3 = vmul.f32 %v3676_v21, %v321_v61 }
 0x1c2   : > { %v3320_v0 = vunpack.i.h.bf16 %v3318_v32  ;;  %v3319_v59 = vunpack.i.l.bf16 %v3318_v32  ;;  %v3383_v24 = vpop.permute.xlu2 %3382 }
 0x1c3   : > { %v3385_v37 = vunpack.i.h.bf16 %v3383_v24  ;;  %v3384_v18 = vunpack.i.l.bf16 %v3383_v24  ;;  %v437_v29 = vsub.f32 %v379_v3, %v6421_v12 }
 0x1c4   : > { %3507 = vrot.lane.b32.xlu0 %v6420_v36, %s3766_s27  ;;  %v1998_v40 = vsel %vm1977_vm11, %v5455_v2, %v3319_v59  ;;  %v1999_v46 = vsel %vm1977_vm11, %v5451_v53, %v3320_v0  ;;  %v2940_v2 = vcvt.f32.s32 %v436_v50  ;;  %v322_v0 = vld [vmem:[%s3869_s17 + $0x1a8] sm:$0x3]  ;;  %v2943_v36 = vand.u32 2147483648, %v436_v50 }
 0x1c5   : > { %v5545_v19 = vsel %vm2010_vm12, %v1992_v56, %v3384_v18  ;;  %v5548_v32 = vsel %vm2010_vm12, %v1993_v5, %v3385_v37  ;;  %v2948_v53 = vcvt.f32.s32 %v437_v29  ;;  %v380_v59 = vmul.f32 %v3676_v21, %v322_v0 }
 0x1c6   : > { %v3298_v42 = vpop.permute.xlu0 %3297  ;;  %v2941_v3 = vcvt.s32.f32 %v2940_v2  ;;  %v2951_v18 = vand.u32 2147483648, %v437_v29 }
 0x1c7   : > { %v3300_v57 = vunpack.i.h.bf16 %v3298_v42  ;;  %v3299_v45 = vunpack.i.l.bf16 %v3298_v42  ;;  %3542 = vrot.lane.b32.xlu1 %v6402_v8, %s3766_s27  ;;  %v2949_v37 = vcvt.s32.f32 %v2948_v53  ;;  %v438_v21 = vsub.f32 %v380_v59, %v6421_v12 }
 0x1c8   : > { %3562 = vrot.lane.b32.xlu2 %v4837_v31, %s3766_s27  ;;  %v2942_v0 = vand.u32 2147483647, %v2941_v3  ;;  %v2946_v59 = vand.u32 2147483647, %v437_v29 }
 0x1c9   : > { %v5555_v61 = vsel %vm1977_vm11, %v5248_v16, %v3300_v57  ;;  %v5559_v56 = vsel %vm1977_vm11, %v5245_v7, %v3299_v45  ;;  %v3333_v24 = vpop.permute.xlu1 %3332  ;;  %v6422_v16 = vld [vmem:[#allocation44_spill] sm:$0xff]  ;;  %v2938_v45 = vand.u32 2147483647, %v436_v50  ;;  %v2956_v2 = vcvt.f32.s32 %v438_v21 }
 0x1ca   : > { %v3335_v5 = vunpack.i.h.bf16 %v3333_v24  ;;  %v3334_v20 = vunpack.i.l.bf16 %v3333_v24  ;;  %v3398_v8 = vpop.permute.xlu2 %3397  ;;  %vm5578_vm14 = vcmp.lt.f32.partialorder %v2946_v59, 8388608.0 }
 0x1cb   : > { %v3400_v57 = vunpack.i.h.bf16 %v3398_v8  ;;  %v3399_v31 = vunpack.i.l.bf16 %v3398_v8  ;;  %vm2939_vm13 = vcmp.lt.f32.partialorder %v2938_v45, 8388608.0  ;;  %v6425_v8 = vld [vmem:[#allocation27_spill] sm:$0xff] }
 0x1cc   : > { %3522 = vrot.lane.b32.xlu0 %v6422_v16, %s3765_s20  ;;  %v2004_v7 = vsel %vm1977_vm11, %v5479_v27, %v3334_v20  ;;  %v2005_v42 = vsel %vm1977_vm11, %v5475_v48, %v3335_v5  ;;  %v2950_v16 = vand.u32 2147483647, %v2949_v37  ;;  %v2944_v48 = vor.u32 %v2943_v36, %v2942_v0 }
 0x1cd   : > { %v5571_v53 = vsel %vm2010_vm12, %v1998_v40, %v3399_v31  ;;  %v5574_v12 = vsel %vm2010_vm12, %v1999_v46, %v3400_v57  ;;  %v2957_v20 = vcvt.s32.f32 %v2956_v2  ;;  %v2954_v0 = vand.u32 2147483647, %v438_v21 }
 0x1ce   : > { %v3313_v24 = vpop.permute.xlu0 %3312  ;;  %v2952_v5 = vor.u32 %v2951_v18, %v2950_v16  ;;  %v2945_v57 = vsel %vm2939_vm13, %v2944_v48, %v436_v50 }
 0x1cf   : > { %v3315_v33 = vunpack.i.h.bf16 %v3313_v24  ;;  %v3314_v39 = vunpack.i.l.bf16 %v3313_v24  ;;  %3557 = vrot.lane.b32.xlu1 %v4818_v41, %s3766_s27  ;;  %v2959_v41 = vand.u32 2147483648, %v438_v21  ;;  %v544_v45 = vmax.f32 %v2945_v57, -128.0 }
 0x1d0   : > { %3577 = vrot.lane.b32.xlu2 %v6425_v8, %s3767_s28  ;;  %v2953_v18 = vsel %vm5578_vm14, %v2952_v5, %v437_v29  ;;  %vm5604_vm15 = vcmp.lt.f32.partialorder %v2954_v0, 8388608.0  ;;  %v3679_v0 = vld [vmem:[%s6108_s4 + $0x8] sm:$0xff] }
 0x1d1   : > { %v5584_v40 = vsel %vm1977_vm11, %v5282_v22, %v3315_v33  ;;  %v5588_v46 = vsel %vm1977_vm11, %v5279_v14, %v3314_v39  ;;  %v3348_v3 = vpop.permute.xlu1 %3347  ;;  %v2958_v22 = vand.u32 2147483647, %v2957_v20  ;;  %v545_v2 = vmax.f32 %v2953_v18, -128.0  ;;  %v3678_v18 = vld [vmem:[%s6108_s4] sm:$0xff] }
 0x1d2   : > { %v3350_v36 = vunpack.i.h.bf16 %v3348_v3  ;;  %v3349_v37 = vunpack.i.l.bf16 %v3348_v3  ;;  %v3413_v31 = vpop.permute.xlu2 %3412  ;;  %v598_v24 = vmin.f32 %v544_v45, 127.0 }
 0x1d3   : > { %v3415_v33 = vunpack.i.h.bf16 %v3413_v31  ;;  %v3414_v50 = vunpack.i.l.bf16 %v3413_v31  ;;  %v2960_v59 = vor.u32 %v2959_v41, %v2958_v22  ;;  %v599_v5 = vmin.f32 %v545_v2, 127.0  ;;  %v6429_v31 = vld [vmem:[#allocation19_spill] sm:$0xff] }
 0x1d4   : > { %3537 = vrot.lane.b32.xlu0 %v4945_v47, %s3766_s27  ;;  %v5598_v14 = vsel %vm2010_vm12, %v5499_v28, %v3349_v37  ;;  %v5602_v39 = vsel %vm2010_vm12, %v5503_v9, %v3350_v36  ;;  %v6428_v9 = vld [vmem:[#allocation30_spill] sm:$0xff] }
 0x1d5   : > { %v5609_v47 = vsel %vm2010_vm12, %v2004_v7, %v3414_v50  ;;  %v5612_v28 = vsel %vm2010_vm12, %v2005_v42, %v3415_v33  ;;  %v2961_v20 = vsel %vm5604_vm15, %v2960_v59, %v438_v21  ;;  %v3677_v42 = vld [vmem:[%s6107_s3] ss:$0 sm:$0xff] }
 0x1d6   : > { %v3328_v16 = vpop.permute.xlu0 %3327  ;;  %v652_v41 = vadd.f32 %v3677_v42, %v598_v24  ;;  %v653_v36 = vadd.f32 %v3677_v42, %v599_v5  ;;  %v6430_v5 = vld [vmem:[#allocation11_spill] sm:$0xff] }
 0x1d7   : > { %v3330_v48 = vunpack.i.h.bf16 %v3328_v16  ;;  %v3329_v27 = vunpack.i.l.bf16 %v3328_v16  ;;  %3572 = vrot.lane.b32.xlu1 %v6428_v9, %s3765_s20 }
 0x1d8   : > { %3592 = vrot.lane.b32.xlu2 %v5335_v62, %s3766_s27  ;;  %v709_v45 = vmul.f32 %v3678_v18, %v652_v41  ;;  %v710_v22 = vmul.f32 %v3679_v0, %v653_v36 }
 0x1d9   : > { %v5620_v3 = vsel %vm1977_vm11, %v5315_v4, %v3330_v48  ;;  %v5624_v7 = vsel %vm1977_vm11, %v5312_v38, %v3329_v27  ;;  %v3363_v8 = vpop.permute.xlu1 %3362  ;;  %v546_v4 = vmax.f32 %v2961_v20, -128.0 }
 0x1da   : > { %v3365_v37 = vunpack.i.h.bf16 %v3363_v8  ;;  %v3364_v21 = vunpack.i.l.bf16 %v3363_v8  ;;  %v5631_v57 = vpop.permute.xlu2 %3427  ;;  %v5657_v16 = vmul.f32 0.0, %v709_v45  ;;  %v5659_v48 = vmul.f32 0.0, %v710_v22 }
 0x1db   : > { %v600_v33 = vmin.f32 %v546_v4, 127.0 }
 0x1dc   : > { %3552 = vrot.lane.b32.xlu0 %v6429_v31, %s3767_s28  ;;  %v2017_v38 = vsel %vm2010_vm12, %v5527_v49, %v3364_v21  ;;  %v2018_v62 = vsel %vm2010_vm12, %v5523_v43, %v3365_v37  ;;  %v3621_v41 = vpack.i.bf16 %v5659_v48, %v5657_v16 }
 0x1dd   : > { %v654_v49 = vadd.f32 %v3677_v42, %v600_v33  ;;  %v1676_v33 = vrot.slane %v5657_v16, 1 }
 0x1de   : > { %v3343_v50 = vpop.permute.xlu0 %3342 }
 0x1df   : > { %v3345_v2 = vunpack.i.h.bf16 %v3343_v50  ;;  %v3344_v24 = vunpack.i.l.bf16 %v3343_v50  ;;  %3587 = vrot.lane.b32.xlu1 %v6397_v6, %s3766_s27  ;;  %v711_v20 = vmul.f32 %v6430_v5, %v654_v49  ;;  %v1677_v50 = vrot.slane %v5659_v48, 1 }
 0x1e0   : > { %3607 = vrot.lane.b32.xlu2 %v4798_v44, %s3766_s27 }
 0x1e1   : > { %v5649_v43 = vsel %vm1977_vm11, %v5344_v60, %v3344_v24  ;;  %v5653_v29 = vsel %vm1977_vm11, %v5347_v26, %v3345_v2  ;;  %v3378_v59 = vpop.permute.xlu1 %3377  ;;  %v6431_v60 = vld [vmem:[#allocation23_spill] sm:$0xff]  ;;  %v5678_v18 = vmul.f32 0.0, %v711_v20 }
 0x1e2   : > { %v3380_v27 = vunpack.i.h.bf16 %v3378_v59  ;;  %v3379_v9 = vunpack.i.l.bf16 %v3378_v59  ;;  %v3443_v6 = vpop.permute.xlu2 %3442 }
 0x1e3   : > { %v3445_v42 = vunpack.i.h.bf16 %v3443_v6  ;;  %v3444_v44 = vunpack.i.l.bf16 %v3443_v6  ;;  %v1679_v2 = vrot.slane %v5678_v18, 1 }
 0x1e4   : > { %3567 = vrot.lane.b32.xlu0 %v6431_v60, %s3765_s20  ;;  %v2023_v26 = vsel %vm2010_vm12, %v5559_v56, %v3379_v9  ;;  %v2024_v8 = vsel %vm2010_vm12, %v5555_v61, %v3380_v27  ;;  %v6432_v56 = vld [vmem:[#allocation18_spill] sm:$0xff] }
 0x1e5   : > { %v5671_v37 = vsel %vm2043_vm1, %v2017_v38, %v3444_v44  ;;  %v5674_v21 = vsel %vm2043_vm1, %v2018_v62, %v3445_v42  ;;  %v1680_v20 = vsel %vm922_vm5, %v1677_v50, %v1679_v2  ;;  %v6434_v42 = vld [vmem:[#allocation7_spill] sm:$0xff]  ;;  %v2166_v44 = vld [vmem:[%s6105_s1 + $0x20] sm:$0xf] }
 0x1e6   : > { %v3358_v36 = vpop.permute.xlu0 %3357 }
 0x1e7   : > { %v3360_v4 = vunpack.i.h.bf16 %v3358_v36  ;;  %v3359_v31 = vunpack.i.l.bf16 %v3358_v36  ;;  %3602 = vrot.lane.b32.xlu1 %v6432_v56, %s3767_s28 }
 0x1e8   : > { %3622 = vrot.lane.b32.xlu2 %v3621_v41, %s3765_s20  ;;  %v2188_v41 = vunpack.c.l.b16 %v2166_v44 }
 0x1e9   : > { %v5682_v61 = vsel %vm2010_vm12, %v5370_v34, %v3359_v31  ;;  %v5686_v45 = vsel %vm2010_vm12, %v5373_v52, %v3360_v4  ;;  %v3393_v38 = vpop.permute.xlu1 %3392  ;;  %v6435_v4 = vld [vmem:[#allocation20_spill] sm:$0xff] }
 0x1ea   : > { %v3395_v62 = vunpack.i.h.bf16 %v3393_v38  ;;  %v3394_v0 = vunpack.i.l.bf16 %v3393_v38  ;;  %v3458_v22 = vpop.permute.xlu2 %3457  ;;  %v2512_v38 = vld [vmem:[%s6105_s1 + $0x18] sm:$0xff] }
 0x1eb   : > { %v3460_v24 = vunpack.i.h.bf16 %v3458_v22  ;;  %v3459_v49 = vunpack.i.l.bf16 %v3458_v22 }
 0x1ec   : > { %3582 = vrot.lane.b32.xlu0 %v5224_v54, %s3767_s28  ;;  %v5696_v34 = vsel %vm2010_vm12, %v5588_v46, %v3394_v0  ;;  %v5700_v52 = vsel %vm2010_vm12, %v5584_v40, %v3395_v62  ;;  %v6433_v54 = vld [vmem:[#allocation5_spill] sm:$0xff]  ;;  %v1678_v46 = vsel %vm922_vm5, %v1676_v33, %v1677_v50  ;;  %vm2247_vm5 = vcmask 1043456  }
 0x1ed   : > { %v5703_v27 = vsel %vm2043_vm1, %v2023_v26, %v3459_v49  ;;  %v5706_v9 = vsel %vm2043_vm1, %v2024_v8, %v3460_v24  ;;  %v3631_v8 = vpack.i.bf16 %v1680_v20, %v1678_v46  ;;  %v6436_v24 = vld [vmem:[#allocation12_spill] sm:$0xff]  ;;  %v2510_v46 = vld [vmem:[%s6105_s1 + $0x8] sm:$0xff] }
 0x1ee   : > { %v3373_v59 = vpop.permute.xlu0 %3372 }
 0x1ef   : > { %v3375_v6 = vunpack.i.h.bf16 %v3373_v59  ;;  %v3374_v5 = vunpack.i.l.bf16 %v3373_v59  ;;  %3617 = vrot.lane.b32.xlu1 %v6433_v54, %s3765_s20  ;;  %v1778_v59 = vrot.slane %v5659_v48, 2  ;;  %s2513_s20 = sshll.u32 %s3750_s24, 8 }
 0x1f0   : > { %3637 = vrot.lane.b32.xlu2 %v6392_v23, %s3766_s27  ;;  %s2386_s17 = scalar_lea.hbm %s6110_s6, %s2513_s20 }
 0x1f1   : > { %v5714_v40 = vsel %vm2010_vm12, %v5394_v17, %v3374_v5  ;;  %v5718_v60 = vsel %vm2010_vm12, %v5397_v63, %v3375_v6  ;;  %v5720_v26 = vpop.permute.xlu1 %3407  ;;  %v2193_v63 = vpack.c.b16 %v2188_v41, %v2188_v41  ;;  %v1780_v6 = vrot.slane %v5678_v18, 2  ;;  %s2389_s13 = sshll.u32 %s2386_s17, 4  ;;  %s2390_s13 = int_to_ptr.hbm [resolvable:$true] %s2389_s13 }
 0x1f2   : > { %v5739_v62 = vpop.permute.xlu2 %3472 }
 0x1f3   : > { %v2249_v23 = vsel %vm2247_vm5, %v2193_v63, 0  ;;  %v1781_v18 = vsel %vm1099_vm0, %v1778_v59, %v1780_v6 }
 0x1f4   : > { %3597 = vrot.lane.b32.xlu0 %v6434_v42, %s3767_s28  ;;  %2515 = vmatpush.bf16.msra.mxu2 %v2249_v23 }
 0x1f5   : > { %2516 = vmatpush.bf16.msra.mxu3 %v2249_v23  ;;  %2254 = vmatpush.bf16.msra.mxu0 %v2249_v23 }
 0x1f6   : > { %v5729_v17 = vpop.permute.xlu0 %3387  ;;  %2514 = vmatpush.bf16.msra.mxu1 %v2249_v23 }
 0x1f7   : > { %3632 = vrot.lane.b32.xlu1 %v3631_v8, %s3767_s28 }
 0x1f8   : > { %3652 = vrot.lane.b32.xlu2 %v6435_v4, %s3767_s28  ;;  %2518 = vmatpush.bf16.msra.mxu2 %v2512_v38 }
 0x1f9   : > { %v3423_v36 = vpop.permute.xlu1 %3422  ;;  %2519 = vmatpush.bf16.msra.mxu3 %v2512_v38  ;;  %2255 = vmatpush.bf16.msra.mxu0 %v2512_v38 }
 0x1fa   : > { %v3425_v31 = vunpack.i.h.bf16 %v3423_v36  ;;  %v3424_v56 = vunpack.i.l.bf16 %v3423_v36  ;;  %2517 = vmatpush.bf16.msra.mxu1 %v2512_v38  ;;  %v5780_v8 = vpop.permute.xlu2 %3487 }
 0x1fc   : > { %3612 = vrot.lane.b32.xlu0 %v4918_v1, %s3766_s27  ;;  %v5743_v0 = vsel %vm2010_vm12, %v5649_v43, %v3424_v56  ;;  %v5747_v22 = vsel %vm2010_vm12, %v5653_v29, %v3425_v31  ;;  %v1777_v1 = vrot.slane %v5657_v16, 2  ;;  %v2511_v43 = vld [vmem:[%s6105_s1 + $0x10] sm:$0xff]  ;;  %v6437_v56 = vld [vmem:[#allocation42_spill] sm:$0xff] }
 0x1fd   : > { %2521 = vmatpush.bf16.msra.mxu2 %v2511_v43  ;;  %2522 = vmatpush.bf16.msra.mxu3 %v2511_v43 }
 0x1fe   : > { %v3403_v33 = vpop.permute.xlu0 %3402  ;;  %2256 = vmatpush.bf16.msra.mxu0 %v2511_v43  ;;  %2520 = vmatpush.bf16.msra.mxu1 %v2511_v43  ;;  %v1779_v48 = vsel %vm1099_vm0, %v1777_v1, %v1778_v59  ;;  %v3390_v1 = vunpack.i.h.bf16 %v5729_v17  ;;  %vm2076_vm0 = vcmask 457728  }
 0x1ff   : > { %v3405_v50 = vunpack.i.h.bf16 %v3403_v33  ;;  %v3404_v2 = vunpack.i.l.bf16 %v3403_v33  ;;  %3647 = vrot.lane.b32.xlu1 %v6436_v24, %s3767_s28 }
 0x201   : > { %v5757_v29 = vsel %vm2010_vm12, %v5442_v11, %v3404_v2  ;;  %v5761_v49 = vsel %vm2010_vm12, %v5445_v25, %v3405_v50  ;;  %v3438_v5 = vpop.permute.xlu1 %3437  ;;  %2524 = vmatpush.bf16.msra.mxu2 %v2510_v46  ;;  %2525 = vmatpush.bf16.msra.mxu3 %v2510_v46 }
 0x202   : > { %v3440_v54 = vunpack.i.h.bf16 %v3438_v5  ;;  %v3439_v16 = vunpack.i.l.bf16 %v3438_v5  ;;  %2257 = vmatpush.bf16.msra.mxu0 %v2510_v46  ;;  %2523 = vmatpush.bf16.msra.mxu1 %v2510_v46 }
 0x204   : > { %3627 = vrot.lane.b32.xlu0 %v6389_v55, %s3767_s28  ;;  %v5772_v11 = vsel %vm2043_vm1, %v5682_v61, %v3439_v16  ;;  %v5776_v25 = vsel %vm2043_vm1, %v5686_v45, %v3440_v54  ;;  %v3641_v61 = vpack.i.bf16 %v1781_v18, %v1779_v48  ;;  %v2509_v45 = vld [vmem:[%s6105_s1] sm:$0xff]  ;;  %s3694_s28 = sshra.s32 %s2390_s13, 4  ;;  %s3695_s28 = int_to_ptr.hbm [resolvable:$true] %s3694_s28 }
 0x205   : > { %2527 = vmatpush.bf16.msra.mxu2 %v2509_v45  ;;  %2528 = vmatpush.bf16.msra.mxu3 %v2509_v45  ;;  %s3696_s14 = scalar_lea.hbm %s3695_s28, 256  ;;  %p3701_p1 = scmp.lt.s32.totalorder %s3695_s28, %s6110_s6 }
 0x206   : > { %v3418_v20 = vpop.permute.xlu0 %3417  ;;  %2258 = vmatpush.bf16.msra.mxu0 %v2509_v45  ;;  %2526 = vmatpush.bf16.msra.mxu1 %v2509_v45  ;;  %p3697_p12 = scmp.ne.s32.totalorder %s3695_s28, %s3696_s14  ;;  %p3702_p2 = scmp.lt.s32.totalorder %s3700_s18, %s3696_s14 }
 0x207   : > { %v3420_v42 = vunpack.i.h.bf16 %v3418_v20  ;;  %v3419_v55 = vunpack.i.l.bf16 %v3418_v20  ;;  %3662 = vrot.lane.b32.xlu1 %v6393_v58, %s3766_s27  ;;  %v3409_v20 = vunpack.i.l.bf16 %v5720_v26 }
 0x208   : > { %p3698_p13 = pnand %p3697_p12, %p3844_p4  ;;  %p3703_p3 = por %p3702_p2, %p3701_p1 }
 0x209   : > { %v5789_v44 = vsel %vm2010_vm12, %v5466_v35, %v3419_v55  ;;  %v5793_v41 = vsel %vm2010_vm12, %v5469_v30, %v3420_v42  ;;  %v3453_v63 = vpop.permute.xlu1 %3452  ;;  %v3503_v30 = vpop.permute.xlu2 %3502  ;;  %v3489_v42 = vunpack.i.l.bf16 %v5780_v8 }
 0x20a   : > { %v3455_v36 = vunpack.i.h.bf16 %v3453_v63  ;;  %v3454_v4 = vunpack.i.l.bf16 %v3453_v63  ;;  %v3505_v55 = vunpack.i.h.bf16 %v3503_v30  ;;  %v3504_v45 = vunpack.i.l.bf16 %v3503_v30  ;;  %p3699_p0 = pneg %p3698_p13 }
 0x20c   : > { %3642 = vrot.lane.b32.xlu0 %v3641_v61, %s3766_s27  ;;  %v5798_v58 = vsel %vm2043_vm1, %v5714_v40, %v3454_v4  ;;  %v5802_v35 = vsel %vm2043_vm1, %v5718_v60, %v3455_v36  ;;  %v3389_v60 = vunpack.i.l.bf16 %v5729_v17  ;;  %v2028_v17 = vsel %vm2010_vm12, %v5421_v13, %v3390_v1  ;;  %p3704_p5 = pnand %p3703_p3, %p3699_p0 }
 0x20e   : > { %v5804_v23 = vpop.permute.xlu0 %3432  ;;  %v2027_v18 = vsel %vm2010_vm12, %v5418_v51, %v3389_v60 }
 0x211   : > { %v3468_v31 = vpop.permute.xlu1 %3467  ;;  %v5810_v50 = vpop.permute.xlu2 %3517 }
 0x212   : > { %v3470_v16 = vunpack.i.h.bf16 %v3468_v31  ;;  %v3469_v46 = vunpack.i.l.bf16 %v3468_v31  ;;  %v3475_v31 = vunpack.i.h.bf16 %v5739_v62 }
 0x214   : > { %3657 = vrot.lane.b32.xlu0 %v6437_v56, %s3766_s27  ;;  %v2060_v4 = vsel %vm2043_vm1, %v2027_v18, %v3469_v46  ;;  %s256_s27 = sand.u32 1, %s3742_s22  }
 0x215   : > { %s2470_s15 = sshll.u32 %s256_s27, 8  ;;  %s2373_s24 = scalar_lea.sflag [#allocation3], %s256_s27 }
 0x216   : > { %v3448_v38 = vpop.permute.xlu0 %3447  ;;  %s5999_s19 = scalar_lea.vmem [#allocation2], %s2470_s15 }
 0x217   : > { %v3450_v5 = vunpack.i.h.bf16 %v3448_v38  ;;  %v3449_v54 = vunpack.i.l.bf16 %v3448_v38  ;;  %s2387_s11 = sshll.u32 %s5999_s19, 4  ;;  %s2388_s11 = int_to_ptr.vmem [resolvable:$true] %s2387_s11 }
 0x219   : > { %v5808_v33 = vpop.permute.xlu1 %3482  ;;  %v5824_v48 = vpop.permute.xlu2 %3532  ;;  %v2052_v51 = vsel %vm2043_vm1, %v5514_v15, %v3449_v54  ;;  %v2053_v13 = vsel %vm2043_vm1, %v5517_v10, %v3450_v5  ;;  %v3474_v10 = vunpack.i.l.bf16 %v5739_v62 }
 0x21a   : > { %v2085_v1 = vsel %vm2076_vm0, %v2052_v51, %v3504_v45  ;;  %v2086_v60 = vsel %vm2076_vm0, %v2053_v13, %v3505_v55  ;;  %v3485_v5 = vunpack.i.h.bf16 %v5808_v33  ;;  %v3484_v54 = vunpack.i.l.bf16 %v5808_v33 }
 0x21b   : > { %v3429_v13 = vunpack.i.l.bf16 %v5631_v57 }
 0x21e   : > { %v3463_v2 = vpop.permute.xlu0 %3462 }
 0x21f   : > { %v3465_v40 = vunpack.i.h.bf16 %v3463_v2  ;;  %v3464_v24 = vunpack.i.l.bf16 %v3463_v2 }
 0x221   : > { %v5816_v43 = vsel %vm2043_vm1, %v5545_v19, %v3464_v24  ;;  %v5820_v59 = vsel %vm2043_vm1, %v5548_v32, %v3465_v40  ;;  %v5822_v6 = vpop.permute.xlu1 %3497  ;;  %v3410_v19 = vunpack.i.h.bf16 %v5720_v26  ;;  %v3490_v32 = vunpack.i.h.bf16 %v5780_v8 }
 0x222   : > { %v2061_v26 = vsel %vm2043_vm1, %v2028_v17, %v3470_v16  ;;  %v2035_v17 = vsel %vm2010_vm12, %v5624_v7, %v3409_v20 }
 0x223   : > { %v2036_v62 = vsel %vm2010_vm12, %v5620_v3, %v3410_v19  ;;  %v2068_v55 = vsel %vm2043_vm1, %v2035_v17, %v3474_v10  ;;  %v3430_v19 = vunpack.i.h.bf16 %v5631_v57 }
 0x226   : > { %v3478_v61 = vpop.permute.xlu0 %3477 }
 0x227   : > { %v3480_v63 = vunpack.i.h.bf16 %v3478_v61  ;;  %v3479_v36 = vunpack.i.l.bf16 %v3478_v61  ;;  %v2069_v61 = vsel %vm2043_vm1, %v2036_v62, %v3475_v31 }
 0x229   : > { %v2093_v8 = vsel %vm2076_vm0, %v2060_v4, %v3479_v36  ;;  %v2094_v56 = vsel %vm2076_vm0, %v2061_v26, %v3480_v63  ;;  %v3513_v30 = vpop.permute.xlu1 %3512  ;;  %v2101_v63 = vsel %vm2076_vm0, %v2068_v55, %v3484_v54  ;;  %v2102_v36 = vsel %vm2076_vm0, %v2069_v61, %v3485_v5 }
 0x22a   : > { %v2126_v38 = vsel %vm2109_vm2, %v2093_v8, %v3489_v42  ;;  %v2127_v2 = vsel %vm2109_vm2, %v2094_v56, %v3490_v32  ;;  %v3515_v15 = vunpack.i.h.bf16 %v3513_v30  ;;  %v3514_v40 = vunpack.i.l.bf16 %v3513_v30  ;;  %v3548_v32 = vpop.permute.xlu2 %3547 }
 0x22b   : > { %v2150_v24 = vpack.c.bf16 %v2127_v2, %v2126_v38  ;;  %v3500_v4 = vunpack.i.h.bf16 %v5822_v6  ;;  %v3499_v26 = vunpack.i.l.bf16 %v5822_v6  ;;  %v2044_v8 = vsel %vm2043_vm1, %v5598_v14, %v3429_v13 }
 0x22c   : > { %v2118_v16 = vsel %vm2109_vm2, %v2085_v1, %v3514_v40  ;;  %v2119_v46 = vsel %vm2109_vm2, %v2086_v60, %v3515_v15  ;;  %v2045_v56 = vsel %vm2043_vm1, %v5602_v39, %v3430_v19  ;;  %v3434_v1 = vunpack.i.l.bf16 %v5804_v23 }
 0x22d   : > { %2496 = vmatmul.msk.bf16.vlgmr.msra.gmra.mxu2 %vm2198_vm3, %v2150_v24  ;;  %v2146_v18 = vpack.c.bf16 %v2119_v46, %v2118_v16  ;;  %v2077_v2 = vsel %vm2076_vm0, %v2044_v8, %v3499_v26  ;;  %v2078_v15 = vsel %vm2076_vm0, %v2045_v56, %v3500_v4  ;;  %v3435_v14 = vunpack.i.h.bf16 %v5804_v23 }
 0x22e   : > { %v3493_v42 = vpop.permute.xlu0 %3492  ;;  %v3549_v39 = vunpack.i.l.bf16 %v3548_v32  ;;  %v3535_v60 = vunpack.i.h.bf16 %v5824_v48  ;;  %v3534_v5 = vunpack.i.l.bf16 %v5824_v48  ;;  %v3550_v54 = vunpack.i.h.bf16 %v3548_v32 }
 0x22f   : > { %v3495_v33 = vunpack.i.h.bf16 %v3493_v42  ;;  %v3494_v45 = vunpack.i.l.bf16 %v3493_v42  ;;  %2492 = vmatmul.msk.bf16.vlgmr.msra.gmra.mxu1 %vm2198_vm3, %v2146_v18  ;;  %v6438_v42 = vld [vmem:[#allocation34_spill] sm:$0xff]  ;;  %v3520_v61 = vunpack.i.h.bf16 %v5810_v50 }
 0x230   : > { %v2046_v55 = vsel %vm2043_vm1, %v6438_v42, %v3434_v1 }
 0x231   : > { %v2134_v51 = vsel %vm2109_vm2, %v2101_v63, %v3494_v45  ;;  %v2135_v7 = vsel %vm2109_vm2, %v2102_v36, %v3495_v33  ;;  %v3528_v20 = vpop.permute.xlu1 %3527  ;;  %v3519_v33 = vunpack.i.l.bf16 %v5810_v50  ;;  %v6439_v45 = vld [vmem:[#allocation31_spill] sm:$0xff]  ;;  %v2079_v63 = vsel %vm2076_vm0, %v2046_v55, %v3549_v39 }
 0x232   : > { %v2154_v3 = vpack.c.bf16 %v2135_v7, %v2134_v51  ;;  %v5875_v57 = vpop.permute.xlu2 %3562  ;;  %v2047_v23 = vsel %vm2043_vm1, %v6439_v45, %v3435_v14  ;;  %v3530_v4 = vunpack.i.h.bf16 %v3528_v20  ;;  %v3529_v8 = vunpack.i.l.bf16 %v3528_v20 }
 0x233   : > { %v2080_v50 = vsel %vm2076_vm0, %v2047_v23, %v3550_v54 }
 0x234   : > { %2500 = vmatmul.msk.bf16.vlgmr.msra.gmra.mxu3 %vm2198_vm3, %v2154_v3 }
 0x236   : > { %v3508_v31 = vpop.permute.xlu0 %3507 }
 0x237   : > { %v3510_v30 = vunpack.i.h.bf16 %v3508_v31  ;;  %v3509_v38 = vunpack.i.l.bf16 %v3508_v31 }
 0x239   : > { %v2110_v40 = vsel %vm2109_vm2, %v2077_v2, %v3509_v38  ;;  %v2111_v6 = vsel %vm2109_vm2, %v2078_v15, %v3510_v30  ;;  %v3543_v10 = vpop.permute.xlu1 %3542  ;;  %v2062_v2 = vsel %vm2043_vm1, %v5696_v34, %v3519_v33  ;;  %v2063_v15 = vsel %vm2043_vm1, %v5700_v52, %v3520_v61 }
 0x23a   : > { %v2142_v24 = vpack.c.bf16 %v2111_v6, %v2110_v40  ;;  %v3545_v17 = vunpack.i.h.bf16 %v3543_v10  ;;  %v3544_v62 = vunpack.i.l.bf16 %v3543_v10  ;;  %v3578_v51 = vpop.permute.xlu2 %3577  ;;  %v2095_v10 = vsel %vm2076_vm0, %v2062_v2, %v3529_v8 }
 0x23b   : > { %v2096_v20 = vsel %vm2076_vm0, %v2063_v15, %v3530_v4  ;;  %v3565_v34 = vunpack.i.h.bf16 %v5875_v57  ;;  %v3564_v52 = vunpack.i.l.bf16 %v5875_v57  ;;  %v3580_v61 = vunpack.i.h.bf16 %v3578_v51 }
 0x23c   : > { %2488 = vmatmul.msk.bf16.vlgmr.msra.gmra.mxu0 %vm2198_vm3, %v2142_v24  ;;  %v3579_v33 = vunpack.i.l.bf16 %v3578_v51 }
 0x23e   : > { %v3523_v16 = vpop.permute.xlu0 %3522 }
 0x23f   : > { %v3525_v46 = vunpack.i.h.bf16 %v3523_v16  ;;  %v3524_v18 = vunpack.i.l.bf16 %v3523_v16 }
 0x241   : > { %v2070_v48 = vsel %vm2043_vm1, %v5609_v47, %v3524_v18  ;;  %v2071_v32 = vsel %vm2043_vm1, %v5612_v28, %v3525_v46  ;;  %v3558_v36 = vpop.permute.xlu1 %3557 }
 0x242   : > { %v2103_v7 = vsel %vm2076_vm0, %v2070_v48, %v3534_v5  ;;  %v2104_v3 = vsel %vm2076_vm0, %v2071_v32, %v3535_v60  ;;  %v3560_v19 = vunpack.i.h.bf16 %v3558_v36  ;;  %v3559_v13 = vunpack.i.l.bf16 %v3558_v36  ;;  %v3593_v60 = vpop.permute.xlu2 %3592 }
 0x243   : > { %v2136_v26 = vsel %vm2109_vm2, %v2103_v7, %v3544_v62  ;;  %v2137_v31 = vsel %vm2109_vm2, %v2104_v3, %v3545_v17 }
 0x244   : > { %v2155_v47 = vpack.c.bf16 %v2137_v31, %v2136_v26  ;;  %v2112_v56 = vsel %vm2109_vm2, %v2079_v63, %v3559_v13  ;;  %v2113_v28 = vsel %vm2109_vm2, %v2080_v50, %v3560_v19  ;;  %v3595_v26 = vunpack.i.h.bf16 %v3593_v60 }
 0x245   : > { %v2143_v30 = vpack.c.bf16 %v2113_v28, %v2112_v56  ;;  %v3594_v31 = vunpack.i.l.bf16 %v3593_v60 }
 0x246   : > { %v3538_v38 = vpop.permute.xlu0 %3537  ;;  %2501 = vmatmul.msk.bf16.gmra.mxu3 %vm2198_vm3, %v2155_v47 }
 0x247   : > { %v3540_v40 = vunpack.i.h.bf16 %v3538_v38  ;;  %v3539_v6 = vunpack.i.l.bf16 %v3538_v38 }
 0x249   : > { %v2128_v24 = vsel %vm2109_vm2, %v2095_v10, %v3539_v6  ;;  %v2129_v1 = vsel %vm2109_vm2, %v2096_v20, %v3540_v40  ;;  %v3573_v14 = vpop.permute.xlu1 %3572 }
 0x24a   : > { %v2151_v39 = vpack.c.bf16 %v2129_v1, %v2128_v24  ;;  %v3608_v57 = vpop.permute.xlu2 %3607  ;;  %v3575_v13 = vunpack.i.h.bf16 %v3573_v14  ;;  %v3574_v50 = vunpack.i.l.bf16 %v3573_v14 }
 0x24b   : > { %v3610_v10 = vunpack.i.h.bf16 %v3608_v57  ;;  %v3609_v20 = vunpack.i.l.bf16 %v3608_v57 }
 0x24c   : > { %2497 = vmatmul.msk.bf16.gmra.mxu2 %vm2198_vm3, %v2151_v39  ;;  %2489 = vmatmul.msk.bf16.gmra.mxu0 %vm2198_vm3, %v2143_v30  ;;  %v2072_v56 = vsel %vm2043_vm1, %v5789_v44, %v3574_v50  ;;  %v2073_v28 = vsel %vm2043_vm1, %v5793_v41, %v3575_v13 }
 0x24e   : > { %v3553_v5 = vpop.permute.xlu0 %3552 }
 0x24f   : > { %v3555_v54 = vunpack.i.h.bf16 %v3553_v5  ;;  %v3554_v16 = vunpack.i.l.bf16 %v3553_v5 }
 0x251   : > { %v2087_v46 = vsel %vm2076_vm0, %v5798_v58, %v3554_v16  ;;  %v2088_v18 = vsel %vm2076_vm0, %v5802_v35, %v3555_v54  ;;  %v3588_v17 = vpop.permute.xlu1 %3587 }
 0x252   : > { %v2120_v62 = vsel %vm2109_vm2, %v2087_v46, %v3564_v52  ;;  %v2121_v42 = vsel %vm2109_vm2, %v2088_v18, %v3565_v34  ;;  %v3590_v48 = vunpack.i.h.bf16 %v3588_v17  ;;  %v3589_v32 = vunpack.i.l.bf16 %v3588_v17 }
 0x253   : > { %v2147_v55 = vpack.c.bf16 %v2121_v42, %v2120_v62 }
 0x255   : > { %2493 = vmatmul.msk.bf16.gmra.mxu1 %vm2198_vm3, %v2147_v55 }
 0x256   : > { %v3568_v45 = vpop.permute.xlu0 %3567 }
 0x257   : > { %v3570_v23 = vunpack.i.h.bf16 %v3568_v45  ;;  %v3569_v63 = vunpack.i.l.bf16 %v3568_v45 }
 0x259   : > { %v2064_v58 = vsel %vm2043_vm1, %v5571_v53, %v3569_v63  ;;  %v2065_v35 = vsel %vm2043_vm1, %v5574_v12, %v3570_v23  ;;  %v3603_v36 = vpop.permute.xlu1 %3602  ;;  %v5931_v12 = vpop.permute.xlu2 %3622 }
 0x25a   : > { %v2097_v7 = vsel %vm2076_vm0, %v2064_v58, %v3579_v33  ;;  %v2098_v3 = vsel %vm2076_vm0, %v2065_v35, %v3580_v61  ;;  %v3605_v54 = vunpack.i.h.bf16 %v3603_v36  ;;  %v3604_v16 = vunpack.i.l.bf16 %v3603_v36 }
 0x25b   : > { %v2130_v19 = vsel %vm2109_vm2, %v2097_v7, %v3589_v32  ;;  %v2131_v51 = vsel %vm2109_vm2, %v2098_v3, %v3590_v48  ;;  %v3625_v7 = vunpack.i.h.bf16 %v5931_v12 }
 0x25c   : > { %v2152_v4 = vpack.c.bf16 %v2131_v51, %v2130_v19 }
 0x25e   : > { %v3583_v8 = vpop.permute.xlu0 %3582  ;;  %2498 = vmatmul.msk.bf16.gmra.mxu2 %vm2198_vm3, %v2152_v4 }
 0x25f   : > { %v3585_v53 = vunpack.i.h.bf16 %v3583_v8  ;;  %v3584_v47 = vunpack.i.l.bf16 %v3583_v8 }
 0x261   : > { %v2105_v30 = vsel %vm2076_vm0, %v2072_v56, %v3584_v47  ;;  %v2106_v38 = vsel %vm2076_vm0, %v2073_v28, %v3585_v53  ;;  %v3618_v2 = vpop.permute.xlu1 %3617  ;;  %v3638_v60 = vpop.permute.xlu2 %3637 }
 0x262   : > { %v2138_v15 = vsel %vm2109_vm2, %v2105_v30, %v3594_v31  ;;  %v2139_v40 = vsel %vm2109_vm2, %v2106_v38, %v3595_v26  ;;  %v3620_v57 = vunpack.i.h.bf16 %v3618_v2  ;;  %v3619_v45 = vunpack.i.l.bf16 %v3618_v2 }
 0x263   : > { %v2156_v6 = vpack.c.bf16 %v2139_v40, %v2138_v15  ;;  %v3640_v23 = vunpack.i.h.bf16 %v3638_v60  ;;  %v3639_v63 = vunpack.i.l.bf16 %v3638_v60  ;;  %v3624_v31 = vunpack.i.l.bf16 %v5931_v12 }
 0x264   : > { %v2067_v36 = vsel %vm2043_vm1, %v5761_v49, %v3620_v57 }
 0x265   : > { %2502 = vmatmul.msk.bf16.gmra.mxu3 %vm2198_vm3, %v2156_v6  ;;  %v2074_v12 = vsel %vm2043_vm1, %v5743_v0, %v3624_v31 }
 0x266   : > { %v3598_v24 = vpop.permute.xlu0 %3597 }
 0x267   : > { %v3600_v1 = vunpack.i.h.bf16 %v3598_v24  ;;  %v3599_v44 = vunpack.i.l.bf16 %v3598_v24 }
 0x269   : > { %v2081_v41 = vsel %vm2076_vm0, %v5772_v11, %v3599_v44  ;;  %v2082_v14 = vsel %vm2076_vm0, %v5776_v25, %v3600_v1  ;;  %v3633_v39 = vpop.permute.xlu1 %3632  ;;  %v2089_v11 = vsel %vm2076_vm0, %v5703_v27, %v3604_v16  ;;  %v2090_v25 = vsel %vm2076_vm0, %v5706_v9, %v3605_v54  ;;  %v3653_v33 = vpop.permute.xlu2 %3652 }
 0x26a   : > { %v2114_v34 = vsel %vm2109_vm2, %v2081_v41, %v3609_v20  ;;  %v2115_v52 = vsel %vm2109_vm2, %v2082_v14, %v3610_v10  ;;  %v3655_v32 = vunpack.i.h.bf16 %v3653_v33  ;;  %v3654_v58 = vunpack.i.l.bf16 %v3653_v33 }
 0x26b   : > { %v2144_v5 = vpack.c.bf16 %v2115_v52, %v2114_v34  ;;  %v2066_v9 = vsel %vm2043_vm1, %v5757_v29, %v3619_v45  ;;  %v3635_v53 = vunpack.i.h.bf16 %v3633_v39  ;;  %v3634_v47 = vunpack.i.l.bf16 %v3633_v39  ;;  %v5996_v52 = vld [vmem:[%s6109_s5] ss:$0 sm:$0xff] }
 0x26c   : > { %v2091_v29 = vsel %vm2076_vm0, %v5816_v43, %v3654_v58  ;;  %v2092_v49 = vsel %vm2076_vm0, %v5820_v59, %v3655_v32  ;;  %v2075_v43 = vsel %vm2043_vm1, %v5747_v22, %v3625_v7 }
 0x26d   : > { %2490 = vmatmul.msk.bf16.gmra.mxu0 %vm2198_vm3, %v2144_v5  ;;  %v2107_v59 = vsel %vm2076_vm0, %v2074_v12, %v3634_v47  ;;  %v2108_v40 = vsel %vm2076_vm0, %v2075_v43, %v3635_v53 }
 0x26e   : > { %v3613_v46 = vpop.permute.xlu0 %3612 }
 0x26f   : > { %v3615_v18 = vunpack.i.h.bf16 %v3613_v46  ;;  %v3614_v17 = vunpack.i.l.bf16 %v3613_v46 }
 0x271   : > { %v2122_v62 = vsel %vm2109_vm2, %v2089_v11, %v3614_v17  ;;  %v2123_v42 = vsel %vm2109_vm2, %v2090_v25, %v3615_v18  ;;  %v3648_v55 = vpop.permute.xlu1 %3647 }
 0x272   : > { %v2148_v61 = vpack.c.bf16 %v2123_v42, %v2122_v62  ;;  %v3650_v24 = vunpack.i.h.bf16 %v3648_v55  ;;  %v3649_v1 = vunpack.i.l.bf16 %v3648_v55 }
 0x274   : > { %2494 = vmatmul.msk.bf16.gmra.mxu1 %vm2198_vm3, %v2148_v61  ;;  %v2083_v41 = vsel %vm2076_vm0, %v5671_v37, %v3649_v1  ;;  %v2084_v14 = vsel %vm2076_vm0, %v5674_v21, %v3650_v24 }
 0x276   : > { %v3628_v48 = vpop.permute.xlu0 %3627 }
 0x277   : > { %v3630_v27 = vunpack.i.h.bf16 %v3628_v48  ;;  %v3629_v35 = vunpack.i.l.bf16 %v3628_v48 }
 0x279   : > { %v2099_v3 = vsel %vm2076_vm0, %v2066_v9, %v3629_v35  ;;  %v2100_v19 = vsel %vm2076_vm0, %v2067_v36, %v3630_v27  ;;  %v3663_v51 = vpop.permute.xlu1 %3662 }
 0x27a   : > { %v2132_v13 = vsel %vm2109_vm2, %v2099_v3, %v3639_v63  ;;  %v2133_v50 = vsel %vm2109_vm2, %v2100_v19, %v3640_v23  ;;  %v3665_v4 = vunpack.i.h.bf16 %v3663_v51  ;;  %v3664_v26 = vunpack.i.l.bf16 %v3663_v51 }
 0x27b   : > { %v2153_v8 = vpack.c.bf16 %v2133_v50, %v2132_v13 }
 0x27c   : > { %v2124_v56 = vsel %vm2109_vm2, %v2091_v29, %v3664_v26  ;;  %v2125_v28 = vsel %vm2109_vm2, %v2092_v49, %v3665_v4 }
 0x27d   : > { %2499 = vmatmul.msk.bf16.gmra.mxu2 %vm2198_vm3, %v2153_v8  ;;  %v2149_v30 = vpack.c.bf16 %v2125_v28, %v2124_v56 }
 0x27e   : > { %v3643_v38 = vpop.permute.xlu0 %3642 }
 0x27f   : > { %v3645_v2 = vunpack.i.h.bf16 %v3643_v38  ;;  %v3644_v15 = vunpack.i.l.bf16 %v3643_v38 }
 0x281   : > { %v2140_v6 = vsel %vm2109_vm2, %v2107_v59, %v3644_v15  ;;  %v2141_v10 = vsel %vm2109_vm2, %v2108_v40, %v3645_v2 }
 0x282   : > { %v2157_v20 = vpack.c.bf16 %v2141_v10, %v2140_v6 }
 0x284   : > { %2503 = vmatmul.msk.bf16.gmra.mxu3 %vm2198_vm3, %v2157_v20  ;;  %2495 = vmatmul.msk.bf16.gmra.mxu1 %vm2198_vm3, %v2149_v30 }
 0x286   : > { %v3658_v0 = vpop.permute.xlu0 %3657 }
 0x287   : > { %v3660_v22 = vunpack.i.h.bf16 %v3658_v0  ;;  %v3659_v44 = vunpack.i.l.bf16 %v3658_v0 }
 0x289   : > { %v2116_v39 = vsel %vm2109_vm2, %v2083_v41, %v3659_v44  ;;  %v2117_v60 = vsel %vm2109_vm2, %v2084_v14, %v3660_v22 }
 0x28a   : > { %v2145_v34 = vpack.c.bf16 %v2117_v60, %v2116_v39 }
 0x28c   : > { %2491 = vmatmul.msk.bf16.gmra.mxu0 %vm2198_vm3, %v2145_v34 }
 0x2ac   : > { %v2280_v5 = vpop.f32.mrf.mxu1 }
 0x2ad   : > { %v2281_v37 = vadd.f32 %v5996_v52, %v2280_v5 }
 0x2af   : > { %2348 = vst [vmem:[%s5999_s19 + $0x40] sm:$0xff] %v2281_v37 }
 0x2b0   : > { %v2300_v21 = vpop.f32.mrf.mxu2 }
 0x2b1   : > { %v2301_v54 = vadd.f32 %v5996_v52, %v2300_v21 }
 0x2b3   : > { %2356 = vst [vmem:[%s5999_s19 + $0x80] sm:$0xff] %v2301_v54 }
 0x2b4   : > { %v2282_v16 = vpop.f32.mrf.mxu1 }
 0x2b5   : > { %v2283_v46 = vadd.f32 %v5996_v52, %v2282_v16 }
 0x2b7   : > { %v2320_v18 = vpop.f32.mrf.mxu3  ;;  %2349 = vst [vmem:[%s5999_s19 + $0x48] sm:$0xff] %v2283_v46 }
 0x2b8   : > { %v2321_v17 = vadd.f32 %v5996_v52, %v2320_v18  ;;  %v2302_v11 = vpop.f32.mrf.mxu2 }
 0x2b9   : > { %v2303_v25 = vadd.f32 %v5996_v52, %v2302_v11  ;;  %v2260_v62 = vpop.f32.mrf.mxu0 }
 0x2ba   : > { %2364 = vst [vmem:[%s5999_s19 + $0xc0] sm:$0xff] %v2321_v17  ;;  %v2261_v42 = vadd.f32 %v5996_v52, %v2260_v62 }
 0x2bb   : > { %2357 = vst [vmem:[%s5999_s19 + $0x88] sm:$0xff] %v2303_v25 }
 0x2bc   : > { %2340 = vst [vmem:[%s5999_s19] sm:$0xff] %v2261_v42 }
 0x2bf   : > { %v2322_v55 = vpop.f32.mrf.mxu3 }
 0x2c0   : > { %v2323_v61 = vadd.f32 %v5996_v52, %v2322_v55 }
 0x2c1   : > { %v2262_v33 = vpop.f32.mrf.mxu0 }
 0x2c2   : > { %2365 = vst [vmem:[%s5999_s19 + $0xc8] sm:$0xff] %v2323_v61  ;;  %v2263_v57 = vadd.f32 %v5996_v52, %v2262_v33 }
 0x2c4   : > { %2341 = vst [vmem:[%s5999_s19 + $0x8] sm:$0xff] %v2263_v57 }
 0x2c9   : > { %v2325_v45 = vpop.f32.mrf.mxu3  ;;  %v2265_v23 = vpop.f32.mrf.mxu0 }
 0x2ca   : > { %v2326_v63 = vadd.f32 %v5996_v52, %v2325_v45  ;;  %v2266_v48 = vadd.f32 %v5996_v52, %v2265_v23 }
 0x2cc   : > { %2366 = vst [vmem:[%s5999_s19 + $0xd0] sm:$0xff] %v2326_v63 }
 0x2cd   : > { %2342 = vst [vmem:[%s5999_s19 + $0x10] sm:$0xff] %v2266_v48 }
 0x2cf   : > { %v2305_v32 = vpop.f32.mrf.mxu2 }
 0x2d0   : > { %v2306_v58 = vadd.f32 %v5996_v52, %v2305_v32 }
 0x2d1   : > { %v2327_v27 = vpop.f32.mrf.mxu3  ;;  %v2267_v35 = vpop.f32.mrf.mxu0 }
 0x2d2   : > { %2358 = vst [vmem:[%s5999_s19 + $0x90] sm:$0xff] %v2306_v58  ;;  %v2285_v9 = vpop.f32.mrf.mxu1  ;;  %v2328_v36 = vadd.f32 %v5996_v52, %v2327_v27  ;;  %v2268_v7 = vadd.f32 %v5996_v52, %v2267_v35 }
 0x2d3   : > { %v2286_v3 = vadd.f32 %v5996_v52, %v2285_v9 }
 0x2d4   : > { %2367 = vst [vmem:[%s5999_s19 + $0xd8] sm:$0xff] %v2328_v36 }
 0x2d5   : > { %2350 = vst [vmem:[%s5999_s19 + $0x50] sm:$0xff] %v2286_v3 }
 0x2d6   : > { %2343 = vst [vmem:[%s5999_s19 + $0x18] sm:$0xff] %v2268_v7 }
 0x2d7   : > { %v2307_v19 = vpop.f32.mrf.mxu2 }
 0x2d8   : > { %v2308_v51 = vadd.f32 %v5996_v52, %v2307_v19 }
 0x2da   : > { %2359 = vst [vmem:[%s5999_s19 + $0x98] sm:$0xff] %v2308_v51  ;;  %v2287_v13 = vpop.f32.mrf.mxu1 }
 0x2db   : > { %v2288_v50 = vadd.f32 %v5996_v52, %v2287_v13 }
 0x2dd   : > { %2351 = vst [vmem:[%s5999_s19 + $0x58] sm:$0xff] %v2288_v50 }
 0x2e1   : > { %v2310_v4 = vpop.f32.mrf.mxu2 }
 0x2e2   : > { %v2311_v26 = vadd.f32 %v5996_v52, %v2310_v4 }
 0x2e4   : > { %2360 = vst [vmem:[%s5999_s19 + $0xa0] sm:$0xff] %v2311_v26 }
 0x2e8   : > { %v2330_v31 = vpop.f32.mrf.mxu3 }
 0x2e9   : > { %v2331_v29 = vadd.f32 %v5996_v52, %v2330_v31  ;;  %v2312_v49 = vpop.f32.mrf.mxu2 }
 0x2ea   : > { %v2270_v8 = vpop.f32.mrf.mxu0  ;;  %v2313_v53 = vadd.f32 %v5996_v52, %v2312_v49 }
 0x2eb   : > { %2368 = vst [vmem:[%s5999_s19 + $0xe0] sm:$0xff] %v2331_v29  ;;  %v2271_v47 = vadd.f32 %v5996_v52, %v2270_v8 }
 0x2ec   : > { %2361 = vst [vmem:[%s5999_s19 + $0xa8] sm:$0xff] %v2313_v53 }
 0x2ed   : > { %2344 = vst [vmem:[%s5999_s19 + $0x20] sm:$0xff] %v2271_v47 }
 0x2f0   : > { %v2332_v56 = vpop.f32.mrf.mxu3 }
 0x2f1   : > { %v2333_v28 = vadd.f32 %v5996_v52, %v2332_v56  ;;  %v2290_v30 = vpop.f32.mrf.mxu1 }
 0x2f2   : > { %v2291_v38 = vadd.f32 %v5996_v52, %v2290_v30  ;;  %v2272_v12 = vpop.f32.mrf.mxu0 }
 0x2f3   : > { %2369 = vst [vmem:[%s5999_s19 + $0xe8] sm:$0xff] %v2333_v28  ;;  %v2273_v43 = vadd.f32 %v5996_v52, %v2272_v12 }
 0x2f4   : > { %2352 = vst [vmem:[%s5999_s19 + $0x60] sm:$0xff] %v2291_v38 }
 0x2f5   : > { %2345 = vst [vmem:[%s5999_s19 + $0x28] sm:$0xff] %v2273_v43 }
 0x2f9   : > { %v2292_v2 = vpop.f32.mrf.mxu1 }
 0x2fa   : > { %v2293_v15 = vadd.f32 %v5996_v52, %v2292_v2 }
 0x2fc   : > { %2353 = vst [vmem:[%s5999_s19 + $0x68] sm:$0xff] %v2293_v15 }
 0x300   : > { %v2315_v59 = vpop.f32.mrf.mxu2 }
 0x301   : > { %v2316_v40 = vadd.f32 %v5996_v52, %v2315_v59  ;;  %v2295_v6 = vpop.f32.mrf.mxu1 }
 0x302   : > { %v2296_v10 = vadd.f32 %v5996_v52, %v2295_v6 }
 0x303   : > { %2362 = vst [vmem:[%s5999_s19 + $0xb0] sm:$0xff] %v2316_v40 }
 0x304   : > { %2354 = vst [vmem:[%s5999_s19 + $0x70] sm:$0xff] %v2296_v10 }
 0x307   : > { %v2335_v20 = vpop.f32.mrf.mxu3 }
 0x308   : > { %v2336_v24 = vadd.f32 %v5996_v52, %v2335_v20  ;;  %v2317_v1 = vpop.f32.mrf.mxu2 }
 0x309   : > { %v2318_v0 = vadd.f32 %v5996_v52, %v2317_v1  ;;  %v2275_v22 = vpop.f32.mrf.mxu0  ;;  %v2297_v44 = vpop.f32.mrf.mxu1 }
 0x30a   : > { %2370 = vst [vmem:[%s5999_s19 + $0xf0] sm:$0xff] %v2336_v24  ;;  %v2276_v41 = vadd.f32 %v5996_v52, %v2275_v22  ;;  %v2298_v14 = vadd.f32 %v5996_v52, %v2297_v44 }
 0x30b   : > { %2363 = vst [vmem:[%s5999_s19 + $0xb8] sm:$0xff] %v2318_v0 }
 0x30c   : > { %2346 = vst [vmem:[%s5999_s19 + $0x30] sm:$0xff] %v2276_v41 }
 0x30d   : > { %2355 = vst [vmem:[%s5999_s19 + $0x78] sm:$0xff] %v2298_v14 }
 0x30f   : > { %v2337_v39 = vpop.f32.mrf.mxu3 }
 0x310   : > { %v2338_v60 = vadd.f32 %v5996_v52, %v2337_v39 }
 0x311   : > { %v2277_v34 = vpop.f32.mrf.mxu0 }
 0x312   : > { %2371 = vst [vmem:[%s5999_s19 + $0xf8] sm:$0xff] %v2338_v60  ;;  %v2278_v5 = vadd.f32 %v5996_v52, %v2277_v34 }
 0x314   : > { %2347 = vst [vmem:[%s5999_s19 + $0x38] sm:$0xff] %v2278_v5 }
 0x315   : > { %3707 = shalt.err (!%p3704_p5)
}
 0x316   : > { %s3768_s27 = smov 128  }
 0x317   : > { %2962 = dma.vmem_to_hbm [thread:$0]  (%p3844_p4), %s2388_s11, 4096, %s2390_s13, %s2373_s24, %s3768_s27, %s3768_s27, %s3760_s12  }
 0x318 PF: > { %p2968_p6 = scmp.ge.s32.totalorder %s3758_s26, 2  ;;  %s2404_s19 = sand.u32 1, %s3738_s21  }
 0x319   : > { %s2405_s8 = scalar_lea.sflag [#allocation3], %s2404_s19 }
 0x31a   : > { %p2965_p7 = pnand %p2968_p6, %p3851_p8 }
 0x31c   : > { %p2966_p9 = pneg %p2965_p7 }
 0x31e   : > { %3733 = dma.done.wait (%p2966_p9), %s2405_s8, 4096  }
 0x31f   : > { %3735 = vsyncadd (%p2966_p9), %s2405_s8, 4294963200  ;;  %s19_s26 = sadd.s32 1, %s3758_s26   ;;  %s6440_s21 = smov %s3742_s22 }
 0x320   : > { %p16_p10 = scmp.ge.s32.totalorder %s19_s26, 4   ;;  %s6441_s22 = smov %s3746_s23 }
 0x321   : > { %s6442_s23 = smov %s3857_s10  ;;  %s6443_s24 = smov %s3754_s25 }
 0x322   : > { %s6444_s25 = smov %s6446_s29  ;;  %18 = sbr.rel (!%p16_p10) target bundleno = 4 (0x4), region = 80 }
 0x327   :  { %2411 = vsyncpa [#allocation3], 1 }
 0x328   :  { %2413 = vsyncpa [#allocation3 + $0x1], 1 }

</bundles_post_ra>
